<compile_context>
chip_gen: v6e
topology: v6e:2x2x1
jax: 0.10.0
libtpu: 0.0.40
codegen_flags: <defaults>
</compile_context>

<pallas_src>
import functools

import jax
import jax.numpy as jnp
from jax.experimental import pallas as pl
from jax.experimental.pallas import tpu as pltpu

_C1, _C2, _C3 = 32, 64, 64          # conv channel widths (Mnih architecture)


def _conv_out(n, f, s):
    return 1 + (n - f) // s


# ----------------------------------------------------------------------------
# Fused kernel: conv1..conv3 + linear1 + fused dueling head for one batch tile
# ----------------------------------------------------------------------------
def _ddqn_fused_kernel(
    p1_ref, w1_ref, b1_ref,          # conv1 patches + im2col weight / bias
    w2_ref, b2_ref,                  # conv2: K-concatenated (512, 64) weight
    w3_ref, b3_ref,                  # conv3: K-concatenated (576, 64) weight
    wl1_ref, bl1_ref,                # linear1 (rows regrouped to (pos, chan))
    wh1_ref, bh1_ref,                # head L1: [action1 | state1] -> (512,512)
    wh2_ref, bh2_ref,                # head L2: block-diag (512, 2*LANE)
    o_ref,                           # (tile_b, 2*LANE) lane-dense output
    a1_ref, col2_ref, a2_ref, col3_ref, a3_ref, flat_ref,   # VMEM scratch
    *, tile_b, h1, h2, h3, use_bf16):

    def mm(a, b):
        # bf16 MXU operands, f32 accumulation; elementwise math stays f32.
        if use_bf16:
            a = a.astype(jnp.bfloat16)
            b = b.astype(jnp.bfloat16)
        return jnp.dot(a, b, preferred_element_type=jnp.float32)

    # --- conv1: stride == kernel, patches prepared by the wrapper -> 1 GEMM --
    a1_ref[...] = jnp.maximum(mm(p1_ref[...], w1_ref[...]) + b1_ref[...], 0.0)

    # --- conv2: exact im2col via strided sublane reads, then ONE K=512 GEMM --
    # a1 rows are ordered (b, oh1, ow1); for a tap (di, dj) the h2 output
    # columns of one output image-row are a stride-2 sublane slice of a1.
    for di in range(4):
        for dj in range(4):
            t = di * 4 + dj
            for b in range(tile_b):
                for oh in range(h2):
                    src = (b * h1 + 2 * oh + di) * h1 + dj
                    dst = (b * h2 + oh) * h2
                    col2_ref[dst:dst + h2, t * _C1:(t + 1) * _C1] = (
                        a1_ref[pl.ds(src, h2, stride=2), :])
    a2_ref[...] = jnp.maximum(mm(col2_ref[...], w2_ref[...]) + b2_ref[...], 0.0)

    # --- conv3 (stride 1): contiguous sublane reads, then ONE K=576 GEMM -----
    for di in range(3):
        for dj in range(3):
            t = di * 3 + dj
            for b in range(tile_b):
                for oh in range(h3):
                    src = (b * h2 + oh + di) * h2 + dj
                    dst = (b * h3 + oh) * h3
                    col3_ref[dst:dst + h3, t * _C2:(t + 1) * _C2] = (
                        a2_ref[pl.ds(src, h3), :])
    a3_ref[...] = jnp.maximum(mm(col3_ref[...], w3_ref[...]) + b3_ref[...], 0.0)

    # --- flatten to (tile_b, P*64) in (pos, chan) order (wl1 rows regrouped) -
    n_pos = h3 * h3
    if n_pos == 1:
        flat_ref[...] = a3_ref[...]
    else:
        for p in range(n_pos):
            flat_ref[:, p * _C3:(p + 1) * _C3] = (
                a3_ref[pl.ds(p, tile_b, stride=n_pos), :])

    # --- linear1 + fused dueling head (2 GEMMs total) -------------------------
    h = jnp.maximum(mm(flat_ref[...], wl1_ref[...]) + bl1_ref[...], 0.0)
    g = jnp.maximum(mm(h, wh1_ref[...]) + bh1_ref[...], 0.0)   # [act1 | st1]
    o_ref[...] = (mm(g, wh2_ref[...]) + bh2_ref[...]).astype(o_ref.dtype)


# ----------------------------------------------------------------------------
# Setup-time helpers (trace-time weight re-layouts, no per-layer HBM traffic)
# ----------------------------------------------------------------------------
def _conv1_patches(x_nchw, k, s):
    """stride==kernel conv1: im2col is a pure reshape/transpose of the input.

    Rows ordered (b, oh, ow); columns ordered (di, dj, c)."""
    assert k == s, "conv1 patch reshape requires stride == kernel"
    b, c, h, w = x_nchw.shape
    ho, wo = _conv_out(h, k, s), _conv_out(w, k, s)
    xc = x_nchw[:, :, :ho * k, :wo * k]
    x6 = xc.reshape(b, c, ho, k, wo, k)
    p = jnp.transpose(x6, (0, 2, 4, 3, 5, 1))        # (b, oh, ow, di, dj, c)
    return p.reshape(b * ho * wo, k * k * c)


def _conv_weight_flat(w_oihw):
    """(Cout, Cin, kh, kw) -> (kh*kw*Cin, Cout) with row order (di, dj, cin)."""
    cout, cin, kh, kw = w_oihw.shape
    return jnp.transpose(w_oihw, (2, 3, 1, 0)).reshape(kh * kw * cin, cout)


def prepare_kernel_operands(params, *, input_channels, input_size, output_size):
    h1 = _conv_out(input_size, 4, 4)
    h2 = _conv_out(h1, 4, 2)
    h3 = _conv_out(h2, 3, 1)
    n_pos = h3 * h3
    lane = 128 * ((output_size + 127) // 128)

    # linear1 rows come in NCHW-flatten order (c*P + p); regroup to (p*64 + c)
    # so the kernel's (b, oh3, ow3, c)-ordered flatten can hit it directly.
    wl1 = jnp.transpose(params["lin1_w"].reshape(_C3, n_pos, 512), (1, 0, 2))
    wl1 = wl1.reshape(n_pos * _C3, 512)

    # Fused dueling head.
    wh1 = jnp.concatenate([params["act1_w"], params["st1_w"]], axis=1)   # (512,512)
    bh1 = jnp.concatenate([params["act1_b"], params["st1_b"]])[None, :]  # (1,512)

    wh2 = jnp.zeros((512, 2 * lane), jnp.float32)
    wh2 = wh2.at[:256, :output_size].set(params["act2_w"])               # action block
    wh2 = wh2.at[256:, lane:].set(jnp.tile(params["st2_w"], (1, lane)))  # state block
    bh2 = jnp.zeros((1, 2 * lane), jnp.float32)
    bh2 = bh2.at[:, :output_size].set(params["act2_b"][None, :])
    bh2 = bh2.at[:, lane:].set(params["st2_b"][0])

    ops = dict(
        w1=_conv_weight_flat(params["conv1_w"]),      # (16*C, 32)
        b1=params["conv1_b"][None, :],
        w2=_conv_weight_flat(params["conv2_w"]),      # (512, 64)
        b2=params["conv2_b"][None, :],
        w3=_conv_weight_flat(params["conv3_w"]),      # (576, 64)
        b3=params["conv3_b"][None, :],
        wl1=wl1, bl1=params["lin1_b"][None, :],
        wh1=wh1, bh1=bh1, wh2=wh2, bh2=bh2,
    )
    cfg = dict(H1=h1, H2=h2, H3=h3, P=n_pos, LANE=lane)
    return ops, cfg


# ----------------------------------------------------------------------------
# Public forward: one XLA layout transform + one pallas_call + cheap epilogue
# ----------------------------------------------------------------------------
def make_ddqn_forward(params, *, batch, input_channels, input_size, output_size,
                      use_bf16=False, tile_batch=None):
    ops, cfg = prepare_kernel_operands(
        params, input_channels=input_channels, input_size=input_size,
        output_size=output_size)
    h1, h2, h3 = cfg["H1"], cfg["H2"], cfg["H3"]
    n_pos, lane = cfg["P"], cfg["LANE"]
    a_dim = output_size

    tile_b = batch if tile_batch is None else tile_batch
    assert batch % tile_b == 0, "tile_batch must divide batch"
    grid_b = batch // tile_b
    if grid_b > 1:
        # (8,128) rule on the output block's sublane dim when actually tiled.
        assert tile_b % 8 == 0, "use a tile_batch that is a multiple of 8"

    m1 = tile_b * h1 * h1
    m2 = tile_b * h2 * h2
    m3 = tile_b * h3 * h3
    k1 = 16 * input_channels

    kernel = functools.partial(
        _ddqn_fused_kernel, tile_b=tile_b, h1=h1, h2=h2, h3=h3,
        use_bf16=use_bf16)

    def _full(arr):          # whole-array (weight) block, constant index_map
        return pl.BlockSpec(arr.shape, lambda i: (0, 0))

    grid_spec = pltpu.PrefetchScalarGridSpec(
        num_scalar_prefetch=0,
        grid=(grid_b,),                               # batch tiles, "parallel"
        in_specs=[
            pl.BlockSpec((m1, k1), lambda i: (i, 0)),  # conv1 patches (batch tile)
            _full(ops["w1"]), _full(ops["b1"]),
            _full(ops["w2"]), _full(ops["b2"]),
            _full(ops["w3"]), _full(ops["b3"]),
            _full(ops["wl1"]), _full(ops["bl1"]),
            _full(ops["wh1"]), _full(ops["bh1"]),
            _full(ops["wh2"]), _full(ops["bh2"]),
        ],
        out_specs=pl.BlockSpec((tile_b, 2 * lane), lambda i: (i, 0)),
        scratch_shapes=[
            pltpu.VMEM((m1, _C1), jnp.float32),             # a1
            pltpu.VMEM((m2, 16 * _C1), jnp.float32),        # conv2 im2col slab
            pltpu.VMEM((m2, _C2), jnp.float32),             # a2
            pltpu.VMEM((m3, 9 * _C2), jnp.float32),         # conv3 im2col slab
            pltpu.VMEM((m3, _C3), jnp.float32),             # a3
            pltpu.VMEM((tile_b, n_pos * _C3), jnp.float32),  # flattened features
        ],
    )

    call = pl.pallas_call(
        kernel,
        grid_spec=grid_spec,
        out_shape=jax.ShapeDtypeStruct((batch, 2 * lane), jnp.float32),
        compiler_params=pltpu.CompilerParams(
            dimension_semantics=("parallel",),
            vmem_limit_bytes=64 * 1024 * 1024),
    )

    @jax.jit
    def forward(x_nchw):
        p1 = _conv1_patches(x_nchw, 4, 4)            # single XLA transpose
        out = call(p1, ops["w1"], ops["b1"], ops["w2"], ops["b2"],
                   ops["w3"], ops["b3"], ops["wl1"], ops["bl1"],
                   ops["wh1"], ops["bh1"], ops["wh2"], ops["bh2"])
        a = out[:, :a_dim]                            # action values
        s = out[:, lane:lane + 1]                     # state value (lane-tiled)
        # torch semantics: x_action - torch.mean(x_action)  (GLOBAL mean) + state.
        # Done here (trivial on (B, A)) so batch tiling needs no cross-tile
        # reduction inside the kernel.
        return a - jnp.mean(a) + s

    return forward


# ----------------------------------------------------------------------------
# Parameter construction (deterministic, synthetic) — PyTorch layouts
# ----------------------------------------------------------------------------
def init_ddqn_params(key, input_channels, input_size, output_size):
    cl = _conv_out(_conv_out(_conv_out(input_size, 4, 4), 4, 2), 3, 1)
    conv_feat = cl * cl * 64

    def lin(key, fan_in, fan_out):
        k1, k2 = jax.random.split(key)
        scale = 1.0 / jnp.sqrt(fan_in)
        w = jax.random.uniform(k1, (fan_in, fan_out), jnp.float32, -scale, scale)
        b = jax.random.uniform(k2, (fan_out,), jnp.float32, -scale, scale)
        return w, b

    def conv(key, cin, cout, k):
        k1, k2 = jax.random.split(key)
        fan_in = cin * k * k
        scale = 1.0 / jnp.sqrt(fan_in)
        w = jax.random.uniform(k1, (cout, cin, k, k), jnp.float32, -scale, scale)
        b = jax.random.uniform(k2, (cout,), jnp.float32, -scale, scale)
        return w, b

    keys = jax.random.split(key, 8)
    p = {}
    p["conv1_w"], p["conv1_b"] = conv(keys[0], input_channels, 32, 4)
    p["conv2_w"], p["conv2_b"] = conv(keys[1], 32, 64, 4)
    p["conv3_w"], p["conv3_b"] = conv(keys[2], 64, 64, 3)
    p["lin1_w"], p["lin1_b"] = lin(keys[3], conv_feat, 512)
    p["act1_w"], p["act1_b"] = lin(keys[4], 512, 256)
    p["act2_w"], p["act2_b"] = lin(keys[5], 256, output_size)
    p["st1_w"], p["st1_b"] = lin(keys[6], 512, 256)
    p["st2_w"], p["st2_b"] = lin(keys[7], 256, 1)
    return p


# ----------------------------------------------------------------------------
# Pure-JAX reference (mirrors the PyTorch DDQN.forward exactly)
# ----------------------------------------------------------------------------
def ddqn_reference(params, x_nchw):
    def conv(x, w, b, s):
        y = jax.lax.conv_general_dilated(
            x, w, window_strides=(s, s), padding="VALID",
            dimension_numbers=("NCHW", "OIHW", "NCHW"))
        return y + b[None, :, None, None]

    x = jax.nn.relu(conv(x_nchw, params["conv1_w"], params["conv1_b"], 4))
    x = jax.nn.relu(conv(x, params["conv2_w"], params["conv2_b"], 2))
    x = jax.nn.relu(conv(x, params["conv3_w"], params["conv3_b"], 1))
    x = x.reshape(x.shape[0], -1)                     # NCHW flatten (torch .view)
    x = jax.nn.relu(x @ params["lin1_w"] + params["lin1_b"])
    a = jax.nn.relu(x @ params["act1_w"] + params["act1_b"])
    a = a @ params["act2_w"] + params["act2_b"]
    a = a - jnp.mean(a)                               # torch.mean over whole tensor
    s = jax.nn.relu(x @ params["st1_w"] + params["st1_b"])
    s = s @ params["st2_w"] + params["st2_b"]
    return a + s


if __name__ == "__main__":
    # batch=2, 4 input channels, 32x32 image (smallest valid for this conv
    # stack: conv outputs 8 -> 3 -> 1), 6 actions.  NOTE: for real RL training
    # batch many states per call (M >= 128) -- the kernel cost is nearly flat
    # in batch up to that point.
    B, C, S, A = 2, 4, 32, 6

    key = jax.random.PRNGKey(0)
    pkey, xkey = jax.random.split(key)
    params = init_ddqn_params(pkey, C, S, A)
    x = jax.random.normal(xkey, (B, C, S, S), dtype=jnp.float32)

    ref = jax.block_until_ready(ddqn_reference(params, x))

    # Strict-f32 path.
    fwd_f32 = make_ddqn_forward(params, batch=B, input_channels=C,
                                input_size=S, output_size=A, use_bf16=False)
    out = jax.block_until_ready(fwd_f32(x))
    assert out.shape == (B, A), out.shape
    assert jnp.allclose(out, ref, atol=2e-4, rtol=2e-4), (out, ref)

    # bf16-MXU path (f32 accumulation) -- the v5e/v6e throughput configuration.
    fwd_bf16 = make_ddqn_forward(params, batch=B, input_channels=C,
                                 input_size=S, output_size=A, use_bf16=True)
    out_bf = jax.block_until_ready(fwd_bf16(x))
    assert out_bf.shape == (B, A), out_bf.shape
    assert jnp.allclose(out_bf, ref, atol=5e-2, rtol=5e-2), (out_bf, ref)

    print("KERNEL_OK")
</pallas_src>

<mosaic_0001>
module attributes {stable_mosaic.version = 11 : i64} {
  func.func @_ddqn_fused_kernel(%arg0: i32, %arg1: memref<128x64xf32, #tpu.memory_space<vmem>>, %arg2: memref<64x32xf32, #tpu.memory_space<vmem>>, %arg3: memref<1x32xf32, #tpu.memory_space<vmem>>, %arg4: memref<512x64xf32, #tpu.memory_space<vmem>>, %arg5: memref<1x64xf32, #tpu.memory_space<vmem>>, %arg6: memref<576x64xf32, #tpu.memory_space<vmem>>, %arg7: memref<1x64xf32, #tpu.memory_space<vmem>>, %arg8: memref<64x512xf32, #tpu.memory_space<vmem>>, %arg9: memref<1x512xf32, #tpu.memory_space<vmem>>, %arg10: memref<512x512xf32, #tpu.memory_space<vmem>>, %arg11: memref<1x512xf32, #tpu.memory_space<vmem>>, %arg12: memref<512x256xf32, #tpu.memory_space<vmem>>, %arg13: memref<1x256xf32, #tpu.memory_space<vmem>>, %arg14: memref<2x256xf32, #tpu.memory_space<vmem>>, %arg15: memref<128x32xf32, #tpu.memory_space<vmem>>, %arg16: memref<18x512xf32, #tpu.memory_space<vmem>>, %arg17: memref<18x64xf32, #tpu.memory_space<vmem>>, %arg18: memref<2x576xf32, #tpu.memory_space<vmem>>, %arg19: memref<2x64xf32, #tpu.memory_space<vmem>>, %arg20: memref<2x64xf32, #tpu.memory_space<vmem>>) attributes {dimension_semantics = [#tpu.dimension_semantics<parallel>], iteration_bounds = array<i64: 1>, scalar_prefetch = 0 : i64, scratch_operands = 6 : i64, tpu.core_type = #tpu.core_type<tc>, window_params = [{transform_indices = @transform_0, window_bounds = array<i64: 128, 64>}, {pipeline_mode = #tpu.pipeline_mode<synchronous>, transform_indices = @transform_1, window_bounds = array<i64: 64, 32>}, {pipeline_mode = #tpu.pipeline_mode<synchronous>, transform_indices = @transform_2, window_bounds = array<i64: 1, 32>}, {pipeline_mode = #tpu.pipeline_mode<synchronous>, transform_indices = @transform_3, window_bounds = array<i64: 512, 64>}, {pipeline_mode = #tpu.pipeline_mode<synchronous>, transform_indices = @transform_4, window_bounds = array<i64: 1, 64>}, {pipeline_mode = #tpu.pipeline_mode<synchronous>, transform_indices = @transform_5, window_bounds = array<i64: 576, 64>}, {pipeline_mode = #tpu.pipeline_mode<synchronous>, transform_indices = @transform_6, window_bounds = array<i64: 1, 64>}, {pipeline_mode = #tpu.pipeline_mode<synchronous>, transform_indices = @transform_7, window_bounds = array<i64: 64, 512>}, {pipeline_mode = #tpu.pipeline_mode<synchronous>, transform_indices = @transform_8, window_bounds = array<i64: 1, 512>}, {pipeline_mode = #tpu.pipeline_mode<synchronous>, transform_indices = @transform_9, window_bounds = array<i64: 512, 512>}, {pipeline_mode = #tpu.pipeline_mode<synchronous>, transform_indices = @transform_10, window_bounds = array<i64: 1, 512>}, {pipeline_mode = #tpu.pipeline_mode<synchronous>, transform_indices = @transform_11, window_bounds = array<i64: 512, 256>}, {pipeline_mode = #tpu.pipeline_mode<synchronous>, transform_indices = @transform_12, window_bounds = array<i64: 1, 256>}, {transform_indices = @transform_13, window_bounds = array<i64: 2, 256>}]} {
    %c0 = arith.constant 0 : index
    %c0_0 = arith.constant 0 : index
    %0 = vector.load %arg1[%c0, %c0_0] : memref<128x64xf32, #tpu.memory_space<vmem>>, vector<128x64xf32>
    %c0_1 = arith.constant 0 : index
    %c0_2 = arith.constant 0 : index
    %1 = vector.load %arg2[%c0_1, %c0_2] : memref<64x32xf32, #tpu.memory_space<vmem>>, vector<64x32xf32>
    %cst = arith.constant dense<0.000000e+00> : vector<128x32xf32>
    %2 = tpu.matmul %0, %1, %cst {dimension_numbers = #tpu.dot_dimension_numbers<[1], [0], [0], [1], [0, 0, 1, 1], [], []>} : vector<128x64xf32>, vector<64x32xf32>, vector<128x32xf32> -> vector<128x32xf32>
    %c0_3 = arith.constant 0 : index
    %c0_4 = arith.constant 0 : index
    %3 = vector.load %arg3[%c0_3, %c0_4] : memref<1x32xf32, #tpu.memory_space<vmem>>, vector<1x32xf32>
    %4 = vector.broadcast %3 : vector<1x32xf32> to vector<128x32xf32>
    %5 = arith.addf %2, %4 : vector<128x32xf32>
    %cst_5 = arith.constant 0.000000e+00 : f32
    %6 = vector.broadcast %cst_5 : f32 to vector<128x32xf32>
    %7 = arith.maximumf %5, %6 : vector<128x32xf32>
    %c0_6 = arith.constant 0 : index
    %c0_7 = arith.constant 0 : index
    %8 = vector.load %arg15[%c0_6, %c0_7] : memref<128x32xf32, #tpu.memory_space<vmem>>, vector<128x32xf32>
    tpu.vector_store %arg15[%c0_6, %c0_7], %7 {strides = array<i32>} : memref<128x32xf32, #tpu.memory_space<vmem>>, vector<128x32xf32>,
    %c0_8 = arith.constant 0 : index
    %c0_9 = arith.constant 0 : index
    %9 = tpu.strided_load %arg15[%c0_8, %c0_9] {strides = array<i32: 2, 1>} : memref<128x32xf32, #tpu.memory_space<vmem>>, vector<3x32xf32>
    %c0_10 = arith.constant 0 : index
    %c0_11 = arith.constant 0 : index
    %10 = vector.load %arg16[%c0_10, %c0_11] : memref<18x512xf32, #tpu.memory_space<vmem>>, vector<3x32xf32>
    tpu.vector_store %arg16[%c0_10, %c0_11], %9 {strides = array<i32>} : memref<18x512xf32, #tpu.memory_space<vmem>>, vector<3x32xf32>,
    %c16 = arith.constant 16 : index
    %c0_12 = arith.constant 0 : index
    %11 = tpu.strided_load %arg15[%c16, %c0_12] {strides = array<i32: 2, 1>} : memref<128x32xf32, #tpu.memory_space<vmem>>, vector<3x32xf32>
    %c3 = arith.constant 3 : index
    %c0_13 = arith.constant 0 : index
    %12 = vector.load %arg16[%c3, %c0_13] : memref<18x512xf32, #tpu.memory_space<vmem>>, vector<3x32xf32>
    tpu.vector_store %arg16[%c3, %c0_13], %11 {strides = array<i32>} : memref<18x512xf32, #tpu.memory_space<vmem>>, vector<3x32xf32>,
    %c32 = arith.constant 32 : index
    %c0_14 = arith.constant 0 : index
    %13 = tpu.strided_load %arg15[%c32, %c0_14] {strides = array<i32: 2, 1>} : memref<128x32xf32, #tpu.memory_space<vmem>>, vector<3x32xf32>
    %c6 = arith.constant 6 : index
    %c0_15 = arith.constant 0 : index
    %14 = vector.load %arg16[%c6, %c0_15] : memref<18x512xf32, #tpu.memory_space<vmem>>, vector<3x32xf32>
    tpu.vector_store %arg16[%c6, %c0_15], %13 {strides = array<i32>} : memref<18x512xf32, #tpu.memory_space<vmem>>, vector<3x32xf32>,
    %c64 = arith.constant 64 : index
    %c0_16 = arith.constant 0 : index
    %15 = tpu.strided_load %arg15[%c64, %c0_16] {strides = array<i32: 2, 1>} : memref<128x32xf32, #tpu.memory_space<vmem>>, vector<3x32xf32>
    %c9 = arith.constant 9 : index
    %c0_17 = arith.constant 0 : index
    %16 = vector.load %arg16[%c9, %c0_17] : memref<18x512xf32, #tpu.memory_space<vmem>>, vector<3x32xf32>
    tpu.vector_store %arg16[%c9, %c0_17], %15 {strides = array<i32>} : memref<18x512xf32, #tpu.memory_space<vmem>>, vector<3x32xf32>,
    %c80 = arith.constant 80 : index
    %c0_18 = arith.constant 0 : index
    %17 = tpu.strided_load %arg15[%c80, %c0_18] {strides = array<i32: 2, 1>} : memref<128x32xf32, #tpu.memory_space<vmem>>, vector<3x32xf32>
    %c12 = arith.constant 12 : index
    %c0_19 = arith.constant 0 : index
    %18 = vector.load %arg16[%c12, %c0_19] : memref<18x512xf32, #tpu.memory_space<vmem>>, vector<3x32xf32>
    tpu.vector_store %arg16[%c12, %c0_19], %17 {strides = array<i32>} : memref<18x512xf32, #tpu.memory_space<vmem>>, vector<3x32xf32>,
    %c96 = arith.constant 96 : index
    %c0_20 = arith.constant 0 : index
    %19 = tpu.strided_load %arg15[%c96, %c0_20] {strides = array<i32: 2, 1>} : memref<128x32xf32, #tpu.memory_space<vmem>>, vector<3x32xf32>
    %c15 = arith.constant 15 : index
    %c0_21 = arith.constant 0 : index
    %20 = vector.load %arg16[%c15, %c0_21] : memref<18x512xf32, #tpu.memory_space<vmem>>, vector<3x32xf32>
    tpu.vector_store %arg16[%c15, %c0_21], %19 {strides = array<i32>} : memref<18x512xf32, #tpu.memory_space<vmem>>, vector<3x32xf32>,
    %c1 = arith.constant 1 : index
    %c0_22 = arith.constant 0 : index
    %21 = tpu.strided_load %arg15[%c1, %c0_22] {strides = array<i32: 2, 1>} : memref<128x32xf32, #tpu.memory_space<vmem>>, vector<3x32xf32>
    %c0_23 = arith.constant 0 : index
    %c32_24 = arith.constant 32 : index
    %22 = vector.load %arg16[%c0_23, %c32_24] : memref<18x512xf32, #tpu.memory_space<vmem>>, vector<3x32xf32>
    tpu.vector_store %arg16[%c0_23, %c32_24], %21 {strides = array<i32>} : memref<18x512xf32, #tpu.memory_space<vmem>>, vector<3x32xf32>,
    %c17 = arith.constant 17 : index
    %c0_25 = arith.constant 0 : index
    %23 = tpu.strided_load %arg15[%c17, %c0_25] {strides = array<i32: 2, 1>} : memref<128x32xf32, #tpu.memory_space<vmem>>, vector<3x32xf32>
    %c3_26 = arith.constant 3 : index
    %c32_27 = arith.constant 32 : index
    %24 = vector.load %arg16[%c3_26, %c32_27] : memref<18x512xf32, #tpu.memory_space<vmem>>, vector<3x32xf32>
    tpu.vector_store %arg16[%c3_26, %c32_27], %23 {strides = array<i32>} : memref<18x512xf32, #tpu.memory_space<vmem>>, vector<3x32xf32>,
    %c33 = arith.constant 33 : index
    %c0_28 = arith.constant 0 : index
    %25 = tpu.strided_load %arg15[%c33, %c0_28] {strides = array<i32: 2, 1>} : memref<128x32xf32, #tpu.memory_space<vmem>>, vector<3x32xf32>
    %c6_29 = arith.constant 6 : index
    %c32_30 = arith.constant 32 : index
    %26 = vector.load %arg16[%c6_29, %c32_30] : memref<18x512xf32, #tpu.memory_space<vmem>>, vector<3x32xf32>
    tpu.vector_store %arg16[%c6_29, %c32_30], %25 {strides = array<i32>} : memref<18x512xf32, #tpu.memory_space<vmem>>, vector<3x32xf32>,
    %c65 = arith.constant 65 : index
    %c0_31 = arith.constant 0 : index
    %27 = tpu.strided_load %arg15[%c65, %c0_31] {strides = array<i32: 2, 1>} : memref<128x32xf32, #tpu.memory_space<vmem>>, vector<3x32xf32>
    %c9_32 = arith.constant 9 : index
    %c32_33 = arith.constant 32 : index
    %28 = vector.load %arg16[%c9_32, %c32_33] : memref<18x512xf32, #tpu.memory_space<vmem>>, vector<3x32xf32>
    tpu.vector_store %arg16[%c9_32, %c32_33], %27 {strides = array<i32>} : memref<18x512xf32, #tpu.memory_space<vmem>>, vector<3x32xf32>,
    %c81 = arith.constant 81 : index
    %c0_34 = arith.constant 0 : index
    %29 = tpu.strided_load %arg15[%c81, %c0_34] {strides = array<i32: 2, 1>} : memref<128x32xf32, #tpu.memory_space<vmem>>, vector<3x32xf32>
    %c12_35 = arith.constant 12 : index
    %c32_36 = arith.constant 32 : index
    %30 = vector.load %arg16[%c12_35, %c32_36] : memref<18x512xf32, #tpu.memory_space<vmem>>, vector<3x32xf32>
    tpu.vector_store %arg16[%c12_35, %c32_36], %29 {strides = array<i32>} : memref<18x512xf32, #tpu.memory_space<vmem>>, vector<3x32xf32>,
    %c97 = arith.constant 97 : index
    %c0_37 = arith.constant 0 : index
    %31 = tpu.strided_load %arg15[%c97, %c0_37] {strides = array<i32: 2, 1>} : memref<128x32xf32, #tpu.memory_space<vmem>>, vector<3x32xf32>
    %c15_38 = arith.constant 15 : index
    %c32_39 = arith.constant 32 : index
    %32 = vector.load %arg16[%c15_38, %c32_39] : memref<18x512xf32, #tpu.memory_space<vmem>>, vector<3x32xf32>
    tpu.vector_store %arg16[%c15_38, %c32_39], %31 {strides = array<i32>} : memref<18x512xf32, #tpu.memory_space<vmem>>, vector<3x32xf32>,
    %c2 = arith.constant 2 : index
    %c0_40 = arith.constant 0 : index
    %33 = tpu.strided_load %arg15[%c2, %c0_40] {strides = array<i32: 2, 1>} : memref<128x32xf32, #tpu.memory_space<vmem>>, vector<3x32xf32>
    %c0_41 = arith.constant 0 : index
    %c64_42 = arith.constant 64 : index
    %34 = vector.load %arg16[%c0_41, %c64_42] : memref<18x512xf32, #tpu.memory_space<vmem>>, vector<3x32xf32>
    tpu.vector_store %arg16[%c0_41, %c64_42], %33 {strides = array<i32>} : memref<18x512xf32, #tpu.memory_space<vmem>>, vector<3x32xf32>,
    %c18 = arith.constant 18 : index
    %c0_43 = arith.constant 0 : index
    %35 = tpu.strided_load %arg15[%c18, %c0_43] {strides = array<i32: 2, 1>} : memref<128x32xf32, #tpu.memory_space<vmem>>, vector<3x32xf32>
    %c3_44 = arith.constant 3 : index
    %c64_45 = arith.constant 64 : index
    %36 = vector.load %arg16[%c3_44, %c64_45] : memref<18x512xf32, #tpu.memory_space<vmem>>, vector<3x32xf32>
    tpu.vector_store %arg16[%c3_44, %c64_45], %35 {strides = array<i32>} : memref<18x512xf32, #tpu.memory_space<vmem>>, vector<3x32xf32>,
    %c34 = arith.constant 34 : index
    %c0_46 = arith.constant 0 : index
    %37 = tpu.strided_load %arg15[%c34, %c0_46] {strides = array<i32: 2, 1>} : memref<128x32xf32, #tpu.memory_space<vmem>>, vector<3x32xf32>
    %c6_47 = arith.constant 6 : index
    %c64_48 = arith.constant 64 : index
    %38 = vector.load %arg16[%c6_47, %c64_48] : memref<18x512xf32, #tpu.memory_space<vmem>>, vector<3x32xf32>
    tpu.vector_store %arg16[%c6_47, %c64_48], %37 {strides = array<i32>} : memref<18x512xf32, #tpu.memory_space<vmem>>, vector<3x32xf32>,
    %c66 = arith.constant 66 : index
    %c0_49 = arith.constant 0 : index
    %39 = tpu.strided_load %arg15[%c66, %c0_49] {strides = array<i32: 2, 1>} : memref<128x32xf32, #tpu.memory_space<vmem>>, vector<3x32xf32>
    %c9_50 = arith.constant 9 : index
    %c64_51 = arith.constant 64 : index
    %40 = vector.load %arg16[%c9_50, %c64_51] : memref<18x512xf32, #tpu.memory_space<vmem>>, vector<3x32xf32>
    tpu.vector_store %arg16[%c9_50, %c64_51], %39 {strides = array<i32>} : memref<18x512xf32, #tpu.memory_space<vmem>>, vector<3x32xf32>,
    %c82 = arith.constant 82 : index
    %c0_52 = arith.constant 0 : index
    %41 = tpu.strided_load %arg15[%c82, %c0_52] {strides = array<i32: 2, 1>} : memref<128x32xf32, #tpu.memory_space<vmem>>, vector<3x32xf32>
    %c12_53 = arith.constant 12 : index
    %c64_54 = arith.constant 64 : index
    %42 = vector.load %arg16[%c12_53, %c64_54] : memref<18x512xf32, #tpu.memory_space<vmem>>, vector<3x32xf32>
    tpu.vector_store %arg16[%c12_53, %c64_54], %41 {strides = array<i32>} : memref<18x512xf32, #tpu.memory_space<vmem>>, vector<3x32xf32>,
    %c98 = arith.constant 98 : index
    %c0_55 = arith.constant 0 : index
    %43 = tpu.strided_load %arg15[%c98, %c0_55] {strides = array<i32: 2, 1>} : memref<128x32xf32, #tpu.memory_space<vmem>>, vector<3x32xf32>
    %c15_56 = arith.constant 15 : index
    %c64_57 = arith.constant 64 : index
    %44 = vector.load %arg16[%c15_56, %c64_57] : memref<18x512xf32, #tpu.memory_space<vmem>>, vector<3x32xf32>
    tpu.vector_store %arg16[%c15_56, %c64_57], %43 {strides = array<i32>} : memref<18x512xf32, #tpu.memory_space<vmem>>, vector<3x32xf32>,
    %c3_58 = arith.constant 3 : index
    %c0_59 = arith.constant 0 : index
    %45 = tpu.strided_load %arg15[%c3_58, %c0_59] {strides = array<i32: 2, 1>} : memref<128x32xf32, #tpu.memory_space<vmem>>, vector<3x32xf32>
    %c0_60 = arith.constant 0 : index
    %c96_61 = arith.constant 96 : index
    %46 = vector.load %arg16[%c0_60, %c96_61] : memref<18x512xf32, #tpu.memory_space<vmem>>, vector<3x32xf32>
    tpu.vector_store %arg16[%c0_60, %c96_61], %45 {strides = array<i32>} : memref<18x512xf32, #tpu.memory_space<vmem>>, vector<3x32xf32>,
    %c19 = arith.constant 19 : index
    %c0_62 = arith.constant 0 : index
    %47 = tpu.strided_load %arg15[%c19, %c0_62] {strides = array<i32: 2, 1>} : memref<128x32xf32, #tpu.memory_space<vmem>>, vector<3x32xf32>
    %c3_63 = arith.constant 3 : index
    %c96_64 = arith.constant 96 : index
    %48 = vector.load %arg16[%c3_63, %c96_64] : memref<18x512xf32, #tpu.memory_space<vmem>>, vector<3x32xf32>
    tpu.vector_store %arg16[%c3_63, %c96_64], %47 {strides = array<i32>} : memref<18x512xf32, #tpu.memory_space<vmem>>, vector<3x32xf32>,
    %c35 = arith.constant 35 : index
    %c0_65 = arith.constant 0 : index
    %49 = tpu.strided_load %arg15[%c35, %c0_65] {strides = array<i32: 2, 1>} : memref<128x32xf32, #tpu.memory_space<vmem>>, vector<3x32xf32>
    %c6_66 = arith.constant 6 : index
    %c96_67 = arith.constant 96 : index
    %50 = vector.load %arg16[%c6_66, %c96_67] : memref<18x512xf32, #tpu.memory_space<vmem>>, vector<3x32xf32>
    tpu.vector_store %arg16[%c6_66, %c96_67], %49 {strides = array<i32>} : memref<18x512xf32, #tpu.memory_space<vmem>>, vector<3x32xf32>,
    %c67 = arith.constant 67 : index
    %c0_68 = arith.constant 0 : index
    %51 = tpu.strided_load %arg15[%c67, %c0_68] {strides = array<i32: 2, 1>} : memref<128x32xf32, #tpu.memory_space<vmem>>, vector<3x32xf32>
    %c9_69 = arith.constant 9 : index
    %c96_70 = arith.constant 96 : index
    %52 = vector.load %arg16[%c9_69, %c96_70] : memref<18x512xf32, #tpu.memory_space<vmem>>, vector<3x32xf32>
    tpu.vector_store %arg16[%c9_69, %c96_70], %51 {strides = array<i32>} : memref<18x512xf32, #tpu.memory_space<vmem>>, vector<3x32xf32>,
    %c83 = arith.constant 83 : index
    %c0_71 = arith.constant 0 : index
    %53 = tpu.strided_load %arg15[%c83, %c0_71] {strides = array<i32: 2, 1>} : memref<128x32xf32, #tpu.memory_space<vmem>>, vector<3x32xf32>
    %c12_72 = arith.constant 12 : index
    %c96_73 = arith.constant 96 : index
    %54 = vector.load %arg16[%c12_72, %c96_73] : memref<18x512xf32, #tpu.memory_space<vmem>>, vector<3x32xf32>
    tpu.vector_store %arg16[%c12_72, %c96_73], %53 {strides = array<i32>} : memref<18x512xf32, #tpu.memory_space<vmem>>, vector<3x32xf32>,
    %c99 = arith.constant 99 : index
    %c0_74 = arith.constant 0 : index
    %55 = tpu.strided_load %arg15[%c99, %c0_74] {strides = array<i32: 2, 1>} : memref<128x32xf32, #tpu.memory_space<vmem>>, vector<3x32xf32>
    %c15_75 = arith.constant 15 : index
    %c96_76 = arith.constant 96 : index
    %56 = vector.load %arg16[%c15_75, %c96_76] : memref<18x512xf32, #tpu.memory_space<vmem>>, vector<3x32xf32>
    tpu.vector_store %arg16[%c15_75, %c96_76], %55 {strides = array<i32>} : memref<18x512xf32, #tpu.memory_space<vmem>>, vector<3x32xf32>,
    %c8 = arith.constant 8 : index
    %c0_77 = arith.constant 0 : index
    %57 = tpu.strided_load %arg15[%c8, %c0_77] {strides = array<i32: 2, 1>} : memref<128x32xf32, #tpu.memory_space<vmem>>, vector<3x32xf32>
    %c0_78 = arith.constant 0 : index
    %c128 = arith.constant 128 : index
    %58 = vector.load %arg16[%c0_78, %c128] : memref<18x512xf32, #tpu.memory_space<vmem>>, vector<3x32xf32>
    tpu.vector_store %arg16[%c0_78, %c128], %57 {strides = array<i32>} : memref<18x512xf32, #tpu.memory_space<vmem>>, vector<3x32xf32>,
    %c24 = arith.constant 24 : index
    %c0_79 = arith.constant 0 : index
    %59 = tpu.strided_load %arg15[%c24, %c0_79] {strides = array<i32: 2, 1>} : memref<128x32xf32, #tpu.memory_space<vmem>>, vector<3x32xf32>
    %c3_80 = arith.constant 3 : index
    %c128_81 = arith.constant 128 : index
    %60 = vector.load %arg16[%c3_80, %c128_81] : memref<18x512xf32, #tpu.memory_space<vmem>>, vector<3x32xf32>
    tpu.vector_store %arg16[%c3_80, %c128_81], %59 {strides = array<i32>} : memref<18x512xf32, #tpu.memory_space<vmem>>, vector<3x32xf32>,
    %c40 = arith.constant 40 : index
    %c0_82 = arith.constant 0 : index
    %61 = tpu.strided_load %arg15[%c40, %c0_82] {strides = array<i32: 2, 1>} : memref<128x32xf32, #tpu.memory_space<vmem>>, vector<3x32xf32>
    %c6_83 = arith.constant 6 : index
    %c128_84 = arith.constant 128 : index
    %62 = vector.load %arg16[%c6_83, %c128_84] : memref<18x512xf32, #tpu.memory_space<vmem>>, vector<3x32xf32>
    tpu.vector_store %arg16[%c6_83, %c128_84], %61 {strides = array<i32>} : memref<18x512xf32, #tpu.memory_space<vmem>>, vector<3x32xf32>,
    %c72 = arith.constant 72 : index
    %c0_85 = arith.constant 0 : index
    %63 = tpu.strided_load %arg15[%c72, %c0_85] {strides = array<i32: 2, 1>} : memref<128x32xf32, #tpu.memory_space<vmem>>, vector<3x32xf32>
    %c9_86 = arith.constant 9 : index
    %c128_87 = arith.constant 128 : index
    %64 = vector.load %arg16[%c9_86, %c128_87] : memref<18x512xf32, #tpu.memory_space<vmem>>, vector<3x32xf32>
    tpu.vector_store %arg16[%c9_86, %c128_87], %63 {strides = array<i32>} : memref<18x512xf32, #tpu.memory_space<vmem>>, vector<3x32xf32>,
    %c88 = arith.constant 88 : index
    %c0_88 = arith.constant 0 : index
    %65 = tpu.strided_load %arg15[%c88, %c0_88] {strides = array<i32: 2, 1>} : memref<128x32xf32, #tpu.memory_space<vmem>>, vector<3x32xf32>
    %c12_89 = arith.constant 12 : index
    %c128_90 = arith.constant 128 : index
    %66 = vector.load %arg16[%c12_89, %c128_90] : memref<18x512xf32, #tpu.memory_space<vmem>>, vector<3x32xf32>
    tpu.vector_store %arg16[%c12_89, %c128_90], %65 {strides = array<i32>} : memref<18x512xf32, #tpu.memory_space<vmem>>, vector<3x32xf32>,
    %c104 = arith.constant 104 : index
    %c0_91 = arith.constant 0 : index
    %67 = tpu.strided_load %arg15[%c104, %c0_91] {strides = array<i32: 2, 1>} : memref<128x32xf32, #tpu.memory_space<vmem>>, vector<3x32xf32>
    %c15_92 = arith.constant 15 : index
    %c128_93 = arith.constant 128 : index
    %68 = vector.load %arg16[%c15_92, %c128_93] : memref<18x512xf32, #tpu.memory_space<vmem>>, vector<3x32xf32>
    tpu.vector_store %arg16[%c15_92, %c128_93], %67 {strides = array<i32>} : memref<18x512xf32, #tpu.memory_space<vmem>>, vector<3x32xf32>,
    %c9_94 = arith.constant 9 : index
    %c0_95 = arith.constant 0 : index
    %69 = tpu.strided_load %arg15[%c9_94, %c0_95] {strides = array<i32: 2, 1>} : memref<128x32xf32, #tpu.memory_space<vmem>>, vector<3x32xf32>
    %c0_96 = arith.constant 0 : index
    %c160 = arith.constant 160 : index
    %70 = vector.load %arg16[%c0_96, %c160] : memref<18x512xf32, #tpu.memory_space<vmem>>, vector<3x32xf32>
    tpu.vector_store %arg16[%c0_96, %c160], %69 {strides = array<i32>} : memref<18x512xf32, #tpu.memory_space<vmem>>, vector<3x32xf32>,
    %c25 = arith.constant 25 : index
    %c0_97 = arith.constant 0 : index
    %71 = tpu.strided_load %arg15[%c25, %c0_97] {strides = array<i32: 2, 1>} : memref<128x32xf32, #tpu.memory_space<vmem>>, vector<3x32xf32>
    %c3_98 = arith.constant 3 : index
    %c160_99 = arith.constant 160 : index
    %72 = vector.load %arg16[%c3_98, %c160_99] : memref<18x512xf32, #tpu.memory_space<vmem>>, vector<3x32xf32>
    tpu.vector_store %arg16[%c3_98, %c160_99], %71 {strides = array<i32>} : memref<18x512xf32, #tpu.memory_space<vmem>>, vector<3x32xf32>,
    %c41 = arith.constant 41 : index
    %c0_100 = arith.constant 0 : index
    %73 = tpu.strided_load %arg15[%c41, %c0_100] {strides = array<i32: 2, 1>} : memref<128x32xf32, #tpu.memory_space<vmem>>, vector<3x32xf32>
    %c6_101 = arith.constant 6 : index
    %c160_102 = arith.constant 160 : index
    %74 = vector.load %arg16[%c6_101, %c160_102] : memref<18x512xf32, #tpu.memory_space<vmem>>, vector<3x32xf32>
    tpu.vector_store %arg16[%c6_101, %c160_102], %73 {strides = array<i32>} : memref<18x512xf32, #tpu.memory_space<vmem>>, vector<3x32xf32>,
    %c73 = arith.constant 73 : index
    %c0_103 = arith.constant 0 : index
    %75 = tpu.strided_load %arg15[%c73, %c0_103] {strides = array<i32: 2, 1>} : memref<128x32xf32, #tpu.memory_space<vmem>>, vector<3x32xf32>
    %c9_104 = arith.constant 9 : index
    %c160_105 = arith.constant 160 : index
    %76 = vector.load %arg16[%c9_104, %c160_105] : memref<18x512xf32, #tpu.memory_space<vmem>>, vector<3x32xf32>
    tpu.vector_store %arg16[%c9_104, %c160_105], %75 {strides = array<i32>} : memref<18x512xf32, #tpu.memory_space<vmem>>, vector<3x32xf32>,
    %c89 = arith.constant 89 : index
    %c0_106 = arith.constant 0 : index
    %77 = tpu.strided_load %arg15[%c89, %c0_106] {strides = array<i32: 2, 1>} : memref<128x32xf32, #tpu.memory_space<vmem>>, vector<3x32xf32>
    %c12_107 = arith.constant 12 : index
    %c160_108 = arith.constant 160 : index
    %78 = vector.load %arg16[%c12_107, %c160_108] : memref<18x512xf32, #tpu.memory_space<vmem>>, vector<3x32xf32>
    tpu.vector_store %arg16[%c12_107, %c160_108], %77 {strides = array<i32>} : memref<18x512xf32, #tpu.memory_space<vmem>>, vector<3x32xf32>,
    %c105 = arith.constant 105 : index
    %c0_109 = arith.constant 0 : index
    %79 = tpu.strided_load %arg15[%c105, %c0_109] {strides = array<i32: 2, 1>} : memref<128x32xf32, #tpu.memory_space<vmem>>, vector<3x32xf32>
    %c15_110 = arith.constant 15 : index
    %c160_111 = arith.constant 160 : index
    %80 = vector.load %arg16[%c15_110, %c160_111] : memref<18x512xf32, #tpu.memory_space<vmem>>, vector<3x32xf32>
    tpu.vector_store %arg16[%c15_110, %c160_111], %79 {strides = array<i32>} : memref<18x512xf32, #tpu.memory_space<vmem>>, vector<3x32xf32>,
    %c10 = arith.constant 10 : index
    %c0_112 = arith.constant 0 : index
    %81 = tpu.strided_load %arg15[%c10, %c0_112] {strides = array<i32: 2, 1>} : memref<128x32xf32, #tpu.memory_space<vmem>>, vector<3x32xf32>
    %c0_113 = arith.constant 0 : index
    %c192 = arith.constant 192 : index
    %82 = vector.load %arg16[%c0_113, %c192] : memref<18x512xf32, #tpu.memory_space<vmem>>, vector<3x32xf32>
    tpu.vector_store %arg16[%c0_113, %c192], %81 {strides = array<i32>} : memref<18x512xf32, #tpu.memory_space<vmem>>, vector<3x32xf32>,
    %c26 = arith.constant 26 : index
    %c0_114 = arith.constant 0 : index
    %83 = tpu.strided_load %arg15[%c26, %c0_114] {strides = array<i32: 2, 1>} : memref<128x32xf32, #tpu.memory_space<vmem>>, vector<3x32xf32>
    %c3_115 = arith.constant 3 : index
    %c192_116 = arith.constant 192 : index
    %84 = vector.load %arg16[%c3_115, %c192_116] : memref<18x512xf32, #tpu.memory_space<vmem>>, vector<3x32xf32>
    tpu.vector_store %arg16[%c3_115, %c192_116], %83 {strides = array<i32>} : memref<18x512xf32, #tpu.memory_space<vmem>>, vector<3x32xf32>,
    %c42 = arith.constant 42 : index
    %c0_117 = arith.constant 0 : index
    %85 = tpu.strided_load %arg15[%c42, %c0_117] {strides = array<i32: 2, 1>} : memref<128x32xf32, #tpu.memory_space<vmem>>, vector<3x32xf32>
    %c6_118 = arith.constant 6 : index
    %c192_119 = arith.constant 192 : index
    %86 = vector.load %arg16[%c6_118, %c192_119] : memref<18x512xf32, #tpu.memory_space<vmem>>, vector<3x32xf32>
    tpu.vector_store %arg16[%c6_118, %c192_119], %85 {strides = array<i32>} : memref<18x512xf32, #tpu.memory_space<vmem>>, vector<3x32xf32>,
    %c74 = arith.constant 74 : index
    %c0_120 = arith.constant 0 : index
    %87 = tpu.strided_load %arg15[%c74, %c0_120] {strides = array<i32: 2, 1>} : memref<128x32xf32, #tpu.memory_space<vmem>>, vector<3x32xf32>
    %c9_121 = arith.constant 9 : index
    %c192_122 = arith.constant 192 : index
    %88 = vector.load %arg16[%c9_121, %c192_122] : memref<18x512xf32, #tpu.memory_space<vmem>>, vector<3x32xf32>
    tpu.vector_store %arg16[%c9_121, %c192_122], %87 {strides = array<i32>} : memref<18x512xf32, #tpu.memory_space<vmem>>, vector<3x32xf32>,
    %c90 = arith.constant 90 : index
    %c0_123 = arith.constant 0 : index
    %89 = tpu.strided_load %arg15[%c90, %c0_123] {strides = array<i32: 2, 1>} : memref<128x32xf32, #tpu.memory_space<vmem>>, vector<3x32xf32>
    %c12_124 = arith.constant 12 : index
    %c192_125 = arith.constant 192 : index
    %90 = vector.load %arg16[%c12_124, %c192_125] : memref<18x512xf32, #tpu.memory_space<vmem>>, vector<3x32xf32>
    tpu.vector_store %arg16[%c12_124, %c192_125], %89 {strides = array<i32>} : memref<18x512xf32, #tpu.memory_space<vmem>>, vector<3x32xf32>,
    %c106 = arith.constant 106 : index
    %c0_126 = arith.constant 0 : index
    %91 = tpu.strided_load %arg15[%c106, %c0_126] {strides = array<i32: 2, 1>} : memref<128x32xf32, #tpu.memory_space<vmem>>, vector<3x32xf32>
    %c15_127 = arith.constant 15 : index
    %c192_128 = arith.constant 192 : index
    %92 = vector.load %arg16[%c15_127, %c192_128] : memref<18x512xf32, #tpu.memory_space<vmem>>, vector<3x32xf32>
    tpu.vector_store %arg16[%c15_127, %c192_128], %91 {strides = array<i32>} : memref<18x512xf32, #tpu.memory_space<vmem>>, vector<3x32xf32>,
    %c11 = arith.constant 11 : index
    %c0_129 = arith.constant 0 : index
    %93 = tpu.strided_load %arg15[%c11, %c0_129] {strides = array<i32: 2, 1>} : memref<128x32xf32, #tpu.memory_space<vmem>>, vector<3x32xf32>
    %c0_130 = arith.constant 0 : index
    %c224 = arith.constant 224 : index
    %94 = vector.load %arg16[%c0_130, %c224] : memref<18x512xf32, #tpu.memory_space<vmem>>, vector<3x32xf32>
    tpu.vector_store %arg16[%c0_130, %c224], %93 {strides = array<i32>} : memref<18x512xf32, #tpu.memory_space<vmem>>, vector<3x32xf32>,
    %c27 = arith.constant 27 : index
    %c0_131 = arith.constant 0 : index
    %95 = tpu.strided_load %arg15[%c27, %c0_131] {strides = array<i32: 2, 1>} : memref<128x32xf32, #tpu.memory_space<vmem>>, vector<3x32xf32>
    %c3_132 = arith.constant 3 : index
    %c224_133 = arith.constant 224 : index
    %96 = vector.load %arg16[%c3_132, %c224_133] : memref<18x512xf32, #tpu.memory_space<vmem>>, vector<3x32xf32>
    tpu.vector_store %arg16[%c3_132, %c224_133], %95 {strides = array<i32>} : memref<18x512xf32, #tpu.memory_space<vmem>>, vector<3x32xf32>,
    %c43 = arith.constant 43 : index
    %c0_134 = arith.constant 0 : index
    %97 = tpu.strided_load %arg15[%c43, %c0_134] {strides = array<i32: 2, 1>} : memref<128x32xf32, #tpu.memory_space<vmem>>, vector<3x32xf32>
    %c6_135 = arith.constant 6 : index
    %c224_136 = arith.constant 224 : index
    %98 = vector.load %arg16[%c6_135, %c224_136] : memref<18x512xf32, #tpu.memory_space<vmem>>, vector<3x32xf32>
    tpu.vector_store %arg16[%c6_135, %c224_136], %97 {strides = array<i32>} : memref<18x512xf32, #tpu.memory_space<vmem>>, vector<3x32xf32>,
    %c75 = arith.constant 75 : index
    %c0_137 = arith.constant 0 : index
    %99 = tpu.strided_load %arg15[%c75, %c0_137] {strides = array<i32: 2, 1>} : memref<128x32xf32, #tpu.memory_space<vmem>>, vector<3x32xf32>
    %c9_138 = arith.constant 9 : index
    %c224_139 = arith.constant 224 : index
    %100 = vector.load %arg16[%c9_138, %c224_139] : memref<18x512xf32, #tpu.memory_space<vmem>>, vector<3x32xf32>
    tpu.vector_store %arg16[%c9_138, %c224_139], %99 {strides = array<i32>} : memref<18x512xf32, #tpu.memory_space<vmem>>, vector<3x32xf32>,
    %c91 = arith.constant 91 : index
    %c0_140 = arith.constant 0 : index
    %101 = tpu.strided_load %arg15[%c91, %c0_140] {strides = array<i32: 2, 1>} : memref<128x32xf32, #tpu.memory_space<vmem>>, vector<3x32xf32>
    %c12_141 = arith.constant 12 : index
    %c224_142 = arith.constant 224 : index
    %102 = vector.load %arg16[%c12_141, %c224_142] : memref<18x512xf32, #tpu.memory_space<vmem>>, vector<3x32xf32>
    tpu.vector_store %arg16[%c12_141, %c224_142], %101 {strides = array<i32>} : memref<18x512xf32, #tpu.memory_space<vmem>>, vector<3x32xf32>,
    %c107 = arith.constant 107 : index
    %c0_143 = arith.constant 0 : index
    %103 = tpu.strided_load %arg15[%c107, %c0_143] {strides = array<i32: 2, 1>} : memref<128x32xf32, #tpu.memory_space<vmem>>, vector<3x32xf32>
    %c15_144 = arith.constant 15 : index
    %c224_145 = arith.constant 224 : index
    %104 = vector.load %arg16[%c15_144, %c224_145] : memref<18x512xf32, #tpu.memory_space<vmem>>, vector<3x32xf32>
    tpu.vector_store %arg16[%c15_144, %c224_145], %103 {strides = array<i32>} : memref<18x512xf32, #tpu.memory_space<vmem>>, vector<3x32xf32>,
    %c16_146 = arith.constant 16 : index
    %c0_147 = arith.constant 0 : index
    %105 = tpu.strided_load %arg15[%c16_146, %c0_147] {strides = array<i32: 2, 1>} : memref<128x32xf32, #tpu.memory_space<vmem>>, vector<3x32xf32>
    %c0_148 = arith.constant 0 : index
    %c256 = arith.constant 256 : index
    %106 = vector.load %arg16[%c0_148, %c256] : memref<18x512xf32, #tpu.memory_space<vmem>>, vector<3x32xf32>
    tpu.vector_store %arg16[%c0_148, %c256], %105 {strides = array<i32>} : memref<18x512xf32, #tpu.memory_space<vmem>>, vector<3x32xf32>,
    %c32_149 = arith.constant 32 : index
    %c0_150 = arith.constant 0 : index
    %107 = tpu.strided_load %arg15[%c32_149, %c0_150] {strides = array<i32: 2, 1>} : memref<128x32xf32, #tpu.memory_space<vmem>>, vector<3x32xf32>
    %c3_151 = arith.constant 3 : index
    %c256_152 = arith.constant 256 : index
    %108 = vector.load %arg16[%c3_151, %c256_152] : memref<18x512xf32, #tpu.memory_space<vmem>>, vector<3x32xf32>
    tpu.vector_store %arg16[%c3_151, %c256_152], %107 {strides = array<i32>} : memref<18x512xf32, #tpu.memory_space<vmem>>, vector<3x32xf32>,
    %c48 = arith.constant 48 : index
    %c0_153 = arith.constant 0 : index
    %109 = tpu.strided_load %arg15[%c48, %c0_153] {strides = array<i32: 2, 1>} : memref<128x32xf32, #tpu.memory_space<vmem>>, vector<3x32xf32>
    %c6_154 = arith.constant 6 : index
    %c256_155 = arith.constant 256 : index
    %110 = vector.load %arg16[%c6_154, %c256_155] : memref<18x512xf32, #tpu.memory_space<vmem>>, vector<3x32xf32>
    tpu.vector_store %arg16[%c6_154, %c256_155], %109 {strides = array<i32>} : memref<18x512xf32, #tpu.memory_space<vmem>>, vector<3x32xf32>,
    %c80_156 = arith.constant 80 : index
    %c0_157 = arith.constant 0 : index
    %111 = tpu.strided_load %arg15[%c80_156, %c0_157] {strides = array<i32: 2, 1>} : memref<128x32xf32, #tpu.memory_space<vmem>>, vector<3x32xf32>
    %c9_158 = arith.constant 9 : index
    %c256_159 = arith.constant 256 : index
    %112 = vector.load %arg16[%c9_158, %c256_159] : memref<18x512xf32, #tpu.memory_space<vmem>>, vector<3x32xf32>
    tpu.vector_store %arg16[%c9_158, %c256_159], %111 {strides = array<i32>} : memref<18x512xf32, #tpu.memory_space<vmem>>, vector<3x32xf32>,
    %c96_160 = arith.constant 96 : index
    %c0_161 = arith.constant 0 : index
    %113 = tpu.strided_load %arg15[%c96_160, %c0_161] {strides = array<i32: 2, 1>} : memref<128x32xf32, #tpu.memory_space<vmem>>, vector<3x32xf32>
    %c12_162 = arith.constant 12 : index
    %c256_163 = arith.constant 256 : index
    %114 = vector.load %arg16[%c12_162, %c256_163] : memref<18x512xf32, #tpu.memory_space<vmem>>, vector<3x32xf32>
    tpu.vector_store %arg16[%c12_162, %c256_163], %113 {strides = array<i32>} : memref<18x512xf32, #tpu.memory_space<vmem>>, vector<3x32xf32>,
    %c112 = arith.constant 112 : index
    %c0_164 = arith.constant 0 : index
    %115 = tpu.strided_load %arg15[%c112, %c0_164] {strides = array<i32: 2, 1>} : memref<128x32xf32, #tpu.memory_space<vmem>>, vector<3x32xf32>
    %c15_165 = arith.constant 15 : index
    %c256_166 = arith.constant 256 : index
    %116 = vector.load %arg16[%c15_165, %c256_166] : memref<18x512xf32, #tpu.memory_space<vmem>>, vector<3x32xf32>
    tpu.vector_store %arg16[%c15_165, %c256_166], %115 {strides = array<i32>} : memref<18x512xf32, #tpu.memory_space<vmem>>, vector<3x32xf32>,
    %c17_167 = arith.constant 17 : index
    %c0_168 = arith.constant 0 : index
    %117 = tpu.strided_load %arg15[%c17_167, %c0_168] {strides = array<i32: 2, 1>} : memref<128x32xf32, #tpu.memory_space<vmem>>, vector<3x32xf32>
    %c0_169 = arith.constant 0 : index
    %c288 = arith.constant 288 : index
    %118 = vector.load %arg16[%c0_169, %c288] : memref<18x512xf32, #tpu.memory_space<vmem>>, vector<3x32xf32>
    tpu.vector_store %arg16[%c0_169, %c288], %117 {strides = array<i32>} : memref<18x512xf32, #tpu.memory_space<vmem>>, vector<3x32xf32>,
    %c33_170 = arith.constant 33 : index
    %c0_171 = arith.constant 0 : index
    %119 = tpu.strided_load %arg15[%c33_170, %c0_171] {strides = array<i32: 2, 1>} : memref<128x32xf32, #tpu.memory_space<vmem>>, vector<3x32xf32>
    %c3_172 = arith.constant 3 : index
    %c288_173 = arith.constant 288 : index
    %120 = vector.load %arg16[%c3_172, %c288_173] : memref<18x512xf32, #tpu.memory_space<vmem>>, vector<3x32xf32>
    tpu.vector_store %arg16[%c3_172, %c288_173], %119 {strides = array<i32>} : memref<18x512xf32, #tpu.memory_space<vmem>>, vector<3x32xf32>,
    %c49 = arith.constant 49 : index
    %c0_174 = arith.constant 0 : index
    %121 = tpu.strided_load %arg15[%c49, %c0_174] {strides = array<i32: 2, 1>} : memref<128x32xf32, #tpu.memory_space<vmem>>, vector<3x32xf32>
    %c6_175 = arith.constant 6 : index
    %c288_176 = arith.constant 288 : index
    %122 = vector.load %arg16[%c6_175, %c288_176] : memref<18x512xf32, #tpu.memory_space<vmem>>, vector<3x32xf32>
    tpu.vector_store %arg16[%c6_175, %c288_176], %121 {strides = array<i32>} : memref<18x512xf32, #tpu.memory_space<vmem>>, vector<3x32xf32>,
    %c81_177 = arith.constant 81 : index
    %c0_178 = arith.constant 0 : index
    %123 = tpu.strided_load %arg15[%c81_177, %c0_178] {strides = array<i32: 2, 1>} : memref<128x32xf32, #tpu.memory_space<vmem>>, vector<3x32xf32>
    %c9_179 = arith.constant 9 : index
    %c288_180 = arith.constant 288 : index
    %124 = vector.load %arg16[%c9_179, %c288_180] : memref<18x512xf32, #tpu.memory_space<vmem>>, vector<3x32xf32>
    tpu.vector_store %arg16[%c9_179, %c288_180], %123 {strides = array<i32>} : memref<18x512xf32, #tpu.memory_space<vmem>>, vector<3x32xf32>,
    %c97_181 = arith.constant 97 : index
    %c0_182 = arith.constant 0 : index
    %125 = tpu.strided_load %arg15[%c97_181, %c0_182] {strides = array<i32: 2, 1>} : memref<128x32xf32, #tpu.memory_space<vmem>>, vector<3x32xf32>
    %c12_183 = arith.constant 12 : index
    %c288_184 = arith.constant 288 : index
    %126 = vector.load %arg16[%c12_183, %c288_184] : memref<18x512xf32, #tpu.memory_space<vmem>>, vector<3x32xf32>
    tpu.vector_store %arg16[%c12_183, %c288_184], %125 {strides = array<i32>} : memref<18x512xf32, #tpu.memory_space<vmem>>, vector<3x32xf32>,
    %c113 = arith.constant 113 : index
    %c0_185 = arith.constant 0 : index
    %127 = tpu.strided_load %arg15[%c113, %c0_185] {strides = array<i32: 2, 1>} : memref<128x32xf32, #tpu.memory_space<vmem>>, vector<3x32xf32>
    %c15_186 = arith.constant 15 : index
    %c288_187 = arith.constant 288 : index
    %128 = vector.load %arg16[%c15_186, %c288_187] : memref<18x512xf32, #tpu.memory_space<vmem>>, vector<3x32xf32>
    tpu.vector_store %arg16[%c15_186, %c288_187], %127 {strides = array<i32>} : memref<18x512xf32, #tpu.memory_space<vmem>>, vector<3x32xf32>,
    %c18_188 = arith.constant 18 : index
    %c0_189 = arith.constant 0 : index
    %129 = tpu.strided_load %arg15[%c18_188, %c0_189] {strides = array<i32: 2, 1>} : memref<128x32xf32, #tpu.memory_space<vmem>>, vector<3x32xf32>
    %c0_190 = arith.constant 0 : index
    %c320 = arith.constant 320 : index
    %130 = vector.load %arg16[%c0_190, %c320] : memref<18x512xf32, #tpu.memory_space<vmem>>, vector<3x32xf32>
    tpu.vector_store %arg16[%c0_190, %c320], %129 {strides = array<i32>} : memref<18x512xf32, #tpu.memory_space<vmem>>, vector<3x32xf32>,
    %c34_191 = arith.constant 34 : index
    %c0_192 = arith.constant 0 : index
    %131 = tpu.strided_load %arg15[%c34_191, %c0_192] {strides = array<i32: 2, 1>} : memref<128x32xf32, #tpu.memory_space<vmem>>, vector<3x32xf32>
    %c3_193 = arith.constant 3 : index
    %c320_194 = arith.constant 320 : index
    %132 = vector.load %arg16[%c3_193, %c320_194] : memref<18x512xf32, #tpu.memory_space<vmem>>, vector<3x32xf32>
    tpu.vector_store %arg16[%c3_193, %c320_194], %131 {strides = array<i32>} : memref<18x512xf32, #tpu.memory_space<vmem>>, vector<3x32xf32>,
    %c50 = arith.constant 50 : index
    %c0_195 = arith.constant 0 : index
    %133 = tpu.strided_load %arg15[%c50, %c0_195] {strides = array<i32: 2, 1>} : memref<128x32xf32, #tpu.memory_space<vmem>>, vector<3x32xf32>
    %c6_196 = arith.constant 6 : index
    %c320_197 = arith.constant 320 : index
    %134 = vector.load %arg16[%c6_196, %c320_197] : memref<18x512xf32, #tpu.memory_space<vmem>>, vector<3x32xf32>
    tpu.vector_store %arg16[%c6_196, %c320_197], %133 {strides = array<i32>} : memref<18x512xf32, #tpu.memory_space<vmem>>, vector<3x32xf32>,
    %c82_198 = arith.constant 82 : index
    %c0_199 = arith.constant 0 : index
    %135 = tpu.strided_load %arg15[%c82_198, %c0_199] {strides = array<i32: 2, 1>} : memref<128x32xf32, #tpu.memory_space<vmem>>, vector<3x32xf32>
    %c9_200 = arith.constant 9 : index
    %c320_201 = arith.constant 320 : index
    %136 = vector.load %arg16[%c9_200, %c320_201] : memref<18x512xf32, #tpu.memory_space<vmem>>, vector<3x32xf32>
    tpu.vector_store %arg16[%c9_200, %c320_201], %135 {strides = array<i32>} : memref<18x512xf32, #tpu.memory_space<vmem>>, vector<3x32xf32>,
    %c98_202 = arith.constant 98 : index
    %c0_203 = arith.constant 0 : index
    %137 = tpu.strided_load %arg15[%c98_202, %c0_203] {strides = array<i32: 2, 1>} : memref<128x32xf32, #tpu.memory_space<vmem>>, vector<3x32xf32>
    %c12_204 = arith.constant 12 : index
    %c320_205 = arith.constant 320 : index
    %138 = vector.load %arg16[%c12_204, %c320_205] : memref<18x512xf32, #tpu.memory_space<vmem>>, vector<3x32xf32>
    tpu.vector_store %arg16[%c12_204, %c320_205], %137 {strides = array<i32>} : memref<18x512xf32, #tpu.memory_space<vmem>>, vector<3x32xf32>,
    %c114 = arith.constant 114 : index
    %c0_206 = arith.constant 0 : index
    %139 = tpu.strided_load %arg15[%c114, %c0_206] {strides = array<i32: 2, 1>} : memref<128x32xf32, #tpu.memory_space<vmem>>, vector<3x32xf32>
    %c15_207 = arith.constant 15 : index
    %c320_208 = arith.constant 320 : index
    %140 = vector.load %arg16[%c15_207, %c320_208] : memref<18x512xf32, #tpu.memory_space<vmem>>, vector<3x32xf32>
    tpu.vector_store %arg16[%c15_207, %c320_208], %139 {strides = array<i32>} : memref<18x512xf32, #tpu.memory_space<vmem>>, vector<3x32xf32>,
    %c19_209 = arith.constant 19 : index
    %c0_210 = arith.constant 0 : index
    %141 = tpu.strided_load %arg15[%c19_209, %c0_210] {strides = array<i32: 2, 1>} : memref<128x32xf32, #tpu.memory_space<vmem>>, vector<3x32xf32>
    %c0_211 = arith.constant 0 : index
    %c352 = arith.constant 352 : index
    %142 = vector.load %arg16[%c0_211, %c352] : memref<18x512xf32, #tpu.memory_space<vmem>>, vector<3x32xf32>
    tpu.vector_store %arg16[%c0_211, %c352], %141 {strides = array<i32>} : memref<18x512xf32, #tpu.memory_space<vmem>>, vector<3x32xf32>,
    %c35_212 = arith.constant 35 : index
    %c0_213 = arith.constant 0 : index
    %143 = tpu.strided_load %arg15[%c35_212, %c0_213] {strides = array<i32: 2, 1>} : memref<128x32xf32, #tpu.memory_space<vmem>>, vector<3x32xf32>
    %c3_214 = arith.constant 3 : index
    %c352_215 = arith.constant 352 : index
    %144 = vector.load %arg16[%c3_214, %c352_215] : memref<18x512xf32, #tpu.memory_space<vmem>>, vector<3x32xf32>
    tpu.vector_store %arg16[%c3_214, %c352_215], %143 {strides = array<i32>} : memref<18x512xf32, #tpu.memory_space<vmem>>, vector<3x32xf32>,
    %c51 = arith.constant 51 : index
    %c0_216 = arith.constant 0 : index
    %145 = tpu.strided_load %arg15[%c51, %c0_216] {strides = array<i32: 2, 1>} : memref<128x32xf32, #tpu.memory_space<vmem>>, vector<3x32xf32>
    %c6_217 = arith.constant 6 : index
    %c352_218 = arith.constant 352 : index
    %146 = vector.load %arg16[%c6_217, %c352_218] : memref<18x512xf32, #tpu.memory_space<vmem>>, vector<3x32xf32>
    tpu.vector_store %arg16[%c6_217, %c352_218], %145 {strides = array<i32>} : memref<18x512xf32, #tpu.memory_space<vmem>>, vector<3x32xf32>,
    %c83_219 = arith.constant 83 : index
    %c0_220 = arith.constant 0 : index
    %147 = tpu.strided_load %arg15[%c83_219, %c0_220] {strides = array<i32: 2, 1>} : memref<128x32xf32, #tpu.memory_space<vmem>>, vector<3x32xf32>
    %c9_221 = arith.constant 9 : index
    %c352_222 = arith.constant 352 : index
    %148 = vector.load %arg16[%c9_221, %c352_222] : memref<18x512xf32, #tpu.memory_space<vmem>>, vector<3x32xf32>
    tpu.vector_store %arg16[%c9_221, %c352_222], %147 {strides = array<i32>} : memref<18x512xf32, #tpu.memory_space<vmem>>, vector<3x32xf32>,
    %c99_223 = arith.constant 99 : index
    %c0_224 = arith.constant 0 : index
    %149 = tpu.strided_load %arg15[%c99_223, %c0_224] {strides = array<i32: 2, 1>} : memref<128x32xf32, #tpu.memory_space<vmem>>, vector<3x32xf32>
    %c12_225 = arith.constant 12 : index
    %c352_226 = arith.constant 352 : index
    %150 = vector.load %arg16[%c12_225, %c352_226] : memref<18x512xf32, #tpu.memory_space<vmem>>, vector<3x32xf32>
    tpu.vector_store %arg16[%c12_225, %c352_226], %149 {strides = array<i32>} : memref<18x512xf32, #tpu.memory_space<vmem>>, vector<3x32xf32>,
    %c115 = arith.constant 115 : index
    %c0_227 = arith.constant 0 : index
    %151 = tpu.strided_load %arg15[%c115, %c0_227] {strides = array<i32: 2, 1>} : memref<128x32xf32, #tpu.memory_space<vmem>>, vector<3x32xf32>
    %c15_228 = arith.constant 15 : index
    %c352_229 = arith.constant 352 : index
    %152 = vector.load %arg16[%c15_228, %c352_229] : memref<18x512xf32, #tpu.memory_space<vmem>>, vector<3x32xf32>
    tpu.vector_store %arg16[%c15_228, %c352_229], %151 {strides = array<i32>} : memref<18x512xf32, #tpu.memory_space<vmem>>, vector<3x32xf32>,
    %c24_230 = arith.constant 24 : index
    %c0_231 = arith.constant 0 : index
    %153 = tpu.strided_load %arg15[%c24_230, %c0_231] {strides = array<i32: 2, 1>} : memref<128x32xf32, #tpu.memory_space<vmem>>, vector<3x32xf32>
    %c0_232 = arith.constant 0 : index
    %c384 = arith.constant 384 : index
    %154 = vector.load %arg16[%c0_232, %c384] : memref<18x512xf32, #tpu.memory_space<vmem>>, vector<3x32xf32>
    tpu.vector_store %arg16[%c0_232, %c384], %153 {strides = array<i32>} : memref<18x512xf32, #tpu.memory_space<vmem>>, vector<3x32xf32>,
    %c40_233 = arith.constant 40 : index
    %c0_234 = arith.constant 0 : index
    %155 = tpu.strided_load %arg15[%c40_233, %c0_234] {strides = array<i32: 2, 1>} : memref<128x32xf32, #tpu.memory_space<vmem>>, vector<3x32xf32>
    %c3_235 = arith.constant 3 : index
    %c384_236 = arith.constant 384 : index
    %156 = vector.load %arg16[%c3_235, %c384_236] : memref<18x512xf32, #tpu.memory_space<vmem>>, vector<3x32xf32>
    tpu.vector_store %arg16[%c3_235, %c384_236], %155 {strides = array<i32>} : memref<18x512xf32, #tpu.memory_space<vmem>>, vector<3x32xf32>,
    %c56 = arith.constant 56 : index
    %c0_237 = arith.constant 0 : index
    %157 = tpu.strided_load %arg15[%c56, %c0_237] {strides = array<i32: 2, 1>} : memref<128x32xf32, #tpu.memory_space<vmem>>, vector<3x32xf32>
    %c6_238 = arith.constant 6 : index
    %c384_239 = arith.constant 384 : index
    %158 = vector.load %arg16[%c6_238, %c384_239] : memref<18x512xf32, #tpu.memory_space<vmem>>, vector<3x32xf32>
    tpu.vector_store %arg16[%c6_238, %c384_239], %157 {strides = array<i32>} : memref<18x512xf32, #tpu.memory_space<vmem>>, vector<3x32xf32>,
    %c88_240 = arith.constant 88 : index
    %c0_241 = arith.constant 0 : index
    %159 = tpu.strided_load %arg15[%c88_240, %c0_241] {strides = array<i32: 2, 1>} : memref<128x32xf32, #tpu.memory_space<vmem>>, vector<3x32xf32>
    %c9_242 = arith.constant 9 : index
    %c384_243 = arith.constant 384 : index
    %160 = vector.load %arg16[%c9_242, %c384_243] : memref<18x512xf32, #tpu.memory_space<vmem>>, vector<3x32xf32>
    tpu.vector_store %arg16[%c9_242, %c384_243], %159 {strides = array<i32>} : memref<18x512xf32, #tpu.memory_space<vmem>>, vector<3x32xf32>,
    %c104_244 = arith.constant 104 : index
    %c0_245 = arith.constant 0 : index
    %161 = tpu.strided_load %arg15[%c104_244, %c0_245] {strides = array<i32: 2, 1>} : memref<128x32xf32, #tpu.memory_space<vmem>>, vector<3x32xf32>
    %c12_246 = arith.constant 12 : index
    %c384_247 = arith.constant 384 : index
    %162 = vector.load %arg16[%c12_246, %c384_247] : memref<18x512xf32, #tpu.memory_space<vmem>>, vector<3x32xf32>
    tpu.vector_store %arg16[%c12_246, %c384_247], %161 {strides = array<i32>} : memref<18x512xf32, #tpu.memory_space<vmem>>, vector<3x32xf32>,
    %c120 = arith.constant 120 : index
    %c0_248 = arith.constant 0 : index
    %163 = tpu.strided_load %arg15[%c120, %c0_248] {strides = array<i32: 2, 1>} : memref<128x32xf32, #tpu.memory_space<vmem>>, vector<3x32xf32>
    %c15_249 = arith.constant 15 : index
    %c384_250 = arith.constant 384 : index
    %164 = vector.load %arg16[%c15_249, %c384_250] : memref<18x512xf32, #tpu.memory_space<vmem>>, vector<3x32xf32>
    tpu.vector_store %arg16[%c15_249, %c384_250], %163 {strides = array<i32>} : memref<18x512xf32, #tpu.memory_space<vmem>>, vector<3x32xf32>,
    %c25_251 = arith.constant 25 : index
    %c0_252 = arith.constant 0 : index
    %165 = tpu.strided_load %arg15[%c25_251, %c0_252] {strides = array<i32: 2, 1>} : memref<128x32xf32, #tpu.memory_space<vmem>>, vector<3x32xf32>
    %c0_253 = arith.constant 0 : index
    %c416 = arith.constant 416 : index
    %166 = vector.load %arg16[%c0_253, %c416] : memref<18x512xf32, #tpu.memory_space<vmem>>, vector<3x32xf32>
    tpu.vector_store %arg16[%c0_253, %c416], %165 {strides = array<i32>} : memref<18x512xf32, #tpu.memory_space<vmem>>, vector<3x32xf32>,
    %c41_254 = arith.constant 41 : index
    %c0_255 = arith.constant 0 : index
    %167 = tpu.strided_load %arg15[%c41_254, %c0_255] {strides = array<i32: 2, 1>} : memref<128x32xf32, #tpu.memory_space<vmem>>, vector<3x32xf32>
    %c3_256 = arith.constant 3 : index
    %c416_257 = arith.constant 416 : index
    %168 = vector.load %arg16[%c3_256, %c416_257] : memref<18x512xf32, #tpu.memory_space<vmem>>, vector<3x32xf32>
    tpu.vector_store %arg16[%c3_256, %c416_257], %167 {strides = array<i32>} : memref<18x512xf32, #tpu.memory_space<vmem>>, vector<3x32xf32>,
    %c57 = arith.constant 57 : index
    %c0_258 = arith.constant 0 : index
    %169 = tpu.strided_load %arg15[%c57, %c0_258] {strides = array<i32: 2, 1>} : memref<128x32xf32, #tpu.memory_space<vmem>>, vector<3x32xf32>
    %c6_259 = arith.constant 6 : index
    %c416_260 = arith.constant 416 : index
    %170 = vector.load %arg16[%c6_259, %c416_260] : memref<18x512xf32, #tpu.memory_space<vmem>>, vector<3x32xf32>
    tpu.vector_store %arg16[%c6_259, %c416_260], %169 {strides = array<i32>} : memref<18x512xf32, #tpu.memory_space<vmem>>, vector<3x32xf32>,
    %c89_261 = arith.constant 89 : index
    %c0_262 = arith.constant 0 : index
    %171 = tpu.strided_load %arg15[%c89_261, %c0_262] {strides = array<i32: 2, 1>} : memref<128x32xf32, #tpu.memory_space<vmem>>, vector<3x32xf32>
    %c9_263 = arith.constant 9 : index
    %c416_264 = arith.constant 416 : index
    %172 = vector.load %arg16[%c9_263, %c416_264] : memref<18x512xf32, #tpu.memory_space<vmem>>, vector<3x32xf32>
    tpu.vector_store %arg16[%c9_263, %c416_264], %171 {strides = array<i32>} : memref<18x512xf32, #tpu.memory_space<vmem>>, vector<3x32xf32>,
    %c105_265 = arith.constant 105 : index
    %c0_266 = arith.constant 0 : index
    %173 = tpu.strided_load %arg15[%c105_265, %c0_266] {strides = array<i32: 2, 1>} : memref<128x32xf32, #tpu.memory_space<vmem>>, vector<3x32xf32>
    %c12_267 = arith.constant 12 : index
    %c416_268 = arith.constant 416 : index
    %174 = vector.load %arg16[%c12_267, %c416_268] : memref<18x512xf32, #tpu.memory_space<vmem>>, vector<3x32xf32>
    tpu.vector_store %arg16[%c12_267, %c416_268], %173 {strides = array<i32>} : memref<18x512xf32, #tpu.memory_space<vmem>>, vector<3x32xf32>,
    %c121 = arith.constant 121 : index
    %c0_269 = arith.constant 0 : index
    %175 = tpu.strided_load %arg15[%c121, %c0_269] {strides = array<i32: 2, 1>} : memref<128x32xf32, #tpu.memory_space<vmem>>, vector<3x32xf32>
    %c15_270 = arith.constant 15 : index
    %c416_271 = arith.constant 416 : index
    %176 = vector.load %arg16[%c15_270, %c416_271] : memref<18x512xf32, #tpu.memory_space<vmem>>, vector<3x32xf32>
    tpu.vector_store %arg16[%c15_270, %c416_271], %175 {strides = array<i32>} : memref<18x512xf32, #tpu.memory_space<vmem>>, vector<3x32xf32>,
    %c26_272 = arith.constant 26 : index
    %c0_273 = arith.constant 0 : index
    %177 = tpu.strided_load %arg15[%c26_272, %c0_273] {strides = array<i32: 2, 1>} : memref<128x32xf32, #tpu.memory_space<vmem>>, vector<3x32xf32>
    %c0_274 = arith.constant 0 : index
    %c448 = arith.constant 448 : index
    %178 = vector.load %arg16[%c0_274, %c448] : memref<18x512xf32, #tpu.memory_space<vmem>>, vector<3x32xf32>
    tpu.vector_store %arg16[%c0_274, %c448], %177 {strides = array<i32>} : memref<18x512xf32, #tpu.memory_space<vmem>>, vector<3x32xf32>,
    %c42_275 = arith.constant 42 : index
    %c0_276 = arith.constant 0 : index
    %179 = tpu.strided_load %arg15[%c42_275, %c0_276] {strides = array<i32: 2, 1>} : memref<128x32xf32, #tpu.memory_space<vmem>>, vector<3x32xf32>
    %c3_277 = arith.constant 3 : index
    %c448_278 = arith.constant 448 : index
    %180 = vector.load %arg16[%c3_277, %c448_278] : memref<18x512xf32, #tpu.memory_space<vmem>>, vector<3x32xf32>
    tpu.vector_store %arg16[%c3_277, %c448_278], %179 {strides = array<i32>} : memref<18x512xf32, #tpu.memory_space<vmem>>, vector<3x32xf32>,
    %c58 = arith.constant 58 : index
    %c0_279 = arith.constant 0 : index
    %181 = tpu.strided_load %arg15[%c58, %c0_279] {strides = array<i32: 2, 1>} : memref<128x32xf32, #tpu.memory_space<vmem>>, vector<3x32xf32>
    %c6_280 = arith.constant 6 : index
    %c448_281 = arith.constant 448 : index
    %182 = vector.load %arg16[%c6_280, %c448_281] : memref<18x512xf32, #tpu.memory_space<vmem>>, vector<3x32xf32>
    tpu.vector_store %arg16[%c6_280, %c448_281], %181 {strides = array<i32>} : memref<18x512xf32, #tpu.memory_space<vmem>>, vector<3x32xf32>,
    %c90_282 = arith.constant 90 : index
    %c0_283 = arith.constant 0 : index
    %183 = tpu.strided_load %arg15[%c90_282, %c0_283] {strides = array<i32: 2, 1>} : memref<128x32xf32, #tpu.memory_space<vmem>>, vector<3x32xf32>
    %c9_284 = arith.constant 9 : index
    %c448_285 = arith.constant 448 : index
    %184 = vector.load %arg16[%c9_284, %c448_285] : memref<18x512xf32, #tpu.memory_space<vmem>>, vector<3x32xf32>
    tpu.vector_store %arg16[%c9_284, %c448_285], %183 {strides = array<i32>} : memref<18x512xf32, #tpu.memory_space<vmem>>, vector<3x32xf32>,
    %c106_286 = arith.constant 106 : index
    %c0_287 = arith.constant 0 : index
    %185 = tpu.strided_load %arg15[%c106_286, %c0_287] {strides = array<i32: 2, 1>} : memref<128x32xf32, #tpu.memory_space<vmem>>, vector<3x32xf32>
    %c12_288 = arith.constant 12 : index
    %c448_289 = arith.constant 448 : index
    %186 = vector.load %arg16[%c12_288, %c448_289] : memref<18x512xf32, #tpu.memory_space<vmem>>, vector<3x32xf32>
    tpu.vector_store %arg16[%c12_288, %c448_289], %185 {strides = array<i32>} : memref<18x512xf32, #tpu.memory_space<vmem>>, vector<3x32xf32>,
    %c122 = arith.constant 122 : index
    %c0_290 = arith.constant 0 : index
    %187 = tpu.strided_load %arg15[%c122, %c0_290] {strides = array<i32: 2, 1>} : memref<128x32xf32, #tpu.memory_space<vmem>>, vector<3x32xf32>
    %c15_291 = arith.constant 15 : index
    %c448_292 = arith.constant 448 : index
    %188 = vector.load %arg16[%c15_291, %c448_292] : memref<18x512xf32, #tpu.memory_space<vmem>>, vector<3x32xf32>
    tpu.vector_store %arg16[%c15_291, %c448_292], %187 {strides = array<i32>} : memref<18x512xf32, #tpu.memory_space<vmem>>, vector<3x32xf32>,
    %c27_293 = arith.constant 27 : index
    %c0_294 = arith.constant 0 : index
    %189 = tpu.strided_load %arg15[%c27_293, %c0_294] {strides = array<i32: 2, 1>} : memref<128x32xf32, #tpu.memory_space<vmem>>, vector<3x32xf32>
    %c0_295 = arith.constant 0 : index
    %c480 = arith.constant 480 : index
    %190 = vector.load %arg16[%c0_295, %c480] : memref<18x512xf32, #tpu.memory_space<vmem>>, vector<3x32xf32>
    tpu.vector_store %arg16[%c0_295, %c480], %189 {strides = array<i32>} : memref<18x512xf32, #tpu.memory_space<vmem>>, vector<3x32xf32>,
    %c43_296 = arith.constant 43 : index
    %c0_297 = arith.constant 0 : index
    %191 = tpu.strided_load %arg15[%c43_296, %c0_297] {strides = array<i32: 2, 1>} : memref<128x32xf32, #tpu.memory_space<vmem>>, vector<3x32xf32>
    %c3_298 = arith.constant 3 : index
    %c480_299 = arith.constant 480 : index
    %192 = vector.load %arg16[%c3_298, %c480_299] : memref<18x512xf32, #tpu.memory_space<vmem>>, vector<3x32xf32>
    tpu.vector_store %arg16[%c3_298, %c480_299], %191 {strides = array<i32>} : memref<18x512xf32, #tpu.memory_space<vmem>>, vector<3x32xf32>,
    %c59 = arith.constant 59 : index
    %c0_300 = arith.constant 0 : index
    %193 = tpu.strided_load %arg15[%c59, %c0_300] {strides = array<i32: 2, 1>} : memref<128x32xf32, #tpu.memory_space<vmem>>, vector<3x32xf32>
    %c6_301 = arith.constant 6 : index
    %c480_302 = arith.constant 480 : index
    %194 = vector.load %arg16[%c6_301, %c480_302] : memref<18x512xf32, #tpu.memory_space<vmem>>, vector<3x32xf32>
    tpu.vector_store %arg16[%c6_301, %c480_302], %193 {strides = array<i32>} : memref<18x512xf32, #tpu.memory_space<vmem>>, vector<3x32xf32>,
    %c91_303 = arith.constant 91 : index
    %c0_304 = arith.constant 0 : index
    %195 = tpu.strided_load %arg15[%c91_303, %c0_304] {strides = array<i32: 2, 1>} : memref<128x32xf32, #tpu.memory_space<vmem>>, vector<3x32xf32>
    %c9_305 = arith.constant 9 : index
    %c480_306 = arith.constant 480 : index
    %196 = vector.load %arg16[%c9_305, %c480_306] : memref<18x512xf32, #tpu.memory_space<vmem>>, vector<3x32xf32>
    tpu.vector_store %arg16[%c9_305, %c480_306], %195 {strides = array<i32>} : memref<18x512xf32, #tpu.memory_space<vmem>>, vector<3x32xf32>,
    %c107_307 = arith.constant 107 : index
    %c0_308 = arith.constant 0 : index
    %197 = tpu.strided_load %arg15[%c107_307, %c0_308] {strides = array<i32: 2, 1>} : memref<128x32xf32, #tpu.memory_space<vmem>>, vector<3x32xf32>
    %c12_309 = arith.constant 12 : index
    %c480_310 = arith.constant 480 : index
    %198 = vector.load %arg16[%c12_309, %c480_310] : memref<18x512xf32, #tpu.memory_space<vmem>>, vector<3x32xf32>
    tpu.vector_store %arg16[%c12_309, %c480_310], %197 {strides = array<i32>} : memref<18x512xf32, #tpu.memory_space<vmem>>, vector<3x32xf32>,
    %c123 = arith.constant 123 : index
    %c0_311 = arith.constant 0 : index
    %199 = tpu.strided_load %arg15[%c123, %c0_311] {strides = array<i32: 2, 1>} : memref<128x32xf32, #tpu.memory_space<vmem>>, vector<3x32xf32>
    %c15_312 = arith.constant 15 : index
    %c480_313 = arith.constant 480 : index
    %200 = vector.load %arg16[%c15_312, %c480_313] : memref<18x512xf32, #tpu.memory_space<vmem>>, vector<3x32xf32>
    tpu.vector_store %arg16[%c15_312, %c480_313], %199 {strides = array<i32>} : memref<18x512xf32, #tpu.memory_space<vmem>>, vector<3x32xf32>,
    %c0_314 = arith.constant 0 : index
    %c0_315 = arith.constant 0 : index
    %201 = vector.load %arg16[%c0_314, %c0_315] : memref<18x512xf32, #tpu.memory_space<vmem>>, vector<18x512xf32>
    %c0_316 = arith.constant 0 : index
    %c0_317 = arith.constant 0 : index
    %202 = vector.load %arg4[%c0_316, %c0_317] : memref<512x64xf32, #tpu.memory_space<vmem>>, vector<512x64xf32>
    %cst_318 = arith.constant dense<0.000000e+00> : vector<18x64xf32>
    %203 = tpu.matmul %201, %202, %cst_318 {dimension_numbers = #tpu.dot_dimension_numbers<[1], [0], [0], [1], [0, 0, 1, 1], [], []>} : vector<18x512xf32>, vector<512x64xf32>, vector<18x64xf32> -> vector<18x64xf32>
    %c0_319 = arith.constant 0 : index
    %c0_320 = arith.constant 0 : index
    %204 = vector.load %arg5[%c0_319, %c0_320] : memref<1x64xf32, #tpu.memory_space<vmem>>, vector<1x64xf32>
    %205 = vector.broadcast %204 : vector<1x64xf32> to vector<18x64xf32>
    %206 = arith.addf %203, %205 : vector<18x64xf32>
    %cst_321 = arith.constant 0.000000e+00 : f32
    %207 = vector.broadcast %cst_321 : f32 to vector<18x64xf32>
    %208 = arith.maximumf %206, %207 : vector<18x64xf32>
    %c0_322 = arith.constant 0 : index
    %c0_323 = arith.constant 0 : index
    %209 = vector.load %arg17[%c0_322, %c0_323] : memref<18x64xf32, #tpu.memory_space<vmem>>, vector<18x64xf32>
    tpu.vector_store %arg17[%c0_322, %c0_323], %208 {strides = array<i32>} : memref<18x64xf32, #tpu.memory_space<vmem>>, vector<18x64xf32>,
    %c0_324 = arith.constant 0 : index
    %c0_325 = arith.constant 0 : index
    %210 = vector.load %arg17[%c0_324, %c0_325] : memref<18x64xf32, #tpu.memory_space<vmem>>, vector<1x64xf32>
    %c0_326 = arith.constant 0 : index
    %c0_327 = arith.constant 0 : index
    %211 = vector.load %arg18[%c0_326, %c0_327] : memref<2x576xf32, #tpu.memory_space<vmem>>, vector<1x64xf32>
    tpu.vector_store %arg18[%c0_326, %c0_327], %210 {strides = array<i32>} : memref<2x576xf32, #tpu.memory_space<vmem>>, vector<1x64xf32>,
    %c9_328 = arith.constant 9 : index
    %c0_329 = arith.constant 0 : index
    %212 = vector.load %arg17[%c9_328, %c0_329] : memref<18x64xf32, #tpu.memory_space<vmem>>, vector<1x64xf32>
    %c1_330 = arith.constant 1 : index
    %c0_331 = arith.constant 0 : index
    %213 = vector.load %arg18[%c1_330, %c0_331] : memref<2x576xf32, #tpu.memory_space<vmem>>, vector<1x64xf32>
    tpu.vector_store %arg18[%c1_330, %c0_331], %212 {strides = array<i32>} : memref<2x576xf32, #tpu.memory_space<vmem>>, vector<1x64xf32>,
    %c1_332 = arith.constant 1 : index
    %c0_333 = arith.constant 0 : index
    %214 = vector.load %arg17[%c1_332, %c0_333] : memref<18x64xf32, #tpu.memory_space<vmem>>, vector<1x64xf32>
    %c0_334 = arith.constant 0 : index
    %c64_335 = arith.constant 64 : index
    %215 = vector.load %arg18[%c0_334, %c64_335] : memref<2x576xf32, #tpu.memory_space<vmem>>, vector<1x64xf32>
    tpu.vector_store %arg18[%c0_334, %c64_335], %214 {strides = array<i32>} : memref<2x576xf32, #tpu.memory_space<vmem>>, vector<1x64xf32>,
    %c10_336 = arith.constant 10 : index
    %c0_337 = arith.constant 0 : index
    %216 = vector.load %arg17[%c10_336, %c0_337] : memref<18x64xf32, #tpu.memory_space<vmem>>, vector<1x64xf32>
    %c1_338 = arith.constant 1 : index
    %c64_339 = arith.constant 64 : index
    %217 = vector.load %arg18[%c1_338, %c64_339] : memref<2x576xf32, #tpu.memory_space<vmem>>, vector<1x64xf32>
    tpu.vector_store %arg18[%c1_338, %c64_339], %216 {strides = array<i32>} : memref<2x576xf32, #tpu.memory_space<vmem>>, vector<1x64xf32>,
    %c2_340 = arith.constant 2 : index
    %c0_341 = arith.constant 0 : index
    %218 = vector.load %arg17[%c2_340, %c0_341] : memref<18x64xf32, #tpu.memory_space<vmem>>, vector<1x64xf32>
    %c0_342 = arith.constant 0 : index
    %c128_343 = arith.constant 128 : index
    %219 = vector.load %arg18[%c0_342, %c128_343] : memref<2x576xf32, #tpu.memory_space<vmem>>, vector<1x64xf32>
    tpu.vector_store %arg18[%c0_342, %c128_343], %218 {strides = array<i32>} : memref<2x576xf32, #tpu.memory_space<vmem>>, vector<1x64xf32>,
    %c11_344 = arith.constant 11 : index
    %c0_345 = arith.constant 0 : index
    %220 = vector.load %arg17[%c11_344, %c0_345] : memref<18x64xf32, #tpu.memory_space<vmem>>, vector<1x64xf32>
    %c1_346 = arith.constant 1 : index
    %c128_347 = arith.constant 128 : index
    %221 = vector.load %arg18[%c1_346, %c128_347] : memref<2x576xf32, #tpu.memory_space<vmem>>, vector<1x64xf32>
    tpu.vector_store %arg18[%c1_346, %c128_347], %220 {strides = array<i32>} : memref<2x576xf32, #tpu.memory_space<vmem>>, vector<1x64xf32>,
    %c3_348 = arith.constant 3 : index
    %c0_349 = arith.constant 0 : index
    %222 = vector.load %arg17[%c3_348, %c0_349] : memref<18x64xf32, #tpu.memory_space<vmem>>, vector<1x64xf32>
    %c0_350 = arith.constant 0 : index
    %c192_351 = arith.constant 192 : index
    %223 = vector.load %arg18[%c0_350, %c192_351] : memref<2x576xf32, #tpu.memory_space<vmem>>, vector<1x64xf32>
    tpu.vector_store %arg18[%c0_350, %c192_351], %222 {strides = array<i32>} : memref<2x576xf32, #tpu.memory_space<vmem>>, vector<1x64xf32>,
    %c12_352 = arith.constant 12 : index
    %c0_353 = arith.constant 0 : index
    %224 = vector.load %arg17[%c12_352, %c0_353] : memref<18x64xf32, #tpu.memory_space<vmem>>, vector<1x64xf32>
    %c1_354 = arith.constant 1 : index
    %c192_355 = arith.constant 192 : index
    %225 = vector.load %arg18[%c1_354, %c192_355] : memref<2x576xf32, #tpu.memory_space<vmem>>, vector<1x64xf32>
    tpu.vector_store %arg18[%c1_354, %c192_355], %224 {strides = array<i32>} : memref<2x576xf32, #tpu.memory_space<vmem>>, vector<1x64xf32>,
    %c4 = arith.constant 4 : index
    %c0_356 = arith.constant 0 : index
    %226 = vector.load %arg17[%c4, %c0_356] : memref<18x64xf32, #tpu.memory_space<vmem>>, vector<1x64xf32>
    %c0_357 = arith.constant 0 : index
    %c256_358 = arith.constant 256 : index
    %227 = vector.load %arg18[%c0_357, %c256_358] : memref<2x576xf32, #tpu.memory_space<vmem>>, vector<1x64xf32>
    tpu.vector_store %arg18[%c0_357, %c256_358], %226 {strides = array<i32>} : memref<2x576xf32, #tpu.memory_space<vmem>>, vector<1x64xf32>,
    %c13 = arith.constant 13 : index
    %c0_359 = arith.constant 0 : index
    %228 = vector.load %arg17[%c13, %c0_359] : memref<18x64xf32, #tpu.memory_space<vmem>>, vector<1x64xf32>
    %c1_360 = arith.constant 1 : index
    %c256_361 = arith.constant 256 : index
    %229 = vector.load %arg18[%c1_360, %c256_361] : memref<2x576xf32, #tpu.memory_space<vmem>>, vector<1x64xf32>
    tpu.vector_store %arg18[%c1_360, %c256_361], %228 {strides = array<i32>} : memref<2x576xf32, #tpu.memory_space<vmem>>, vector<1x64xf32>,
    %c5 = arith.constant 5 : index
    %c0_362 = arith.constant 0 : index
    %230 = vector.load %arg17[%c5, %c0_362] : memref<18x64xf32, #tpu.memory_space<vmem>>, vector<1x64xf32>
    %c0_363 = arith.constant 0 : index
    %c320_364 = arith.constant 320 : index
    %231 = vector.load %arg18[%c0_363, %c320_364] : memref<2x576xf32, #tpu.memory_space<vmem>>, vector<1x64xf32>
    tpu.vector_store %arg18[%c0_363, %c320_364], %230 {strides = array<i32>} : memref<2x576xf32, #tpu.memory_space<vmem>>, vector<1x64xf32>,
    %c14 = arith.constant 14 : index
    %c0_365 = arith.constant 0 : index
    %232 = vector.load %arg17[%c14, %c0_365] : memref<18x64xf32, #tpu.memory_space<vmem>>, vector<1x64xf32>
    %c1_366 = arith.constant 1 : index
    %c320_367 = arith.constant 320 : index
    %233 = vector.load %arg18[%c1_366, %c320_367] : memref<2x576xf32, #tpu.memory_space<vmem>>, vector<1x64xf32>
    tpu.vector_store %arg18[%c1_366, %c320_367], %232 {strides = array<i32>} : memref<2x576xf32, #tpu.memory_space<vmem>>, vector<1x64xf32>,
    %c6_368 = arith.constant 6 : index
    %c0_369 = arith.constant 0 : index
    %234 = vector.load %arg17[%c6_368, %c0_369] : memref<18x64xf32, #tpu.memory_space<vmem>>, vector<1x64xf32>
    %c0_370 = arith.constant 0 : index
    %c384_371 = arith.constant 384 : index
    %235 = vector.load %arg18[%c0_370, %c384_371] : memref<2x576xf32, #tpu.memory_space<vmem>>, vector<1x64xf32>
    tpu.vector_store %arg18[%c0_370, %c384_371], %234 {strides = array<i32>} : memref<2x576xf32, #tpu.memory_space<vmem>>, vector<1x64xf32>,
    %c15_372 = arith.constant 15 : index
    %c0_373 = arith.constant 0 : index
    %236 = vector.load %arg17[%c15_372, %c0_373] : memref<18x64xf32, #tpu.memory_space<vmem>>, vector<1x64xf32>
    %c1_374 = arith.constant 1 : index
    %c384_375 = arith.constant 384 : index
    %237 = vector.load %arg18[%c1_374, %c384_375] : memref<2x576xf32, #tpu.memory_space<vmem>>, vector<1x64xf32>
    tpu.vector_store %arg18[%c1_374, %c384_375], %236 {strides = array<i32>} : memref<2x576xf32, #tpu.memory_space<vmem>>, vector<1x64xf32>,
    %c7 = arith.constant 7 : index
    %c0_376 = arith.constant 0 : index
    %238 = vector.load %arg17[%c7, %c0_376] : memref<18x64xf32, #tpu.memory_space<vmem>>, vector<1x64xf32>
    %c0_377 = arith.constant 0 : index
    %c448_378 = arith.constant 448 : index
    %239 = vector.load %arg18[%c0_377, %c448_378] : memref<2x576xf32, #tpu.memory_space<vmem>>, vector<1x64xf32>
    tpu.vector_store %arg18[%c0_377, %c448_378], %238 {strides = array<i32>} : memref<2x576xf32, #tpu.memory_space<vmem>>, vector<1x64xf32>,
    %c16_379 = arith.constant 16 : index
    %c0_380 = arith.constant 0 : index
    %240 = vector.load %arg17[%c16_379, %c0_380] : memref<18x64xf32, #tpu.memory_space<vmem>>, vector<1x64xf32>
    %c1_381 = arith.constant 1 : index
    %c448_382 = arith.constant 448 : index
    %241 = vector.load %arg18[%c1_381, %c448_382] : memref<2x576xf32, #tpu.memory_space<vmem>>, vector<1x64xf32>
    tpu.vector_store %arg18[%c1_381, %c448_382], %240 {strides = array<i32>} : memref<2x576xf32, #tpu.memory_space<vmem>>, vector<1x64xf32>,
    %c8_383 = arith.constant 8 : index
    %c0_384 = arith.constant 0 : index
    %242 = vector.load %arg17[%c8_383, %c0_384] : memref<18x64xf32, #tpu.memory_space<vmem>>, vector<1x64xf32>
    %c0_385 = arith.constant 0 : index
    %c512 = arith.constant 512 : index
    %243 = vector.load %arg18[%c0_385, %c512] : memref<2x576xf32, #tpu.memory_space<vmem>>, vector<1x64xf32>
    tpu.vector_store %arg18[%c0_385, %c512], %242 {strides = array<i32>} : memref<2x576xf32, #tpu.memory_space<vmem>>, vector<1x64xf32>,
    %c17_386 = arith.constant 17 : index
    %c0_387 = arith.constant 0 : index
    %244 = vector.load %arg17[%c17_386, %c0_387] : memref<18x64xf32, #tpu.memory_space<vmem>>, vector<1x64xf32>
    %c1_388 = arith.constant 1 : index
    %c512_389 = arith.constant 512 : index
    %245 = vector.load %arg18[%c1_388, %c512_389] : memref<2x576xf32, #tpu.memory_space<vmem>>, vector<1x64xf32>
    tpu.vector_store %arg18[%c1_388, %c512_389], %244 {strides = array<i32>} : memref<2x576xf32, #tpu.memory_space<vmem>>, vector<1x64xf32>,
    %c0_390 = arith.constant 0 : index
    %c0_391 = arith.constant 0 : index
    %246 = vector.load %arg18[%c0_390, %c0_391] : memref<2x576xf32, #tpu.memory_space<vmem>>, vector<2x576xf32>
    %c0_392 = arith.constant 0 : index
    %c0_393 = arith.constant 0 : index
    %247 = vector.load %arg6[%c0_392, %c0_393] : memref<576x64xf32, #tpu.memory_space<vmem>>, vector<576x64xf32>
    %cst_394 = arith.constant dense<0.000000e+00> : vector<2x64xf32>
    %248 = tpu.matmul %246, %247, %cst_394 {dimension_numbers = #tpu.dot_dimension_numbers<[1], [0], [0], [1], [0, 0, 1, 1], [], []>} : vector<2x576xf32>, vector<576x64xf32>, vector<2x64xf32> -> vector<2x64xf32>
    %c0_395 = arith.constant 0 : index
    %c0_396 = arith.constant 0 : index
    %249 = vector.load %arg7[%c0_395, %c0_396] : memref<1x64xf32, #tpu.memory_space<vmem>>, vector<1x64xf32>
    %250 = vector.broadcast %249 : vector<1x64xf32> to vector<2x64xf32>
    %251 = arith.addf %248, %250 : vector<2x64xf32>
    %cst_397 = arith.constant 0.000000e+00 : f32
    %252 = vector.broadcast %cst_397 : f32 to vector<2x64xf32>
    %253 = arith.maximumf %251, %252 : vector<2x64xf32>
    %c0_398 = arith.constant 0 : index
    %c0_399 = arith.constant 0 : index
    %254 = vector.load %arg19[%c0_398, %c0_399] : memref<2x64xf32, #tpu.memory_space<vmem>>, vector<2x64xf32>
    tpu.vector_store %arg19[%c0_398, %c0_399], %253 {strides = array<i32>} : memref<2x64xf32, #tpu.memory_space<vmem>>, vector<2x64xf32>,
    %c0_400 = arith.constant 0 : index
    %c0_401 = arith.constant 0 : index
    %255 = vector.load %arg19[%c0_400, %c0_401] : memref<2x64xf32, #tpu.memory_space<vmem>>, vector<2x64xf32>
    %c0_402 = arith.constant 0 : index
    %c0_403 = arith.constant 0 : index
    %256 = vector.load %arg20[%c0_402, %c0_403] : memref<2x64xf32, #tpu.memory_space<vmem>>, vector<2x64xf32>
    tpu.vector_store %arg20[%c0_402, %c0_403], %255 {strides = array<i32>} : memref<2x64xf32, #tpu.memory_space<vmem>>, vector<2x64xf32>,
    %c0_404 = arith.constant 0 : index
    %c0_405 = arith.constant 0 : index
    %257 = vector.load %arg20[%c0_404, %c0_405] : memref<2x64xf32, #tpu.memory_space<vmem>>, vector<2x64xf32>
    %c0_406 = arith.constant 0 : index
    %c0_407 = arith.constant 0 : index
    %258 = vector.load %arg8[%c0_406, %c0_407] : memref<64x512xf32, #tpu.memory_space<vmem>>, vector<64x512xf32>
    %cst_408 = arith.constant dense<0.000000e+00> : vector<2x512xf32>
    %259 = tpu.matmul %257, %258, %cst_408 {dimension_numbers = #tpu.dot_dimension_numbers<[1], [0], [0], [1], [0, 0, 1, 1], [], []>} : vector<2x64xf32>, vector<64x512xf32>, vector<2x512xf32> -> vector<2x512xf32>
    %c0_409 = arith.constant 0 : index
    %c0_410 = arith.constant 0 : index
    %260 = vector.load %arg9[%c0_409, %c0_410] : memref<1x512xf32, #tpu.memory_space<vmem>>, vector<1x512xf32>
    %261 = vector.broadcast %260 : vector<1x512xf32> to vector<2x512xf32>
    %262 = arith.addf %259, %261 : vector<2x512xf32>
    %cst_411 = arith.constant 0.000000e+00 : f32
    %263 = vector.broadcast %cst_411 : f32 to vector<2x512xf32>
    %264 = arith.maximumf %262, %263 : vector<2x512xf32>
    %c0_412 = arith.constant 0 : index
    %c0_413 = arith.constant 0 : index
    %265 = vector.load %arg10[%c0_412, %c0_413] : memref<512x512xf32, #tpu.memory_space<vmem>>, vector<512x512xf32>
    %cst_414 = arith.constant dense<0.000000e+00> : vector<2x512xf32>
    %266 = tpu.matmul %264, %265, %cst_414 {dimension_numbers = #tpu.dot_dimension_numbers<[1], [0], [0], [1], [0, 0, 1, 1], [], []>} : vector<2x512xf32>, vector<512x512xf32>, vector<2x512xf32> -> vector<2x512xf32>
    %c0_415 = arith.constant 0 : index
    %c0_416 = arith.constant 0 : index
    %267 = vector.load %arg11[%c0_415, %c0_416] : memref<1x512xf32, #tpu.memory_space<vmem>>, vector<1x512xf32>
    %268 = vector.broadcast %267 : vector<1x512xf32> to vector<2x512xf32>
    %269 = arith.addf %266, %268 : vector<2x512xf32>
    %cst_417 = arith.constant 0.000000e+00 : f32
    %270 = vector.broadcast %cst_417 : f32 to vector<2x512xf32>
    %271 = arith.maximumf %269, %270 : vector<2x512xf32>
    %c0_418 = arith.constant 0 : index
    %c0_419 = arith.constant 0 : index
    %272 = vector.load %arg12[%c0_418, %c0_419] : memref<512x256xf32, #tpu.memory_space<vmem>>, vector<512x256xf32>
    %cst_420 = arith.constant dense<0.000000e+00> : vector<2x256xf32>
    %273 = tpu.matmul %271, %272, %cst_420 {dimension_numbers = #tpu.dot_dimension_numbers<[1], [0], [0], [1], [0, 0, 1, 1], [], []>} : vector<2x512xf32>, vector<512x256xf32>, vector<2x256xf32> -> vector<2x256xf32>
    %c0_421 = arith.constant 0 : index
    %c0_422 = arith.constant 0 : index
    %274 = vector.load %arg13[%c0_421, %c0_422] : memref<1x256xf32, #tpu.memory_space<vmem>>, vector<1x256xf32>
    %275 = vector.broadcast %274 : vector<1x256xf32> to vector<2x256xf32>
    %276 = arith.addf %273, %275 : vector<2x256xf32>
    %c0_423 = arith.constant 0 : index
    %c0_424 = arith.constant 0 : index
    %277 = vector.load %arg14[%c0_423, %c0_424] : memref<2x256xf32, #tpu.memory_space<vmem>>, vector<2x256xf32>
    tpu.vector_store %arg14[%c0_423, %c0_424], %276 {strides = array<i32>} : memref<2x256xf32, #tpu.memory_space<vmem>>, vector<2x256xf32>,
    return
  }
  func.func @transform_0(%arg0: i32) -> (i32, i32) {
    %c0_i32 = arith.constant 0 : i32
    %c0_i32_0 = arith.constant 0 : i32
    return %arg0, %c0_i32 : i32, i32
  }
  func.func @transform_1(%arg0: i32) -> (i32, i32) {
    %c0_i32 = arith.constant 0 : i32
    %c0_i32_0 = arith.constant 0 : i32
    %c0_i32_1 = arith.constant 0 : i32
    return %c0_i32, %c0_i32_0 : i32, i32
  }
  func.func @transform_2(%arg0: i32) -> (i32, i32) {
    %c0_i32 = arith.constant 0 : i32
    %c0_i32_0 = arith.constant 0 : i32
    %c0_i32_1 = arith.constant 0 : i32
    return %c0_i32, %c0_i32_0 : i32, i32
  }
  func.func @transform_3(%arg0: i32) -> (i32, i32) {
    %c0_i32 = arith.constant 0 : i32
    %c0_i32_0 = arith.constant 0 : i32
    %c0_i32_1 = arith.constant 0 : i32
    return %c0_i32, %c0_i32_0 : i32, i32
  }
  func.func @transform_4(%arg0: i32) -> (i32, i32) {
    %c0_i32 = arith.constant 0 : i32
    %c0_i32_0 = arith.constant 0 : i32
    %c0_i32_1 = arith.constant 0 : i32
    return %c0_i32, %c0_i32_0 : i32, i32
  }
  func.func @transform_5(%arg0: i32) -> (i32, i32) {
    %c0_i32 = arith.constant 0 : i32
    %c0_i32_0 = arith.constant 0 : i32
    %c0_i32_1 = arith.constant 0 : i32
    return %c0_i32, %c0_i32_0 : i32, i32
  }
  func.func @transform_6(%arg0: i32) -> (i32, i32) {
    %c0_i32 = arith.constant 0 : i32
    %c0_i32_0 = arith.constant 0 : i32
    %c0_i32_1 = arith.constant 0 : i32
    return %c0_i32, %c0_i32_0 : i32, i32
  }
  func.func @transform_7(%arg0: i32) -> (i32, i32) {
    %c0_i32 = arith.constant 0 : i32
    %c0_i32_0 = arith.constant 0 : i32
    %c0_i32_1 = arith.constant 0 : i32
    return %c0_i32, %c0_i32_0 : i32, i32
  }
  func.func @transform_8(%arg0: i32) -> (i32, i32) {
    %c0_i32 = arith.constant 0 : i32
    %c0_i32_0 = arith.constant 0 : i32
    %c0_i32_1 = arith.constant 0 : i32
    return %c0_i32, %c0_i32_0 : i32, i32
  }
  func.func @transform_9(%arg0: i32) -> (i32, i32) {
    %c0_i32 = arith.constant 0 : i32
    %c0_i32_0 = arith.constant 0 : i32
    %c0_i32_1 = arith.constant 0 : i32
    return %c0_i32, %c0_i32_0 : i32, i32
  }
  func.func @transform_10(%arg0: i32) -> (i32, i32) {
    %c0_i32 = arith.constant 0 : i32
    %c0_i32_0 = arith.constant 0 : i32
    %c0_i32_1 = arith.constant 0 : i32
    return %c0_i32, %c0_i32_0 : i32, i32
  }
  func.func @transform_11(%arg0: i32) -> (i32, i32) {
    %c0_i32 = arith.constant 0 : i32
    %c0_i32_0 = arith.constant 0 : i32
    %c0_i32_1 = arith.constant 0 : i32
    return %c0_i32, %c0_i32_0 : i32, i32
  }
  func.func @transform_12(%arg0: i32) -> (i32, i32) {
    %c0_i32 = arith.constant 0 : i32
    %c0_i32_0 = arith.constant 0 : i32
    %c0_i32_1 = arith.constant 0 : i32
    return %c0_i32, %c0_i32_0 : i32, i32
  }
  func.func @transform_13(%arg0: i32) -> (i32, i32) {
    %c0_i32 = arith.constant 0 : i32
    %c0_i32_0 = arith.constant 0 : i32
    return %arg0, %c0_i32 : i32, i32
  }
}

</mosaic_0001>

<bundles_post_ra>
// kernel: forward.1
= control target key start
LH: loop header
LB: loop body
LE: loop exit
PB: predicated region body
PF: predicated region fallthrough
CT: control target
= control target key end

     0   :  { %vm75_vm0 = vcmask 523264   ;;  %vm285_vm1 = vcmask 261120   ;;  %s3085_s22 = smov 96   ;;  %vm303_vm2 = vcmask 256000   ;;  %vm310_vm3 = vcmask 259075   ;;  %s5247_s1 = inlined_call_operand.vmem [shape: f32[64,32], index: 1, kind: input, shape index: {}]   ;;  %s5248_s0 = inlined_call_operand.vmem [shape: f32[128,64], index: 0, kind: input, shape index: {}]   ;;  %s5249_s2 = inlined_call_operand.vmem [shape: f32[1,32], index: 2, kind: input, shape index: {}]   ;;  %s5250_s3 = inlined_call_operand.vmem [shape: f32[512,64], index: 3, kind: input, shape index: {}]   ;;  %s5251_s4 = inlined_call_operand.vmem [shape: f32[1,64], index: 4, kind: input, shape index: {}]   ;;  %s5252_s5 = inlined_call_operand.vmem [shape: f32[576,64], index: 5, kind: input, shape index: {}]   ;;  %s5253_s7 = inlined_call_operand.vmem [shape: f32[64,512], index: 7, kind: input, shape index: {}]   ;;  %s5254_s9 = inlined_call_operand.vmem [shape: f32[512,512], index: 9, kind: input, shape index: {}]   ;;  %s5255_s6 = inlined_call_operand.vmem [shape: f32[1,64], index: 6, kind: input, shape index: {}]   ;;  %s5256_s8 = inlined_call_operand.vmem [shape: f32[1,512], index: 8, kind: input, shape index: {}]   ;;  %s5257_s11 = inlined_call_operand.vmem [shape: f32[512,256], index: 11, kind: input, shape index: {}]   ;;  %s5258_s10 = inlined_call_operand.vmem [shape: f32[1,512], index: 10, kind: input, shape index: {}]   ;;  %s5259_s12 = inlined_call_operand.vmem [shape: f32[1,256], index: 12, kind: input, shape index: {}]   ;;  %s5260_s13 = inlined_call_operand.vmem [shape: f32[2,256], index: 13, kind: output, shape index: {}]  }
   0x1   :  { %v67_v0 = vld [vmem:[%s5247_s1 + $0x38] sm:$0xff]  ;;  %v66_v1 = vld [vmem:[%s5247_s1 + $0x30] sm:$0xff]  ;;  %v65_v2 = vld [vmem:[%s5247_s1 + $0x28] sm:$0xff]  ;;  %vm317_vm4 = vcmask 261126   ;;  %vm319_vm5 = vcmask 253952   ;;  %vm326_vm6 = vcmask 257025  }
   0x2   :  { %3017 = vmatprep.subr.mxu0 %v67_v0  ;;  %v44_v3 = vld [vmem:[%s5248_s0] sm:$0xff]  ;;  %v63_v5 = vld [vmem:[%s5247_s1 + $0x18] sm:$0xff]  ;;  %v62_v6 = vld [vmem:[%s5247_s1 + $0x10] sm:$0xff]  ;;  %vm333_vm7 = vcmask 260100   ;;  %vm340_vm8 = vcmask 261127   ;;  %vm342_vm9 = vcmask 254976  }
   0x3   :  { %3018 = vmatpush3.msra.mxu0 %v67_v0  ;;  %3033 = vmatprep.mubr.msk.f32.mxu0 %vm75_vm0, %v44_v3  ;;  %v64_v4 = vld [vmem:[%s5247_s1 + $0x20] sm:$0xff]  ;;  %v61_v7 = vld [vmem:[%s5247_s1 + $0x8] sm:$0xff]  ;;  %v46_v10 = vld [vmem:[%s5248_s0 + $0x10] sm:$0xff]  ;;  %vm350_vm10 = vcmask 518400   ;;  %vm407_vm11 = vcmask 780800   ;;  %vm464_vm12 = vcmask 1043200  }
   0x4   :  { %3019 = vmatprep.subr.mxu0 %v66_v1  ;;  %v60_v8 = vld [vmem:[%s5247_s1] sm:$0xff]  ;;  %v45_v9 = vld [vmem:[%s5248_s0 + $0x8] sm:$0xff]  ;;  %v47_v11 = vld [vmem:[%s5248_s0 + $0x18] sm:$0xff]  ;;  %vm359_vm13 = vcmask 521475   ;;  %vm416_vm14 = vcmask 783875   ;;  %vm473_vm15 = vcmask 1046275  }
   0x5   :  { %3020 = vmatpush3.msra.mxu0 %v66_v1  ;;  %v48_v12 = vld [vmem:[%s5248_s0 + $0x20] sm:$0xff]  ;;  %v49_v13 = vld [vmem:[%s5248_s0 + $0x28] sm:$0xff]  ;;  %v50_v14 = vld [vmem:[%s5248_s0 + $0x30] sm:$0xff] }
   0x6   :  { %3021 = vmatprep.subr.mxu0 %v65_v2  ;;  %v51_v15 = vld [vmem:[%s5248_s0 + $0x38] sm:$0xff]  ;;  %v52_v16 = vld [vmem:[%s5248_s0 + $0x40] sm:$0xff]  ;;  %v53_v17 = vld [vmem:[%s5248_s0 + $0x48] sm:$0xff] }
   0x7   :  { %3022 = vmatpush3.msra.mxu0 %v65_v2  ;;  %v54_v18 = vld [vmem:[%s5248_s0 + $0x50] sm:$0xff]  ;;  %v55_v19 = vld [vmem:[%s5248_s0 + $0x58] sm:$0xff]  ;;  %v56_v20 = vld [vmem:[%s5248_s0 + $0x60] sm:$0xff] }
   0x8   :  { %3023 = vmatprep.subr.mxu0 %v64_v4  ;;  %v57_v21 = vld [vmem:[%s5248_s0 + $0x68] sm:$0xff]  ;;  %v58_v22 = vld [vmem:[%s5248_s0 + $0x70] sm:$0xff]  ;;  %v59_v23 = vld [vmem:[%s5248_s0 + $0x78] sm:$0xff]  ;;  %s3083_s0 = smov 32  }
   0x9   :  { %3024 = vmatpush3.msra.mxu0 %v64_v4  ;;  %v3250_v24 = vld [vmem:[%s5249_s2] ss:$0 sm:$0xff]  ;;  %s3084_s2 = smov 64  }
   0xa   :  { %3025 = vmatprep.subr.mxu0 %v63_v5 }
   0xb   :  { %3026 = vmatpush3.msra.mxu0 %v63_v5 }
   0xc   :  { %3027 = vmatprep.subr.mxu0 %v62_v6 }
   0xd   :  { %3028 = vmatpush3.msra.mxu0 %v62_v6 }
   0xe   :  { %3029 = vmatprep.subr.mxu0 %v61_v7 }
   0xf   :  { %3030 = vmatpush3.msra.mxu0 %v61_v7 }
  0x10   :  { %3031 = vmatprep.subr.mxu0 %v60_v8 }
  0x11   :  { %3032 = vmatpush3.msra.mxu0 %v60_v8 }
  0x12   :  { %3034 = vmatmul.mubr.msk.f32.vlgmr.msra.gmra.mxu0 %vm75_vm0, %v45_v9 }
  0x13   :  { %3036 = vmatprep.mubr.msk.f32.mxu0 %vm75_vm0, %v46_v10 }
  0x16   :  { %3037 = vmatmul.mubr.msk.f32.gmra.mxu0 %vm75_vm0, %v47_v11 }
  0x17   :  { %3039 = vmatprep.mubr.msk.f32.mxu0 %vm75_vm0, %v48_v12 }
  0x1a   :  { %3040 = vmatmul.mubr.msk.f32.gmra.mxu0 %vm75_vm0, %v49_v13 }
  0x1b   :  { %3042 = vmatprep.mubr.msk.f32.mxu0 %vm75_vm0, %v50_v14 }
  0x1e   :  { %3043 = vmatmul.mubr.msk.f32.gmra.mxu0 %vm75_vm0, %v51_v15 }
  0x1f   :  { %3045 = vmatprep.mubr.msk.f32.mxu0 %vm75_vm0, %v52_v16 }
  0x22   :  { %3046 = vmatmul.mubr.msk.f32.gmra.mxu0 %vm75_vm0, %v53_v17 }
  0x23   :  { %3048 = vmatprep.mubr.msk.f32.mxu0 %vm75_vm0, %v54_v18 }
  0x26   :  { %3049 = vmatmul.mubr.msk.f32.gmra.mxu0 %vm75_vm0, %v55_v19 }
  0x27   :  { %3051 = vmatprep.mubr.msk.f32.mxu0 %vm75_vm0, %v56_v20 }
  0x2a   :  { %3052 = vmatmul.mubr.msk.f32.gmra.mxu0 %vm75_vm0, %v57_v21 }
  0x2b   :  { %3054 = vmatprep.mubr.msk.f32.mxu0 %vm75_vm0, %v58_v22 }
  0x2e   :  { %3055 = vmatmul.mubr.msk.f32.gmra.mxu0 %vm75_vm0, %v59_v23 }
  0xd2   :  { %v3035_v25 = vpop.f32.mrf.mxu0 }
  0xd3   :  { %v196_v26 = vadd.f32 %v3035_v25, %v3250_v24  ;;  %v1072_v25 = vld [vmem:[%s5250_s3 + $0xf8] sm:$0xff] }
  0xd4   :  { %v190_v27 = vpop.f32.mrf.mxu0  ;;  %2856 = vmatprep.subr.mxu1 %v1072_v25  ;;  %v1099_v25 = vld [vmem:[%s5250_s3 + $0x1d0] sm:$0xff] }
  0xd5   :  { %v270_v28 = vmax.f32 %v196_v26, 0.0  ;;  %v191_v29 = vadd.f32 %v3250_v24, %v190_v27  ;;  %v1056_v26 = vld [vmem:[%s5250_s3 + $0x78] sm:$0xff]  ;;  %v1071_v27 = vld [vmem:[%s5250_s3 + $0xf0] sm:$0xff] }
  0xd6   :  { %v3038_v30 = vpop.f32.mrf.mxu0  ;;  %2857 = vmatpush3.msra.mxu1 %v1056_v26  ;;  %v1043_v26 = vld [vmem:[%s5250_s3 + $0x10] sm:$0xff] }
  0xd7   :  { %287 = vst.msk [vmem:[#allocation2 + $0x8] sm:$0xff] %vm285_vm1, %v270_v28  ;;  %v269_v31 = vmax.f32 %v191_v29, 0.0  ;;  %v206_v32 = vadd.f32 %v3038_v30, %v3250_v24  ;;  %2858 = vmatprep.subr.mxu1 %v1071_v27  ;;  %v1070_v30 = vld [vmem:[%s5250_s3 + $0xe8] sm:$0xff] }
  0xd8   :  { %v200_v33 = vpop.f32.mrf.mxu0 }
  0xd9   :  { %286 = vst.msk [vmem:[#allocation2] sm:$0xff] %vm285_vm1, %v269_v31  ;;  %v272_v34 = vmax.f32 %v206_v32, 0.0  ;;  %v201_v35 = vadd.f32 %v3250_v24, %v200_v33  ;;  %v1054_v31 = vld [vmem:[%s5250_s3 + $0x68] sm:$0xff]  ;;  %v1069_v33 = vld [vmem:[%s5250_s3 + $0xe0] sm:$0xff] }
  0xda   :  { %v3041_v36 = vpop.f32.mrf.mxu0 }
  0xdb   :  { %289 = vst.msk [vmem:[#allocation2 + $0x18] sm:$0xff] %vm285_vm1, %v272_v34  ;;  %v271_v37 = vmax.f32 %v201_v35, 0.0  ;;  %v216_v38 = vadd.f32 %v3041_v36, %v3250_v24  ;;  %v1053_v34 = vld [vmem:[%s5250_s3 + $0x60] sm:$0xff] }
  0xdc   :  { %v210_v39 = vpop.f32.mrf.mxu0 }
  0xdd   :  { %288 = vst.msk [vmem:[#allocation2 + $0x10] sm:$0xff] %vm285_vm1, %v271_v37  ;;  %v274_v40 = vmax.f32 %v216_v38, 0.0  ;;  %v211_v41 = vadd.f32 %v3250_v24, %v210_v39  ;;  %v1068_v38 = vld [vmem:[%s5250_s3 + $0xd8] sm:$0xff] }
  0xde   :  { %v551_v42 = vld [vmem:[#allocation2 + $0x9] ss:$2 sm:$0x7]  ;;  %v3044_v43 = vpop.f32.mrf.mxu0  ;;  %v600_v50 = vld [vmem:[#allocation2 + $0xa] ss:$2 sm:$0x7] }
  0xdf   :  { %553 = vrot.lane.b32.xlu0 %v551_v42, %s3083_s0  ;;  %291 = vst.msk [vmem:[#allocation2 + $0x28] sm:$0xff] %vm285_vm1, %v274_v40  ;;  %v273_v44 = vmax.f32 %v211_v41, 0.0  ;;  %v226_v45 = vadd.f32 %v3044_v43, %v3250_v24  ;;  %v649_v58 = vld [vmem:[#allocation2 + $0xb] ss:$2 sm:$0x7]  ;;  %v1052_v39 = vld [vmem:[%s5250_s3 + $0x58] sm:$0xff] }
  0xe0   :  { %v345_v46 = vld [vmem:[#allocation2 + $0x1] ss:$2 sm:$0x7]  ;;  %v220_v47 = vpop.f32.mrf.mxu0  ;;  %v402_v53 = vld [vmem:[#allocation2 + $0x2] ss:$2 sm:$0x7] }
  0xe1   :  { %347 = vrot.lane.b32.xlu1 %v345_v46, %s3083_s0  ;;  %290 = vst.msk [vmem:[#allocation2 + $0x20] sm:$0xff] %vm285_vm1, %v273_v44  ;;  %v276_v48 = vmax.f32 %v226_v45, 0.0  ;;  %v221_v49 = vadd.f32 %v3250_v24, %v220_v47  ;;  %v459_v1 = vld [vmem:[#allocation2 + $0x3] ss:$2 sm:$0x7]  ;;  %v1067_v41 = vld [vmem:[%s5250_s3 + $0xd0] sm:$0xff] }
  0xe2   :  { %v3047_v51 = vpop.f32.mrf.mxu0  ;;  %v894_v59 = vld [vmem:[#allocation2 + $0x19] ss:$2 sm:$0x7]  ;;  %v607_v7 = vld [vmem:[#allocation2 + $0x1a] ss:$2 sm:$0x7] }
  0xe3   :  { %602 = vrot.lane.b32.xlu0 %v600_v50, %s3084_s2  ;;  %293 = vst.msk [vmem:[#allocation2 + $0x38] sm:$0xff] %vm285_vm1, %v276_v48  ;;  %v236_v52 = vadd.f32 %v3047_v51, %v3250_v24  ;;  %v275_v54 = vmax.f32 %v221_v49, 0.0  ;;  %v984_v6 = vld [vmem:[#allocation2 + $0x1b] ss:$2 sm:$0x7]  ;;  %v609_v14 = vrot.slane %v607_v7, 5 }
  0xe4   :  { %v230_v55 = vpop.f32.mrf.mxu0  ;;  %v939_v11 = vld [vmem:[#allocation2 + $0x1a] ss:$2 sm:$0x7]  ;;  %v558_v12 = vld [vmem:[#allocation2 + $0x19] ss:$2 sm:$0x7] }
  0xe5   :  { %404 = vrot.lane.b32.xlu1 %v402_v53, %s3084_s2  ;;  %v278_v56 = vmax.f32 %v236_v52, 0.0  ;;  %v231_v57 = vadd.f32 %v3250_v24, %v230_v55  ;;  %292 = vst.msk [vmem:[#allocation2 + $0x30] sm:$0xff] %vm285_vm1, %v275_v54  ;;  %v656_v17 = vld [vmem:[#allocation2 + $0x1b] ss:$2 sm:$0x7]  ;;  %v560_v19 = vrot.slane %v558_v12, 5 }
  0xe6   :  { %v3050_v60 = vpop.f32.mrf.mxu0  ;;  %v658_v22 = vrot.slane %v656_v17, 5  ;;  %v773_v28 = vld [vmem:[#allocation2 + $0x12] ss:$2 sm:$0x7]  ;;  %v1066_v46 = vld [vmem:[%s5250_s3 + $0xc8] sm:$0xff]  ;;  %v1065_v49 = vld [vmem:[%s5250_s3 + $0xc0] sm:$0xff] }
  0xe7   :  { %651 = vrot.lane.b32.xlu0 %v649_v58, %s3085_s22  ;;  %295 = vst.msk [vmem:[#allocation2 + $0x48] sm:$0xff] %vm285_vm1, %v278_v56  ;;  %v246_v61 = vadd.f32 %v3050_v60, %v3250_v24  ;;  %v277_v63 = vmax.f32 %v231_v57, 0.0  ;;  %v728_v29 = vld [vmem:[#allocation2 + $0x11] ss:$2 sm:$0x7]  ;;  %v1050_v47 = vld [vmem:[%s5250_s3 + $0x48] sm:$0xff] }
  0xe8   :  { %v240_v62 = vpop.f32.mrf.mxu0  ;;  %v467_v32 = vld [vmem:[#allocation2 + $0x13] ss:$2 sm:$0x7]  ;;  %v566_v37 = vld [vmem:[#allocation2 + $0x29] ss:$2 sm:$0x7] }
  0xe9   :  { %896 = vrot.lane.b32.xlu1 %v894_v59, %s3083_s0  ;;  %v241_v0 = vadd.f32 %v3250_v24, %v240_v62  ;;  %v280_v2 = vmax.f32 %v246_v61, 0.0  ;;  %294 = vst.msk [vmem:[#allocation2 + $0x40] sm:$0xff] %vm285_vm1, %v277_v63  ;;  %v818_v35 = vld [vmem:[#allocation2 + $0x13] ss:$2 sm:$0x7]  ;;  %v469_v40 = vrot.slane %v467_v32, 5 }
  0xea   :  { %v3053_v3 = vpop.f32.mrf.mxu0  ;;  %v353_v36 = vld [vmem:[#allocation2 + $0x11] ss:$2 sm:$0x7]  ;;  %v568_v44 = vrot.slane %v566_v37, 2  ;;  %v1049_v50 = vld [vmem:[%s5250_s3 + $0x40] sm:$0xff]  ;;  %v1064_v54 = vld [vmem:[%s5250_s3 + $0xb8] sm:$0xff] }
  0xeb   :  { %461 = vrot.lane.b32.xlu0 %v459_v1, %s3085_s22  ;;  %v279_v4 = vmax.f32 %v241_v0, 0.0  ;;  %v256_v5 = vadd.f32 %v3053_v3, %v3250_v24  ;;  %297 = vst.msk [vmem:[#allocation2 + $0x58] sm:$0xff] %vm285_vm1, %v280_v2  ;;  %v1051_v42 = vld [vmem:[%s5250_s3 + $0x50] sm:$0xff]  ;;  %v355_v43 = vrot.slane %v353_v36, 5  ;;  %v1104_v55 = vld [vmem:[%s5250_s3 + $0x1f8] sm:$0xff]  ;;  %v1062_v2 = vld [vmem:[%s5250_s3 + $0xa8] sm:$0xff] }
  0xec   :  { %v250_v8 = vpop.f32.mrf.mxu0  ;;  %v410_v45 = vld [vmem:[#allocation2 + $0x12] ss:$2 sm:$0x7]  ;;  %v945_v48 = vld [vmem:[#allocation2 + $0x2a] ss:$2 sm:$0x7]  ;;  %2897 = vmatprep.subr.mxu0 %v1104_v55 }
  0xed   :  { %986 = vrot.lane.b32.xlu1 %v984_v6, %s3085_s22  ;;  %296 = vst.msk [vmem:[#allocation2 + $0x50] sm:$0xff] %vm285_vm1, %v279_v4  ;;  %v282_v9 = vmax.f32 %v256_v5, 0.0  ;;  %v251_v10 = vadd.f32 %v3250_v24, %v250_v8  ;;  %v412_v51 = vrot.slane %v410_v45, 5  ;;  %v615_v52 = vld [vmem:[#allocation2 + $0x2a] ss:$2 sm:$0x7] }
  0xee   :  { %v3056_v13 = vpop.f32.mrf.mxu0  ;;  %v947_v53 = vrot.slane %v945_v48, 5  ;;  %v362_v56 = vld [vmem:[#allocation2 + $0x21] ss:$2 sm:$0x7]  ;;  %v1048_v57 = vld [vmem:[%s5250_s3 + $0x38] sm:$0xff]  ;;  %v617_v59 = vrot.slane %v615_v52, 2 }
  0xef   :  { %941 = vrot.lane.b32.xlu0 %v939_v11, %s3084_s2  ;;  %299 = vst.msk [vmem:[#allocation2 + $0x68] sm:$0xff] %vm285_vm1, %v282_v9  ;;  %v281_v15 = vmax.f32 %v251_v10, 0.0  ;;  %v266_v16 = vadd.f32 %v3056_v13, %v3250_v24  ;;  %v1088_v58 = vld [vmem:[%s5250_s3 + $0x178] sm:$0xff]  ;;  %v1063_v60 = vld [vmem:[%s5250_s3 + $0xb0] sm:$0xff]  ;;  %v364_v1 = vrot.slane %v362_v56, 2  ;;  %v1102_v3 = vld [vmem:[%s5250_s3 + $0x1e8] sm:$0xff] }
  0xf0   :  { %v260_v18 = vpop.f32.mrf.mxu0  ;;  %v1103_v61 = vld [vmem:[%s5250_s3 + $0x1f0] sm:$0xff]  ;;  %v664_v62 = vld [vmem:[#allocation2 + $0x2b] ss:$2 sm:$0x7]  ;;  %2898 = vmatpush3.msra.mxu0 %v1088_v58  ;;  %v1061_v8 = vld [vmem:[%s5250_s3 + $0xa0] sm:$0xff] }
  0xf1   :  { %610 = vrot.lane.b32.xlu1 %v609_v14, %s3084_s2  ;;  %298 = vst.msk [vmem:[#allocation2 + $0x60] sm:$0xff] %vm285_vm1, %v281_v15  ;;  %v284_v20 = vmax.f32 %v266_v16, 0.0  ;;  %v261_v21 = vadd.f32 %v3250_v24, %v260_v18  ;;  %v1055_v24 = vld [vmem:[%s5250_s3 + $0x70] sm:$0xff]  ;;  %2899 = vmatprep.subr.mxu0 %v1103_v61  ;;  %v419_v4 = vld [vmem:[#allocation2 + $0x22] ss:$2 sm:$0x7] }
  0xf2   :  { %2859 = vmatpush3.msra.mxu1 %v1055_v24  ;;  %v1047_v63 = vld [vmem:[%s5250_s3 + $0x30] sm:$0xff]  ;;  %v1046_v5 = vld [vmem:[%s5250_s3 + $0x28] sm:$0xff]  ;;  %v666_v7 = vrot.slane %v664_v62, 2  ;;  %v1101_v9 = vld [vmem:[%s5250_s3 + $0x1e0] sm:$0xff]  ;;  %v421_v12 = vrot.slane %v419_v4, 2 }
  0xf3   :  { %561 = vrot.lane.b32.xlu0 %v560_v19, %s3083_s0  ;;  %301 = vst.msk [vmem:[#allocation2 + $0x78] sm:$0xff] %vm285_vm1, %v284_v20  ;;  %v283_v23 = vmax.f32 %v261_v21, 0.0  ;;  %2860 = vmatprep.subr.mxu1 %v1070_v30  ;;  %v1087_v0 = vld [vmem:[%s5250_s3 + $0x170] sm:$0xff]  ;;  %v1086_v6 = vld [vmem:[%s5250_s3 + $0x168] sm:$0xff]  ;;  %v1045_v11 = vld [vmem:[%s5250_s3 + $0x20] sm:$0xff] }
  0xf4   :  { %2861 = vmatpush3.msra.mxu1 %v1054_v31  ;;  %2900 = vmatpush3.msra.mxu0 %v1087_v0  ;;  %v900_v10 = vld [vmem:[#allocation2 + $0x29] ss:$2 sm:$0x7]  ;;  %v1085_v13 = vld [vmem:[%s5250_s3 + $0x160] sm:$0xff]  ;;  %v1060_v14 = vld [vmem:[%s5250_s3 + $0x98] sm:$0xff] }
  0xf5   :  { %659 = vrot.lane.b32.xlu1 %v658_v22, %s3085_s22  ;;  %300 = vst.msk [vmem:[#allocation2 + $0x70] sm:$0xff] %vm285_vm1, %v283_v23  ;;  %2862 = vmatprep.subr.mxu1 %v1069_v33  ;;  %v779_v15 = vld [vmem:[#allocation2 + $0x22] ss:$2 sm:$0x7]  ;;  %v1100_v16 = vld [vmem:[%s5250_s3 + $0x1d8] sm:$0xff]  ;;  %v902_v17 = vrot.slane %v900_v10, 5 }
  0xf6   :  { %2863 = vmatpush3.msra.mxu1 %v1053_v34  ;;  %2901 = vmatprep.subr.mxu0 %v1102_v3  ;;  %v1044_v18 = vld [vmem:[%s5250_s3 + $0x18] sm:$0xff]  ;;  %v990_v20 = vld [vmem:[#allocation2 + $0x2b] ss:$2 sm:$0x7]  ;;  %v1059_v21 = vld [vmem:[%s5250_s3 + $0x90] sm:$0xff]  ;;  %v781_v22 = vrot.slane %v779_v15, 5 }
  0xf7   :  { %775 = vrot.lane.b32.xlu0 %v773_v28, %s3084_s2  ;;  %2864 = vmatprep.subr.mxu1 %v1068_v38  ;;  %v1084_v19 = vld [vmem:[%s5250_s3 + $0x158] sm:$0xff]  ;;  %v824_v23 = vld [vmem:[#allocation2 + $0x23] ss:$2 sm:$0x7]  ;;  %v1083_v24 = vld [vmem:[%s5250_s3 + $0x150] sm:$0xff]  ;;  %v992_v28 = vrot.slane %v990_v20, 5 }
  0xf8   :  { %2865 = vmatpush3.msra.mxu1 %v1052_v39  ;;  %2902 = vmatpush3.msra.mxu0 %v1086_v6  ;;  %v476_v27 = vld [vmem:[#allocation2 + $0x23] ss:$2 sm:$0x7]  ;;  %v1058_v30 = vld [vmem:[%s5250_s3 + $0x88] sm:$0xff]  ;;  %v826_v34 = vrot.slane %v824_v23, 5  ;;  %v1096_v45 = vld [vmem:[%s5250_s3 + $0x1b8] sm:$0xff] }
  0xf9   :  { %730 = vrot.lane.b32.xlu1 %v728_v29, %s3083_s0  ;;  %2866 = vmatprep.subr.mxu1 %v1067_v41  ;;  %v516_v29 = vld [vmem:[#allocation2 + $0x8] ss:$2 sm:$0x7]  ;;  %v908_v32 = vld [vmem:[#allocation2 + $0x39] ss:$2 sm:$0x7] }
  0xfa   :  { %2867 = vmatpush3.msra.mxu1 %v1051_v42  ;;  %2903 = vmatprep.subr.mxu0 %v1101_v9  ;;  %v1098_v31 = vld [vmem:[%s5250_s3 + $0x1c8] sm:$0xff]  ;;  %517 = vst.msk [vmem:[#allocation3 + $0x8] sm:$0x7] %vm303_vm2, %v516_v29  ;;  %v1057_v37 = vld [vmem:[%s5250_s3 + $0x80] sm:$0xff]  ;;  %v478_v38 = vrot.slane %v476_v27, 2  ;;  %v910_v39 = vrot.slane %v908_v32, 2 }
  0xfb   :  { %820 = vrot.lane.b32.xlu0 %v818_v35, %s3085_s22  ;;  %2868 = vmatprep.subr.mxu1 %v1066_v46  ;;  %v1042_v33 = vld [vmem:[%s5250_s3 + $0x8] sm:$0xff]  ;;  %v302_v35 = vld [vmem:[#allocation2] ss:$2 sm:$0x7]  ;;  %v1080_v46 = vld [vmem:[%s5250_s3 + $0x138] sm:$0xff]  ;;  %vm368_vm1 = vcmask 523526  }
  0xfc   :  { %2869 = vmatpush3.msra.mxu1 %v1050_v47  ;;  %2904 = vmatpush3.msra.mxu0 %v1085_v13  ;;  %v1082_v36 = vld [vmem:[%s5250_s3 + $0x148] sm:$0xff]  ;;  %304 = vst.msk [vmem:[#allocation3] sm:$0x7] %vm303_vm2, %v302_v35  ;;  %v734_v41 = vld [vmem:[#allocation2 + $0x21] ss:$2 sm:$0x7] }
  0xfd   :  { %470 = vrot.lane.b32.xlu1 %v469_v40, %s3085_s22  ;;  %2870 = vmatprep.subr.mxu1 %v1065_v49  ;;  %v1097_v40 = vld [vmem:[%s5250_s3 + $0x1c0] sm:$0xff]  ;;  %v998_v47 = vld [vmem:[#allocation2 + $0x3b] ss:$2 sm:$0x7]  ;;  %v736_v48 = vrot.slane %v734_v41, 5  ;;  %v1095_v49 = vld [vmem:[%s5250_s3 + $0x1b0] sm:$0xff] }
  0xfe   :  { %2871 = vmatpush3.msra.mxu1 %v1049_v50  ;;  %2905 = vmatprep.subr.mxu0 %v1100_v16  ;;  %v1041_v42 = vld [vmem:[%s5250_s3] sm:$0xff]  ;;  %v953_v50 = vld [vmem:[#allocation2 + $0x3a] ss:$2 sm:$0x7]  ;;  %v1094_v52 = vld [vmem:[%s5250_s3 + $0x1a8] sm:$0xff] }
  0xff   :  { %356 = vrot.lane.b32.xlu0 %v355_v43, %s3083_s0  ;;  %2872 = vmatprep.subr.mxu1 %v1064_v54  ;;  %v1081_v43 = vld [vmem:[%s5250_s3 + $0x140] sm:$0xff]  ;;  %v519_v54 = vld [vmem:[#allocation2 + $0x18] ss:$2 sm:$0x7]  ;;  %v1078_v55 = vld [vmem:[%s5250_s3 + $0x128] sm:$0xff] }
 0x100   :  { %2873 = vmatpush3.msra.mxu1 %v1048_v57  ;;  %2906 = vmatpush3.msra.mxu0 %v1084_v19  ;;  %v742_v56 = vld [vmem:[#allocation2 + $0x31] ss:$2 sm:$0x7]  ;;  %v521_v57 = vrot.slane %v519_v54, 5  ;;  %v1093_v58 = vld [vmem:[%s5250_s3 + $0x1a0] sm:$0xff]  ;;  %v1074_v15 = vld [vmem:[%s5250_s3 + $0x108] sm:$0xff] }
 0x101   :  { %569 = vrot.lane.b32.xlu1 %v568_v44, %s3083_s0  ;;  %2874 = vmatprep.subr.mxu1 %v1063_v60  ;;  %v863_v44 = vld [vmem:[#allocation2 + $0x18] ss:$2 sm:$0x7]  ;;  %v787_v60 = vld [vmem:[#allocation2 + $0x32] ss:$2 sm:$0x7] }
 0x102   :  { %2875 = vmatpush3.msra.mxu1 %v1047_v63  ;;  %2907 = vmatprep.subr.mxu0 %v1099_v25  ;;  %864 = vst.msk [vmem:[#allocation3 + $0x18] sm:$0x7] %vm303_vm2, %v863_v44  ;;  %v1077_v61 = vld [vmem:[%s5250_s3 + $0x120] sm:$0xff]  ;;  %v575_v62 = vld [vmem:[#allocation2 + $0x49] ss:$2 sm:$0x7] }
 0x103   :  { %413 = vrot.lane.b32.xlu0 %v412_v51, %s3084_s2  ;;  %2876 = vmatprep.subr.mxu1 %v1062_v2  ;;  %v1079_v51 = vld [vmem:[%s5250_s3 + $0x130] sm:$0xff]  ;;  %523 = vst.msk [vmem:[#allocation3 + $0x8] sm:$0x38] %vm310_vm3, %v521_v57  ;;  %v1092_v63 = vld [vmem:[%s5250_s3 + $0x198] sm:$0xff]  ;;  %v744_v0 = vrot.slane %v742_v56, 2  ;;  %v577_v6 = vrot.slane %v575_v62, 7 }
 0x104   :  { %2877 = vmatpush3.msra.mxu1 %v1046_v5  ;;  %2908 = vmatpush3.msra.mxu0 %v1083_v24  ;;  %v832_v2 = vld [vmem:[#allocation2 + $0x33] ss:$2 sm:$0x7]  ;;  %v697_v3 = vld [vmem:[#allocation2 + $0x10] ss:$2 sm:$0x7] }
 0x105   :  { %948 = vrot.lane.b32.xlu1 %v947_v53, %s3084_s2  ;;  %2878 = vmatprep.subr.mxu1 %v1061_v8  ;;  %v1000_v53 = vrot.slane %v998_v47, 2  ;;  %v1091_v4 = vld [vmem:[%s5250_s3 + $0x190] sm:$0xff]  ;;  %v789_v5 = vrot.slane %v787_v60, 2  ;;  %698 = vst.msk [vmem:[#allocation3 + $0x10] sm:$0x7] %vm303_vm2, %v697_v3  ;;  %v1089_v19 = vld [vmem:[%s5250_s3 + $0x180] sm:$0xff] }
 0x106   :  { %2879 = vmatpush3.msra.mxu1 %v1045_v11  ;;  %2909 = vmatprep.subr.mxu0 %v1098_v31  ;;  %v1075_v8 = vld [vmem:[%s5250_s3 + $0x110] sm:$0xff]  ;;  %v624_v9 = vld [vmem:[#allocation2 + $0x4a] ss:$2 sm:$0x7]  ;;  %v834_v20 = vrot.slane %v832_v2, 2  ;;  %v1073_v23 = vld [vmem:[%s5250_s3 + $0x100] sm:$0xff] }
 0x107   :  { %618 = vrot.lane.b32.xlu0 %v617_v59, %s3084_s2  ;;  %2880 = vmatprep.subr.mxu1 %v1060_v14  ;;  %v955_v59 = vrot.slane %v953_v50, 2  ;;  %v525_v11 = vld [vmem:[#allocation2 + $0x28] ss:$2 sm:$0x7]  ;;  %v626_v24 = vrot.slane %v624_v9, 7  ;;  %vm370_vm2 = vcmask 516352  }
 0x108   :  { %2881 = vmatpush3.msra.mxu1 %v1044_v18  ;;  %2910 = vmatpush3.msra.mxu0 %v1082_v36  ;;  %v527_v13 = vrot.slane %v525_v11, 2  ;;  %v313_v14 = vld [vmem:[#allocation2 + $0x20] ss:$2 sm:$0x7] }
 0x109   :  { %365 = vrot.lane.b32.xlu1 %v364_v1, %s3083_s0  ;;  %2882 = vmatprep.subr.mxu1 %v1059_v21  ;;  %v1076_v1 = vld [vmem:[%s5250_s3 + $0x118] sm:$0xff]  ;;  %v673_v16 = vld [vmem:[#allocation2 + $0x4b] ss:$2 sm:$0x7] }
 0x10a   :  { %2883 = vmatpush3.msra.mxu1 %v1043_v26  ;;  %2911 = vmatprep.subr.mxu0 %v1097_v40  ;;  %v865_v18 = vld [vmem:[#allocation2 + $0x28] ss:$2 sm:$0x7]  ;;  %529 = vst.msk [vmem:[#allocation3 + $0x8] sm:$0xc0] %vm317_vm4, %v527_v13 }
 0x10b   :  { %667 = vrot.lane.b32.xlu0 %v666_v7, %s3085_s22  ;;  %2884 = vmatprep.subr.mxu1 %v1058_v30  ;;  %v306_v7 = vld [vmem:[#allocation2 + $0x10] ss:$2 sm:$0x7]  ;;  %530 = vst.msk [vmem:[#allocation3 + $0x28] sm:$0x1] %vm319_vm5, %v527_v13  ;;  %v867_v21 = vrot.slane %v865_v18, 5 }
 0x10c   :  { %2885 = vmatpush3.msra.mxu1 %v1042_v33  ;;  %2912 = vmatpush3.msra.mxu0 %v1081_v43  ;;  %v308_v10 = vrot.slane %v306_v7, 5  ;;  %v430_v25 = vld [vmem:[#allocation2 + $0x42] ss:$2 sm:$0x7] }
 0x10d   :  { %422 = vrot.lane.b32.xlu1 %v421_v12, %s3084_s2  ;;  %2886 = vmatprep.subr.mxu1 %v1057_v37  ;;  %v1090_v12 = vld [vmem:[%s5250_s3 + $0x188] sm:$0xff]  ;;  %v699_v27 = vld [vmem:[#allocation2 + $0x20] ss:$2 sm:$0x7]  ;;  %869 = vst.msk [vmem:[#allocation3 + $0x18] sm:$0x38] %vm310_vm3, %v867_v21 }
 0x10e   :  { %2887 = vmatpush3.msra.mxu1 %v1041_v42  ;;  %2913 = vmatprep.subr.mxu0 %v1096_v45  ;;  %311 = vst.msk [vmem:[#allocation3] sm:$0x38] %vm310_vm3, %v308_v10  ;;  %v705_v29 = vld [vmem:[#allocation2 + $0x30] ss:$2 sm:$0x7] }
 0x10f   :  { %903 = vrot.lane.b32.xlu0 %v902_v17, %s3083_s0  ;;  %2914 = vmatpush3.msra.mxu0 %v1080_v46  ;;  %v315_v17 = vrot.slane %v313_v14, 2  ;;  %v373_v30 = vld [vmem:[#allocation2 + $0x41] ss:$2 sm:$0x7]  ;;  %v707_v32 = vrot.slane %v705_v29, 2 }
 0x110   :  { %2915 = vmatprep.subr.mxu0 %v1095_v49  ;;  %v681_v31 = vld [vmem:[#allocation2 + $0x5b] ss:$2 sm:$0x7]  ;;  %v532_v33 = vld [vmem:[#allocation2 + $0x48] ss:$2 sm:$0x7] }
 0x111   :  { %782 = vrot.lane.b32.xlu1 %v781_v22, %s3084_s2  ;;  %2916 = vmatpush3.msra.mxu0 %v1079_v51  ;;  %v871_v22 = vld [vmem:[#allocation2 + $0x38] ss:$2 sm:$0x7]  ;;  %318 = vst.msk [vmem:[#allocation3] sm:$0xc0] %vm317_vm4, %v315_v17  ;;  %v534_v35 = vrot.slane %v532_v33, 7 }
 0x112   :  { %2917 = vmatprep.subr.mxu0 %v1094_v52  ;;  %320 = vst.msk [vmem:[#allocation3 + $0x20] sm:$0x1] %vm319_vm5, %v315_v17  ;;  %v873_v26 = vrot.slane %v871_v22, 2  ;;  %v322_v36 = vld [vmem:[#allocation2 + $0x40] ss:$2 sm:$0x7] }
 0x113   :  { %993 = vrot.lane.b32.xlu0 %v992_v28, %s3085_s22  ;;  %2918 = vmatpush3.msra.mxu0 %v1078_v55  ;;  %v701_v28 = vrot.slane %v699_v27, 5  ;;  %709 = vst.msk [vmem:[#allocation3 + $0x10] sm:$0xc0] %vm317_vm4, %v707_v32  ;;  %v324_v37 = vrot.slane %v322_v36, 7  ;;  %v375_v45 = vrot.slane %v373_v30, 7  ;;  %v683_v46 = vrot.slane %v681_v31, 4 }
 0x114   :  { %2919 = vmatprep.subr.mxu0 %v1093_v58  ;;  %875 = vst.msk [vmem:[#allocation3 + $0x18] sm:$0xc0] %vm317_vm4, %v873_v26  ;;  %v538_v41 = vld [vmem:[#allocation2 + $0x58] ss:$2 sm:$0x7]  ;;  %vm427_vm4 = vcmask 778752  }
 0x115   :  { %827 = vrot.lane.b32.xlu1 %v826_v34, %s3085_s22  ;;  %2920 = vmatpush3.msra.mxu0 %v1077_v61  ;;  %876 = vst.msk [vmem:[#allocation3 + $0x38] sm:$0x1] %vm319_vm5, %v873_v26  ;;  %v675_v34 = vrot.slane %v673_v16, 7  ;;  %710 = vst.msk [vmem:[#allocation3 + $0x30] sm:$0x1] %vm319_vm5, %v707_v32  ;;  %v540_v43 = vrot.slane %v538_v41, 4 }
 0x116   :  { %2921 = vmatprep.subr.mxu0 %v1092_v63  ;;  %703 = vst.msk [vmem:[#allocation3 + $0x10] sm:$0x38] %vm310_vm3, %v701_v28  ;;  %v487_v42 = vld [vmem:[#allocation2 + $0x43] ss:$2 sm:$0x7]  ;;  %vm425_vm3 = vcmask 785926  }
 0x117   :  { %479 = vrot.lane.b32.xlu0 %v478_v38, %s3085_s22  ;;  %2922 = vmatpush3.msra.mxu0 %v1076_v1  ;;  %v877_v38 = vld [vmem:[#allocation2 + $0x58] ss:$2 sm:$0x7]  ;;  %536 = vst.msk [vmem:[#allocation3 + $0x28] sm:$0xe] %vm326_vm6, %v534_v35  ;;  %v489_v57 = vrot.slane %v487_v42, 7 }
 0x118   :  { %2923 = vmatprep.subr.mxu0 %v1091_v4  ;;  %v879_v40 = vrot.slane %v877_v38, 7  ;;  %327 = vst.msk [vmem:[#allocation3 + $0x20] sm:$0xe] %vm326_vm6, %v324_v37  ;;  %v329_v44 = vld [vmem:[#allocation2 + $0x50] ss:$2 sm:$0x7] }
 0x119   :  { %911 = vrot.lane.b32.xlu1 %v910_v39, %s3083_s0  ;;  %2924 = vmatpush3.msra.mxu0 %v1075_v8  ;;  %v432_v39 = vrot.slane %v430_v25, 7  ;;  %v331_v47 = vrot.slane %v329_v44, 4  ;;  %v916_v49 = vld [vmem:[#allocation2 + $0x59] ss:$2 sm:$0x7]  ;;  %vm482_vm5 = vcmask 1048326  }
 0x11a   :  { %2925 = vmatprep.subr.mxu0 %v1090_v12  ;;  %881 = vst.msk [vmem:[#allocation3 + $0x38] sm:$0xe] %vm326_vm6, %v879_v40  ;;  %v544_v51 = vld [vmem:[#allocation2 + $0x68] ss:$2 sm:$0x7]  ;;  %v918_v62 = vrot.slane %v916_v49, 7 }
 0x11b   :  { %737 = vrot.lane.b32.xlu0 %v736_v48, %s3083_s0  ;;  %2926 = vmatpush3.msra.mxu0 %v1074_v15  ;;  %v711_v48 = vld [vmem:[#allocation2 + $0x50] ss:$2 sm:$0x7]  ;;  %542 = vst.msk [vmem:[#allocation3 + $0x28] sm:$0x70] %vm333_vm7, %v540_v43  ;;  %v546_v52 = vrot.slane %v544_v51, 1 }
 0x11c   :  { %2927 = vmatprep.subr.mxu0 %v1089_v19  ;;  %v713_v50 = vrot.slane %v711_v48, 7  ;;  %334 = vst.msk [vmem:[#allocation3 + $0x20] sm:$0x70] %vm333_vm7, %v331_v47  ;;  %v583_v54 = vld [vmem:[#allocation2 + $0x59] ss:$2 sm:$0x7] }
 0x11d   :  { %1001 = vrot.lane.b32.xlu1 %v1000_v53, %s3085_s22  ;;  %2928 = vmatpush3.msra.mxu0 %v1073_v23  ;;  %v882_v53 = vld [vmem:[#allocation2 + $0x68] ss:$2 sm:$0x7]  ;;  %v336_v56 = vld [vmem:[#allocation2 + $0x60] ss:$2 sm:$0x7] }
 0x11e   :  { %715 = vst.msk [vmem:[#allocation3 + $0x30] sm:$0xe] %vm326_vm6, %v713_v50  ;;  %v884_v55 = vrot.slane %v882_v53, 4  ;;  %v338_v58 = vrot.slane %v336_v56, 1  ;;  %v585_v3 = vrot.slane %v583_v54, 4  ;;  %vm484_vm6 = vcmask 1041152  }
 0x11f   :  { %956 = vrot.lane.b32.xlu0 %v955_v59, %s3084_s2  ;;  %548 = vst.msk [vmem:[#allocation3 + $0x28] sm:$0x80] %vm340_vm8, %v546_v52  ;;  %v716_v59 = vld [vmem:[#allocation2 + $0x60] ss:$2 sm:$0x7] }
 0x120   :  { %549 = vst.msk [vmem:[#allocation3 + $0x48] sm:$0x3] %vm342_vm9, %v546_v52  ;;  %v718_v60 = vrot.slane %v716_v59, 4  ;;  %v888_v61 = vld [vmem:[#allocation2 + $0x78] ss:$2 sm:$0x7] }
 0x121   :  { %745 = vrot.lane.b32.xlu1 %v744_v0, %s3083_s0  ;;  %886 = vst.msk [vmem:[#allocation3 + $0x38] sm:$0x70] %vm333_vm7, %v884_v55  ;;  %v890_v63 = vrot.slane %v888_v61, 1  ;;  %v722_v0 = vld [vmem:[#allocation2 + $0x70] ss:$2 sm:$0x7] }
 0x122   :  { %341 = vst.msk [vmem:[#allocation3 + $0x20] sm:$0x80] %vm340_vm8, %v338_v58  ;;  %v382_v1 = vld [vmem:[#allocation2 + $0x51] ss:$2 sm:$0x7]  ;;  %v724_v2 = vrot.slane %v722_v0, 1 }
 0x123   :  { %790 = vrot.lane.b32.xlu0 %v789_v5, %s3084_s2  ;;  %343 = vst.msk [vmem:[#allocation3 + $0x40] sm:$0x3] %vm342_vm9, %v338_v58  ;;  %893 = vst.msk [vmem:[#allocation3 + $0x58] sm:$0x3] %vm342_vm9, %v890_v63  ;;  %v384_v5 = vrot.slane %v382_v1, 4 }
 0x124   :  { %720 = vst.msk [vmem:[#allocation3 + $0x30] sm:$0x70] %vm333_vm7, %v718_v60  ;;  %v632_v4 = vld [vmem:[#allocation2 + $0x5a] ss:$2 sm:$0x7]  ;;  %vm379_vm7 = vcmask 519425  }
 0x125   :  { %578 = vrot.lane.b32.xlu1 %v577_v6, %s3083_s0  ;;  %892 = vst.msk [vmem:[#allocation3 + $0x38] sm:$0x80] %vm340_vm8, %v890_v63  ;;  %726 = vst.msk [vmem:[#allocation3 + $0x30] sm:$0x80] %vm340_vm8, %v724_v2  ;;  %v634_v7 = vrot.slane %v632_v4, 4  ;;  %vm436_vm8 = vcmask 781825  }
 0x126   :  { %727 = vst.msk [vmem:[#allocation3 + $0x50] sm:$0x3] %vm342_vm9, %v724_v2  ;;  %v496_v6 = vld [vmem:[#allocation2 + $0x53] ss:$2 sm:$0x7]  ;;  %vm493_vm9 = vcmask 1044225  }
 0x127   :  { %835 = vrot.lane.b32.xlu0 %v834_v20, %s3085_s22  ;;  %v961_v8 = vld [vmem:[#allocation2 + $0x5a] ss:$2 sm:$0x7]  ;;  %v498_v9 = vrot.slane %v496_v6, 4 }
 0x128   :  { %v750_v10 = vld [vmem:[#allocation2 + $0x51] ss:$2 sm:$0x7]  ;;  %v963_v11 = vrot.slane %v961_v8, 7 }
 0x129   :  { %627 = vrot.lane.b32.xlu1 %v626_v24, %s3084_s2  ;;  %v1006_v12 = vld [vmem:[#allocation2 + $0x5b] ss:$2 sm:$0x7]  ;;  %v752_v13 = vrot.slane %v750_v10, 7 }
 0x12a   :  { %v795_v14 = vld [vmem:[#allocation2 + $0x52] ss:$2 sm:$0x7]  ;;  %v1008_v15 = vrot.slane %v1006_v12, 7 }
 0x12b   :  { %676 = vrot.lane.b32.xlu0 %v675_v34, %s3085_s22  ;;  %v439_v16 = vld [vmem:[#allocation2 + $0x52] ss:$2 sm:$0x7]  ;;  %v797_v17 = vrot.slane %v795_v14, 7 }
 0x12c   :  { %v840_v18 = vld [vmem:[#allocation2 + $0x53] ss:$2 sm:$0x7]  ;;  %v689_v19 = vld [vmem:[#allocation2 + $0x6b] ss:$2 sm:$0x7] }
 0x12d   :  { %433 = vrot.lane.b32.xlu1 %v432_v39, %s3084_s2  ;;  %v441_v20 = vrot.slane %v439_v16, 4  ;;  %v591_v21 = vld [vmem:[#allocation2 + $0x69] ss:$2 sm:$0x7]  ;;  %v842_v22 = vrot.slane %v840_v18, 7  ;;  %v691_v23 = vrot.slane %v689_v19, 1 }
 0x12e   :  { %v593_v25 = vrot.slane %v591_v21, 1  ;;  %v923_v26 = vld [vmem:[#allocation2 + $0x69] ss:$2 sm:$0x7] }
 0x12f   :  { %376 = vrot.lane.b32.xlu0 %v375_v45, %s3083_s0  ;;  %v640_v27 = vld [vmem:[#allocation2 + $0x6a] ss:$2 sm:$0x7]  ;;  %v925_v24 = vrot.slane %v923_v26, 4 }
 0x130   :  { %v391_v28 = vld [vmem:[#allocation2 + $0x61] ss:$2 sm:$0x7]  ;;  %v642_v29 = vrot.slane %v640_v27, 1 }
 0x131   :  { %684 = vrot.lane.b32.xlu1 %v683_v46, %s3085_s22  ;;  %v968_v30 = vld [vmem:[#allocation2 + $0x6a] ss:$2 sm:$0x7]  ;;  %v393_v32 = vrot.slane %v391_v28, 1 }
 0x132   :  { %v505_v33 = vld [vmem:[#allocation2 + $0x63] ss:$2 sm:$0x7]  ;;  %v970_v35 = vrot.slane %v968_v30, 4 }
 0x133   :  { %490 = vrot.lane.b32.xlu0 %v489_v57, %s3085_s22  ;;  %v1013_v36 = vld [vmem:[#allocation2 + $0x6b] ss:$2 sm:$0x7]  ;;  %v507_v38 = vrot.slane %v505_v33, 1 }
 0x134   :  { %v757_v39 = vld [vmem:[#allocation2 + $0x61] ss:$2 sm:$0x7]  ;;  %v1015_v41 = vrot.slane %v1013_v36, 4 }
 0x135   :  { %919 = vrot.lane.b32.xlu1 %v918_v62, %s3083_s0  ;;  %v448_v42 = vld [vmem:[#allocation2 + $0x62] ss:$2 sm:$0x7]  ;;  %v759_v44 = vrot.slane %v757_v39, 4 }
 0x136   :  { %v802_v45 = vld [vmem:[#allocation2 + $0x62] ss:$2 sm:$0x7]  ;;  %v931_v46 = vld [vmem:[#allocation2 + $0x79] ss:$2 sm:$0x7] }
 0x137   :  { %586 = vrot.lane.b32.xlu0 %v585_v3, %s3083_s0  ;;  %v450_v48 = vrot.slane %v448_v42, 1  ;;  %v804_v50 = vrot.slane %v802_v45, 4  ;;  %v933_v51 = vrot.slane %v931_v46, 1  ;;  %v976_v52 = vld [vmem:[#allocation2 + $0x7a] ss:$2 sm:$0x7] }
 0x138   :  { %v765_v54 = vld [vmem:[#allocation2 + $0x71] ss:$2 sm:$0x7]  ;;  %v978_v56 = vrot.slane %v976_v52, 1 }
 0x139   :  { %385 = vrot.lane.b32.xlu1 %v384_v5, %s3083_s0  ;;  %v1021_v57 = vld [vmem:[#allocation2 + $0x7b] ss:$2 sm:$0x7]  ;;  %v767_v59 = vrot.slane %v765_v54, 1 }
 0x13a   :  { %v810_v60 = vld [vmem:[#allocation2 + $0x72] ss:$2 sm:$0x7]  ;;  %v1023_v62 = vrot.slane %v1021_v57, 1 }
 0x13b   :  { %635 = vrot.lane.b32.xlu0 %v634_v7, %s3084_s2  ;;  %v847_v63 = vld [vmem:[#allocation2 + $0x63] ss:$2 sm:$0x7]  ;;  %v812_v1 = vrot.slane %v810_v60, 1 }
 0x13c   :  { %v855_v2 = vld [vmem:[#allocation2 + $0x73] ss:$2 sm:$0x7]  ;;  %v849_v4 = vrot.slane %v847_v63, 4 }
 0x13d   :  { %499 = vrot.lane.b32.xlu1 %v498_v9, %s3085_s22  ;;  %v857_v6 = vrot.slane %v855_v2, 1 }
 0x13f   :  { %964 = vrot.lane.b32.xlu0 %v963_v11, %s3084_s2 }
 0x141   :  { %753 = vrot.lane.b32.xlu1 %v752_v13, %s3083_s0 }
 0x143   :  { %1009 = vrot.lane.b32.xlu0 %v1008_v15, %s3085_s22 }
 0x145   :  { %798 = vrot.lane.b32.xlu1 %v797_v17, %s3084_s2 }
 0x147   :  { %442 = vrot.lane.b32.xlu0 %v441_v20, %s3084_s2 }
 0x149   :  { %843 = vrot.lane.b32.xlu1 %v842_v22, %s3085_s22 }
 0x14b   :  { %692 = vrot.lane.b32.xlu0 %v691_v23, %s3085_s22 }
 0x14d   :  { %594 = vrot.lane.b32.xlu1 %v593_v25, %s3083_s0 }
 0x14f   :  { %926 = vrot.lane.b32.xlu0 %v925_v24, %s3083_s0 }
 0x151   :  { %v554_v31 = vpop.permute.xlu0 %553  ;;  %643 = vrot.lane.b32.xlu1 %v642_v29, %s3084_s2 }
 0x152   :  { %556 = vst.msk [vmem:[#allocation3 + $0x8] sm:$0x7] %vm350_vm10, %v554_v31 }
 0x153   :  { %394 = vrot.lane.b32.xlu0 %v393_v32, %s3083_s0  ;;  %v348_v34 = vpop.permute.xlu1 %347 }
 0x154   :  { %351 = vst.msk [vmem:[#allocation3] sm:$0x7] %vm350_vm10, %v348_v34 }
 0x155   :  { %v603_v37 = vpop.permute.xlu0 %602  ;;  %971 = vrot.lane.b32.xlu1 %v970_v35, %s3084_s2 }
 0x156   :  { %605 = vst.msk [vmem:[#allocation3 + $0x8] sm:$0x7] %vm407_vm11, %v603_v37 }
 0x157   :  { %508 = vrot.lane.b32.xlu0 %v507_v38, %s3085_s22  ;;  %v405_v40 = vpop.permute.xlu1 %404 }
 0x158   :  { %408 = vst.msk [vmem:[#allocation3] sm:$0x7] %vm407_vm11, %v405_v40 }
 0x159   :  { %v652_v43 = vpop.permute.xlu0 %651  ;;  %1016 = vrot.lane.b32.xlu1 %v1015_v41, %s3085_s22 }
 0x15a   :  { %654 = vst.msk [vmem:[#allocation3 + $0x8] sm:$0x7] %vm464_vm12, %v652_v43 }
 0x15b   :  { %760 = vrot.lane.b32.xlu0 %v759_v44, %s3083_s0  ;;  %v897_v47 = vpop.permute.xlu1 %896 }
 0x15c   :  { %899 = vst.msk [vmem:[#allocation3 + $0x18] sm:$0x7] %vm350_vm10, %v897_v47 }
 0x15d   :  { %v462_v49 = vpop.permute.xlu0 %461  ;;  %451 = vrot.lane.b32.xlu1 %v450_v48, %s3084_s2 }
 0x15e   :  { %465 = vst.msk [vmem:[#allocation3] sm:$0x7] %vm464_vm12, %v462_v49 }
 0x15f   :  { %805 = vrot.lane.b32.xlu0 %v804_v50, %s3084_s2  ;;  %v987_v53 = vpop.permute.xlu1 %986 }
 0x161   :  { %v942_v55 = vpop.permute.xlu0 %941  ;;  %934 = vrot.lane.b32.xlu1 %v933_v51, %s3083_s0 }
 0x162   :  { %944 = vst.msk [vmem:[#allocation3 + $0x18] sm:$0x7] %vm407_vm11, %v942_v55 }
 0x163   :  { %989 = vst.msk [vmem:[#allocation3 + $0x18] sm:$0x7] %vm464_vm12, %v987_v53  ;;  %979 = vrot.lane.b32.xlu0 %v978_v56, %s3084_s2  ;;  %v611_v58 = vpop.permute.xlu1 %610 }
 0x165   :  { %v562_v61 = vpop.permute.xlu0 %561  ;;  %768 = vrot.lane.b32.xlu1 %v767_v59, %s3083_s0 }
 0x166   :  { %564 = vst.msk [vmem:[#allocation3 + $0x8] sm:$0x38] %vm359_vm13, %v562_v61 }
 0x167   :  { %1024 = vrot.lane.b32.xlu0 %v1023_v62, %s3085_s22  ;;  %613 = vst.msk [vmem:[#allocation3 + $0x8] sm:$0x38] %vm416_vm14, %v611_v58  ;;  %v660_v0 = vpop.permute.xlu1 %659 }
 0x168   :  { %662 = vst.msk [vmem:[#allocation3 + $0x8] sm:$0x38] %vm473_vm15, %v660_v0 }
 0x169   :  { %v776_v3 = vpop.permute.xlu0 %775  ;;  %813 = vrot.lane.b32.xlu1 %v812_v1, %s3084_s2 }
 0x16b   :  { %850 = vrot.lane.b32.xlu0 %v849_v4, %s3085_s22  ;;  %v731_v5 = vpop.permute.xlu1 %730 }
 0x16c   :  { %733 = vst.msk [vmem:[#allocation3 + $0x10] sm:$0x7] %vm350_vm10, %v731_v5  ;;  %vm388_vm10 = vcmask 522500  }
 0x16d   :  { %778 = vst.msk [vmem:[#allocation3 + $0x10] sm:$0x7] %vm407_vm11, %v776_v3  ;;  %v821_v7 = vpop.permute.xlu0 %820  ;;  %858 = vrot.lane.b32.xlu1 %v857_v6, %s3085_s22  ;;  %vm445_vm11 = vcmask 784900  }
 0x16e   :  { %823 = vst.msk [vmem:[#allocation3 + $0x10] sm:$0x7] %vm464_vm12, %v821_v7  ;;  %vm502_vm12 = vcmask 1047300  }
 0x16f   :  { %v471_v8 = vpop.permute.xlu1 %470 }
 0x171   :  { %v357_v9 = vpop.permute.xlu0 %356 }
 0x172   :  { %360 = vst.msk [vmem:[#allocation3] sm:$0x38] %vm359_vm13, %v357_v9 }
 0x173   :  { %v570_v10 = vpop.permute.xlu1 %569 }
 0x174   :  { %572 = vst.msk [vmem:[#allocation3 + $0x8] sm:$0xc0] %vm368_vm1, %v570_v10 }
 0x175   :  { %573 = vst.msk [vmem:[#allocation3 + $0x28] sm:$0x1] %vm370_vm2, %v570_v10  ;;  %v414_v11 = vpop.permute.xlu0 %413 }
 0x176   :  { %417 = vst.msk [vmem:[#allocation3] sm:$0x38] %vm416_vm14, %v414_v11 }
 0x177   :  { %474 = vst.msk [vmem:[#allocation3] sm:$0x38] %vm473_vm15, %v471_v8  ;;  %v949_v12 = vpop.permute.xlu1 %948 }
 0x179   :  { %v619_v13 = vpop.permute.xlu0 %618 }
 0x17a   :  { %621 = vst.msk [vmem:[#allocation3 + $0x8] sm:$0xc0] %vm425_vm3, %v619_v13 }
 0x17b   :  { %622 = vst.msk [vmem:[#allocation3 + $0x28] sm:$0x1] %vm427_vm4, %v619_v13  ;;  %v366_v14 = vpop.permute.xlu1 %365 }
 0x17c   :  { %369 = vst.msk [vmem:[#allocation3] sm:$0xc0] %vm368_vm1, %v366_v14 }
 0x17d   :  { %371 = vst.msk [vmem:[#allocation3 + $0x20] sm:$0x1] %vm370_vm2, %v366_v14  ;;  %v668_v15 = vpop.permute.xlu0 %667 }
 0x17e   :  { %670 = vst.msk [vmem:[#allocation3 + $0x8] sm:$0xc0] %vm482_vm5, %v668_v15 }
 0x17f   :  { %671 = vst.msk [vmem:[#allocation3 + $0x28] sm:$0x1] %vm484_vm6, %v668_v15  ;;  %v423_v16 = vpop.permute.xlu1 %422 }
 0x180   :  { %426 = vst.msk [vmem:[#allocation3] sm:$0xc0] %vm425_vm3, %v423_v16 }
 0x181   :  { %428 = vst.msk [vmem:[#allocation3 + $0x20] sm:$0x1] %vm427_vm4, %v423_v16  ;;  %v904_v17 = vpop.permute.xlu0 %903  ;;  %v3679_v16 = vld [vmem:[%s5251_s4] ss:$0 sm:$0xff] }
 0x182   :  { %906 = vst.msk [vmem:[#allocation3 + $0x18] sm:$0x38] %vm359_vm13, %v904_v17 }
 0x183   :  { %951 = vst.msk [vmem:[#allocation3 + $0x18] sm:$0x38] %vm416_vm14, %v949_v12  ;;  %v783_v18 = vpop.permute.xlu1 %782 }
 0x185   :  { %v994_v19 = vpop.permute.xlu0 %993  ;;  %v1030_v20 = vld [vmem:[#allocation3 + $0x8] sm:$0xff] }
 0x186   :  { %996 = vst.msk [vmem:[#allocation3 + $0x18] sm:$0x38] %vm473_vm15, %v994_v19  ;;  %1176 = vmatprep.mubr.f32.mxu1 %v1030_v20 }
 0x187   :  { %v828_v21 = vpop.permute.xlu1 %827 }
 0x189   :  { %v480_v22 = vpop.permute.xlu0 %479 }
 0x18a   :  { %483 = vst.msk [vmem:[#allocation3] sm:$0xc0] %vm482_vm5, %v480_v22 }
 0x18b   :  { %485 = vst.msk [vmem:[#allocation3 + $0x20] sm:$0x1] %vm484_vm6, %v480_v22  ;;  %v912_v23 = vpop.permute.xlu1 %911 }
 0x18c   :  { %914 = vst.msk [vmem:[#allocation3 + $0x18] sm:$0xc0] %vm368_vm1, %v912_v23 }
 0x18d   :  { %915 = vst.msk [vmem:[#allocation3 + $0x38] sm:$0x1] %vm370_vm2, %v912_v23  ;;  %v738_v25 = vpop.permute.xlu0 %737 }
 0x18e   :  { %740 = vst.msk [vmem:[#allocation3 + $0x10] sm:$0x38] %vm359_vm13, %v738_v25  ;;  %vm397_vm13 = vcmask 523527  }
 0x18f   :  { %785 = vst.msk [vmem:[#allocation3 + $0x10] sm:$0x38] %vm416_vm14, %v783_v18  ;;  %v1002_v26 = vpop.permute.xlu1 %1001  ;;  %vm399_vm14 = vcmask 517376  }
 0x190   :  { %830 = vst.msk [vmem:[#allocation3 + $0x10] sm:$0x38] %vm473_vm15, %v828_v21  ;;  %vm454_vm15 = vcmask 785927  }
 0x191   :  { %v957_v27 = vpop.permute.xlu0 %956  ;;  %v1029_v24 = vld [vmem:[#allocation3] sm:$0xff] }
 0x192   :  { %959 = vst.msk [vmem:[#allocation3 + $0x18] sm:$0xc0] %vm425_vm3, %v957_v27  ;;  %1177 = vmatmul.mubr.f32.vlgmr.msra.gmra.mxu1 %v1029_v24 }
 0x193   :  { %960 = vst.msk [vmem:[#allocation3 + $0x38] sm:$0x1] %vm427_vm4, %v957_v27  ;;  %v746_v28 = vpop.permute.xlu1 %745 }
 0x194   :  { %1004 = vst.msk [vmem:[#allocation3 + $0x18] sm:$0xc0] %vm482_vm5, %v1002_v26 }
 0x195   :  { %1005 = vst.msk [vmem:[#allocation3 + $0x38] sm:$0x1] %vm484_vm6, %v1002_v26  ;;  %v791_v29 = vpop.permute.xlu0 %790 }
 0x196   :  { %748 = vst.msk [vmem:[#allocation3 + $0x10] sm:$0xc0] %vm368_vm1, %v746_v28  ;;  %vm456_vm1 = vcmask 779776  }
 0x197   :  { %749 = vst.msk [vmem:[#allocation3 + $0x30] sm:$0x1] %vm370_vm2, %v746_v28  ;;  %v579_v30 = vpop.permute.xlu1 %578  ;;  %vm511_vm2 = vcmask 1048327  }
 0x198   :  { %793 = vst.msk [vmem:[#allocation3 + $0x10] sm:$0xc0] %vm425_vm3, %v791_v29  ;;  %vm513_vm3 = vcmask 1042176  }
 0x199   :  { %794 = vst.msk [vmem:[#allocation3 + $0x30] sm:$0x1] %vm427_vm4, %v791_v29  ;;  %v836_v31 = vpop.permute.xlu0 %835  ;;  %vm1280_vm4 = vcmask 516096   ;;  %v1438_v29 = vld [vmem:[%s5252_s5 + $0xf8] sm:$0xff] }
 0x19a   :  { %581 = vst.msk [vmem:[#allocation3 + $0x28] sm:$0xe] %vm379_vm7, %v579_v30  ;;  %v1422_v30 = vld [vmem:[%s5252_s5 + $0x78] sm:$0xff]  ;;  %2938 = vmatprep.subr.mxu1 %v1438_v29 }
 0x19b   :  { %838 = vst.msk [vmem:[#allocation3 + $0x10] sm:$0xc0] %vm482_vm5, %v836_v31  ;;  %v1032_v32 = vld [vmem:[#allocation3 + $0x18] sm:$0xff]  ;;  %v628_v33 = vpop.permute.xlu1 %627  ;;  %2939 = vmatpush3.msra.mxu1 %v1422_v30  ;;  %vm1277_vm5 = vcmask 517120  }
 0x19c   :  { %839 = vst.msk [vmem:[#allocation3 + $0x30] sm:$0x1] %vm484_vm6, %v836_v31  ;;  %1256 = vmatprep.mubr.f32.mxu0 %v1032_v32  ;;  %v1437_v31 = vld [vmem:[%s5252_s5 + $0xf0] sm:$0xff]  ;;  %vm1296_vm6 = vcmask 1040896  }
 0x19d   :  { %630 = vst.msk [vmem:[#allocation3 + $0x28] sm:$0xe] %vm436_vm8, %v628_v33  ;;  %v677_v34 = vpop.permute.xlu0 %676  ;;  %v1421_v32 = vld [vmem:[%s5252_s5 + $0x70] sm:$0xff]  ;;  %v1470_v33 = vld [vmem:[%s5252_s5 + $0x1f8] sm:$0xff]  ;;  %2940 = vmatprep.subr.mxu1 %v1437_v31 }
 0x19e   :  { %679 = vst.msk [vmem:[#allocation3 + $0x28] sm:$0xe] %vm493_vm9, %v677_v34  ;;  %2973 = vmatprep.subr.mxu0 %v1470_v33  ;;  %v1436_v34 = vld [vmem:[%s5252_s5 + $0xe8] sm:$0xff]  ;;  %2941 = vmatpush3.msra.mxu1 %v1421_v32  ;;  %v1446_v31 = vld [vmem:[%s5252_s5 + $0x138] sm:$0xff]  ;;  %v1461_v33 = vld [vmem:[%s5252_s5 + $0x1b0] sm:$0xff] }
 0x19f   :  { %v434_v35 = vpop.permute.xlu1 %433  ;;  %2942 = vmatprep.subr.mxu1 %v1436_v34  ;;  %v1412_v32 = vld [vmem:[%s5252_s5 + $0x28] sm:$0xff]  ;;  %v1427_v34 = vld [vmem:[%s5252_s5 + $0xa0] sm:$0xff] }
 0x1a1   :  { %v377_v36 = vpop.permute.xlu0 %376 }
 0x1a2   :  { %v1031_v37 = vld [vmem:[#allocation3 + $0x10] sm:$0xff]  ;;  %380 = vst.msk [vmem:[#allocation3 + $0x20] sm:$0xe] %vm379_vm7, %v377_v36 }
 0x1a3   :  { %1257 = vmatmul.mubr.f32.vlgmr.msra.gmra.mxu0 %v1031_v37  ;;  %437 = vst.msk [vmem:[#allocation3 + $0x20] sm:$0xe] %vm436_vm8, %v434_v35  ;;  %v685_v38 = vpop.permute.xlu1 %684  ;;  %v1454_v35 = vld [vmem:[%s5252_s5 + $0x178] sm:$0xff]  ;;  %v1469_v36 = vld [vmem:[%s5252_s5 + $0x1f0] sm:$0xff]  ;;  %v1420_v37 = vld [vmem:[%s5252_s5 + $0x68] sm:$0xff] }
 0x1a4   :  { %2974 = vmatpush3.msra.mxu0 %v1454_v35  ;;  %2943 = vmatpush3.msra.mxu1 %v1420_v37  ;;  %v1445_v35 = vld [vmem:[%s5252_s5 + $0x130] sm:$0xff]  ;;  %v1460_v37 = vld [vmem:[%s5252_s5 + $0x1a8] sm:$0xff] }
 0x1a5   :  { %v491_v39 = vpop.permute.xlu0 %490  ;;  %2975 = vmatprep.subr.mxu0 %v1469_v36  ;;  %v1411_v36 = vld [vmem:[%s5252_s5 + $0x20] sm:$0xff] }
 0x1a6   :  { %494 = vst.msk [vmem:[#allocation3 + $0x20] sm:$0xe] %vm493_vm9, %v491_v39 }
 0x1a7   :  { %v920_v40 = vpop.permute.xlu1 %919 }
 0x1a8   :  { %922 = vst.msk [vmem:[#allocation3 + $0x38] sm:$0xe] %vm379_vm7, %v920_v40  ;;  %v1435_v40 = vld [vmem:[%s5252_s5 + $0xe0] sm:$0xff] }
 0x1a9   :  { %v587_v41 = vpop.permute.xlu0 %586  ;;  %2944 = vmatprep.subr.mxu1 %v1435_v40 }
 0x1aa   :  { %589 = vst.msk [vmem:[#allocation3 + $0x28] sm:$0x70] %vm388_vm10, %v587_v41  ;;  %v1468_v41 = vld [vmem:[%s5252_s5 + $0x1e8] sm:$0xff] }
 0x1ab   :  { %v386_v42 = vpop.permute.xlu1 %385 }
 0x1ac   :  { %389 = vst.msk [vmem:[#allocation3 + $0x20] sm:$0x70] %vm388_vm10, %v386_v42  ;;  %v1419_v42 = vld [vmem:[%s5252_s5 + $0x60] sm:$0xff] }
 0x1ad   :  { %v636_v43 = vpop.permute.xlu0 %635  ;;  %2945 = vmatpush3.msra.mxu1 %v1419_v42  ;;  %v1459_v42 = vld [vmem:[%s5252_s5 + $0x1a0] sm:$0xff] }
 0x1ae   :  { %638 = vst.msk [vmem:[#allocation3 + $0x28] sm:$0x70] %vm445_vm11, %v636_v43 }
 0x1af   :  { %687 = vst.msk [vmem:[#allocation3 + $0x28] sm:$0x70] %vm502_vm12, %v685_v38  ;;  %v500_v44 = vpop.permute.xlu1 %499  ;;  %v1453_v38 = vld [vmem:[%s5252_s5 + $0x170] sm:$0xff] }
 0x1b0   :  { %2976 = vmatpush3.msra.mxu0 %v1453_v38  ;;  %v1426_v38 = vld [vmem:[%s5252_s5 + $0x98] sm:$0xff] }
 0x1b1   :  { %v965_v45 = vpop.permute.xlu0 %964  ;;  %2977 = vmatprep.subr.mxu0 %v1468_v41  ;;  %v1410_v41 = vld [vmem:[%s5252_s5 + $0x18] sm:$0xff] }
 0x1b2   :  { %967 = vst.msk [vmem:[#allocation3 + $0x38] sm:$0xe] %vm436_vm8, %v965_v45 }
 0x1b3   :  { %v754_v46 = vpop.permute.xlu1 %753 }
 0x1b4   :  { %756 = vst.msk [vmem:[#allocation3 + $0x30] sm:$0xe] %vm379_vm7, %v754_v46  ;;  %vm3088_vm7 = vmmov 0  }
 0x1b5   :  { %v1010_v47 = vpop.permute.xlu0 %1009 }
 0x1b6   :  { %1012 = vst.msk [vmem:[#allocation3 + $0x38] sm:$0xe] %vm493_vm9, %v1010_v47 }
 0x1b7   :  { %v799_v48 = vpop.permute.xlu1 %798 }
 0x1b8   :  { %801 = vst.msk [vmem:[#allocation3 + $0x30] sm:$0xe] %vm436_vm8, %v799_v48 }
 0x1b9   :  { %v443_v49 = vpop.permute.xlu0 %442 }
 0x1ba   :  { %446 = vst.msk [vmem:[#allocation3 + $0x20] sm:$0x70] %vm445_vm11, %v443_v49 }
 0x1bb   :  { %503 = vst.msk [vmem:[#allocation3 + $0x20] sm:$0x70] %vm502_vm12, %v500_v44  ;;  %v844_v50 = vpop.permute.xlu1 %843 }
 0x1bc   :  { %846 = vst.msk [vmem:[#allocation3 + $0x30] sm:$0xe] %vm493_vm9, %v844_v50 }
 0x1bd   :  { %v693_v51 = vpop.permute.xlu0 %692 }
 0x1bf   :  { %v595_v52 = vpop.permute.xlu1 %594 }
 0x1c0   :  { %597 = vst.msk [vmem:[#allocation3 + $0x28] sm:$0x80] %vm397_vm13, %v595_v52 }
 0x1c1   :  { %598 = vst.msk [vmem:[#allocation3 + $0x48] sm:$0x3] %vm399_vm14, %v595_v52  ;;  %v927_v53 = vpop.permute.xlu0 %926 }
 0x1c2   :  { %929 = vst.msk [vmem:[#allocation3 + $0x38] sm:$0x70] %vm388_vm10, %v927_v53 }
 0x1c3   :  { %v644_v54 = vpop.permute.xlu1 %643 }
 0x1c4   :  { %646 = vst.msk [vmem:[#allocation3 + $0x28] sm:$0x80] %vm454_vm15, %v644_v54 }
 0x1c5   :  { %647 = vst.msk [vmem:[#allocation3 + $0x48] sm:$0x3] %vm456_vm1, %v644_v54  ;;  %v395_v55 = vpop.permute.xlu0 %394 }
 0x1c6   :  { %695 = vst.msk [vmem:[#allocation3 + $0x28] sm:$0x80] %vm511_vm2, %v693_v51 }
 0x1c7   :  { %696 = vst.msk [vmem:[#allocation3 + $0x48] sm:$0x3] %vm513_vm3, %v693_v51  ;;  %v972_v56 = vpop.permute.xlu1 %971 }
 0x1c8   :  { %398 = vst.msk [vmem:[#allocation3 + $0x20] sm:$0x80] %vm397_vm13, %v395_v55 }
 0x1c9   :  { %400 = vst.msk [vmem:[#allocation3 + $0x40] sm:$0x3] %vm399_vm14, %v395_v55  ;;  %v509_v57 = vpop.permute.xlu0 %508  ;;  %v1434_v55 = vld [vmem:[%s5252_s5 + $0xd8] sm:$0xff] }
 0x1ca   :  { %974 = vst.msk [vmem:[#allocation3 + $0x38] sm:$0x70] %vm445_vm11, %v972_v56  ;;  %v1452_v56 = vld [vmem:[%s5252_s5 + $0x168] sm:$0xff]  ;;  %2946 = vmatprep.subr.mxu1 %v1434_v55 }
 0x1cb   :  { %v1017_v58 = vpop.permute.xlu1 %1016  ;;  %2978 = vmatpush3.msra.mxu0 %v1452_v56  ;;  %v1456_v55 = vld [vmem:[%s5252_s5 + $0x188] sm:$0xff] }
 0x1cc   :  { %1019 = vst.msk [vmem:[#allocation3 + $0x38] sm:$0x70] %vm502_vm12, %v1017_v58  ;;  %v1440_v56 = vld [vmem:[%s5252_s5 + $0x108] sm:$0xff] }
 0x1cd   :  { %v1034_v59 = vld [vmem:[#allocation3 + $0x28] sm:$0xff]  ;;  %v761_v60 = vpop.permute.xlu0 %760 }
 0x1ce   :  { %1181 = vmatprep.mubr.f32.mxu1 %v1034_v59  ;;  %763 = vst.msk [vmem:[#allocation3 + $0x30] sm:$0x70] %vm388_vm10, %v761_v60  ;;  %v1038_v4 = vld [vmem:[#allocation3 + $0x48] sm:$0x3]  ;;  %v1467_v59 = vld [vmem:[%s5252_s5 + $0x1e0] sm:$0xff]  ;;  %v1433_v60 = vld [vmem:[%s5252_s5 + $0xd0] sm:$0xff] }
 0x1cf   :  { %v452_v61 = vpop.permute.xlu1 %451  ;;  %2979 = vmatprep.subr.mxu0 %v1467_v59  ;;  %v1439_v59 = vld [vmem:[%s5252_s5 + $0x100] sm:$0xff] }
 0x1d0   :  { %455 = vst.msk [vmem:[#allocation3 + $0x20] sm:$0x80] %vm454_vm15, %v452_v61 }
 0x1d1   :  { %457 = vst.msk [vmem:[#allocation3 + $0x40] sm:$0x3] %vm456_vm1, %v452_v61  ;;  %v806_v62 = vpop.permute.xlu0 %805  ;;  %v1451_v61 = vld [vmem:[%s5252_s5 + $0x160] sm:$0xff] }
 0x1d2   :  { %512 = vst.msk [vmem:[#allocation3 + $0x20] sm:$0x80] %vm511_vm2, %v509_v57  ;;  %2980 = vmatpush3.msra.mxu0 %v1451_v61 }
 0x1d3   :  { %514 = vst.msk [vmem:[#allocation3 + $0x40] sm:$0x3] %vm513_vm3, %v509_v57  ;;  %v935_v63 = vpop.permute.xlu1 %934  ;;  %v1418_v57 = vld [vmem:[%s5252_s5 + $0x58] sm:$0xff] }
 0x1d4   :  { %808 = vst.msk [vmem:[#allocation3 + $0x30] sm:$0x70] %vm445_vm11, %v806_v62  ;;  %2947 = vmatpush3.msra.mxu1 %v1418_v57  ;;  %v1455_v57 = vld [vmem:[%s5252_s5 + $0x180] sm:$0xff] }
 0x1d5   :  { %937 = vst.msk [vmem:[#allocation3 + $0x38] sm:$0x80] %vm397_vm13, %v935_v63  ;;  %v980_v0 = vpop.permute.xlu0 %979  ;;  %2948 = vmatprep.subr.mxu1 %v1433_v60 }
 0x1d6   :  { %938 = vst.msk [vmem:[#allocation3 + $0x58] sm:$0x3] %vm399_vm14, %v935_v63  ;;  %v1417_v63 = vld [vmem:[%s5252_s5 + $0x50] sm:$0xff] }
 0x1d7   :  { %982 = vst.msk [vmem:[#allocation3 + $0x38] sm:$0x80] %vm454_vm15, %v980_v0  ;;  %v769_v1 = vpop.permute.xlu1 %768  ;;  %2949 = vmatpush3.msra.mxu1 %v1417_v63 }
 0x1d8   :  { %983 = vst.msk [vmem:[#allocation3 + $0x58] sm:$0x3] %vm456_vm1, %v980_v0  ;;  %v1466_v0 = vld [vmem:[%s5252_s5 + $0x1d8] sm:$0xff] }
 0x1d9   :  { %771 = vst.msk [vmem:[#allocation3 + $0x30] sm:$0x80] %vm397_vm13, %v769_v1  ;;  %v1033_v2 = vld [vmem:[#allocation3 + $0x20] sm:$0xff]  ;;  %v1025_v3 = vpop.permute.xlu0 %1024  ;;  %2981 = vmatprep.subr.mxu0 %v1466_v0 }
 0x1da   :  { %772 = vst.msk [vmem:[#allocation3 + $0x50] sm:$0x3] %vm399_vm14, %v769_v1  ;;  %1182 = vmatmul.mubr.f32.gmra.mxu1 %v1033_v2  ;;  %v1037_v6 = vld [vmem:[#allocation3 + $0x40] sm:$0x3] }
 0x1db   :  { %1027 = vst.msk [vmem:[#allocation3 + $0x38] sm:$0x80] %vm511_vm2, %v1025_v3  ;;  %1186 = vmatprep.mubr.f32.mxu1 %v1038_v4  ;;  %v814_v5 = vpop.permute.xlu1 %813  ;;  %v1432_v4 = vld [vmem:[%s5252_s5 + $0xc8] sm:$0xff] }
 0x1dc   :  { %1028 = vst.msk [vmem:[#allocation3 + $0x58] sm:$0x3] %vm513_vm3, %v1025_v3  ;;  %2950 = vmatprep.subr.mxu1 %v1432_v4 }
 0x1dd   :  { %816 = vst.msk [vmem:[#allocation3 + $0x30] sm:$0x80] %vm454_vm15, %v814_v5  ;;  %v851_v7 = vpop.permute.xlu0 %850 }
 0x1de   :  { %817 = vst.msk [vmem:[#allocation3 + $0x50] sm:$0x3] %vm456_vm1, %v814_v5  ;;  %1187 = vmatmul.mubr.f32.gmra.mxu1 %v1037_v6  ;;  %v1450_v5 = vld [vmem:[%s5252_s5 + $0x158] sm:$0xff]  ;;  %v1416_v6 = vld [vmem:[%s5252_s5 + $0x48] sm:$0xff] }
 0x1df   :  { %853 = vst.msk [vmem:[#allocation3 + $0x30] sm:$0x70] %vm502_vm12, %v851_v7  ;;  %v859_v8 = vpop.permute.xlu1 %858  ;;  %2982 = vmatpush3.msra.mxu0 %v1450_v5  ;;  %2951 = vmatpush3.msra.mxu1 %v1416_v6  ;;  %v1492_v5 = vlaneseq }
 0x1e0   :  { %861 = vst.msk [vmem:[#allocation3 + $0x30] sm:$0x80] %vm511_vm2, %v859_v8 }
 0x1e1   :  { %862 = vst.msk [vmem:[#allocation3 + $0x50] sm:$0x3] %vm513_vm3, %v859_v8  ;;  %v1465_v8 = vld [vmem:[%s5252_s5 + $0x1d0] sm:$0xff] }
 0x1e2   :  { %v1036_v9 = vld [vmem:[#allocation3 + $0x38] sm:$0xff]  ;;  %2983 = vmatprep.subr.mxu0 %v1465_v8  ;;  %v3906_v8 = vshrl.u32 %v1492_v5, 7 }
 0x1e3   :  { %1261 = vmatprep.mubr.f32.mxu0 %v1036_v9  ;;  %v1040_v11 = vld [vmem:[#allocation3 + $0x58] sm:$0x3]  ;;  %v1431_v9 = vld [vmem:[%s5252_s5 + $0xc0] sm:$0xff] }
 0x1e4   :  { %2952 = vmatprep.subr.mxu1 %v1431_v9 }
 0x1e7   :  { %v1035_v10 = vld [vmem:[#allocation3 + $0x30] sm:$0xff] }
 0x1e8   :  { %1262 = vmatmul.mubr.f32.gmra.mxu0 %v1035_v10  ;;  %v1039_v12 = vld [vmem:[#allocation3 + $0x50] sm:$0x3] }
 0x1e9   :  { %1266 = vmatprep.mubr.f32.mxu0 %v1040_v11  ;;  %v1449_v10 = vld [vmem:[%s5252_s5 + $0x150] sm:$0xff]  ;;  %v1415_v11 = vld [vmem:[%s5252_s5 + $0x40] sm:$0xff] }
 0x1ea   :  { %2984 = vmatpush3.msra.mxu0 %v1449_v10  ;;  %2953 = vmatpush3.msra.mxu1 %v1415_v11 }
 0x1ec   :  { %1267 = vmatmul.mubr.f32.gmra.mxu0 %v1039_v12  ;;  %v1464_v12 = vld [vmem:[%s5252_s5 + $0x1c8] sm:$0xff] }
 0x1ed   :  { %2985 = vmatprep.subr.mxu0 %v1464_v12 }
 0x252   :  { %v2888_v13 = vpop.f32.mrf.mxu1 }
 0x254   :  { %v2889_v14 = vpop.f32.mrf.mxu1 }
 0x255   :  { %v2890_v15 = vadd.f32 %v2889_v14, %v2888_v13  ;;  %v1430_v14 = vld [vmem:[%s5252_s5 + $0xb8] sm:$0xff] }
 0x256   :  { %2954 = vmatprep.subr.mxu1 %v1430_v14 }
 0x257   :  { %v1179_v19 = vadd.f32 %v2890_v15, %v3679_v16  ;;  %v1448_v15 = vld [vmem:[%s5252_s5 + $0x148] sm:$0xff] }
 0x258   :  { %2986 = vmatpush3.msra.mxu0 %v1448_v15  ;;  %v1478_v15 = vld [vmem:[%s5252_s5 + $0x238] sm:$0xff] }
 0x263   :  { %v2929_v17 = vpop.f32.mrf.mxu0 }
 0x265   :  { %v2930_v18 = vpop.f32.mrf.mxu0 }
 0x266   :  { %v2931_v20 = vadd.f32 %v2930_v18, %v2929_v17  ;;  %v1463_v17 = vld [vmem:[%s5252_s5 + $0x1c0] sm:$0xff]  ;;  %v1429_v18 = vld [vmem:[%s5252_s5 + $0xb0] sm:$0xff] }
 0x267   :  { %2987 = vmatprep.subr.mxu0 %v1463_v17  ;;  %v1477_v17 = vld [vmem:[%s5252_s5 + $0x230] sm:$0xff] }
 0x268   :  { %v1259_v21 = vadd.f32 %v2931_v20, %v1179_v19  ;;  %v1447_v19 = vld [vmem:[%s5252_s5 + $0x140] sm:$0xff]  ;;  %v1413_v20 = vld [vmem:[%s5252_s5 + $0x30] sm:$0xff] }
 0x269   :  { %2988 = vmatpush3.msra.mxu0 %v1447_v19  ;;  %v1475_v19 = vld [vmem:[%s5252_s5 + $0x220] sm:$0xff] }
 0x26a   :  { %v1272_v22 = vmax.f32 %v1259_v21, 0.0  ;;  %v1462_v21 = vld [vmem:[%s5252_s5 + $0x1b8] sm:$0xff] }
 0x26b   :  { %2989 = vmatprep.subr.mxu0 %v1462_v21  ;;  %v1473_v21 = vld [vmem:[%s5252_s5 + $0x210] sm:$0xff] }
 0x26c   :  { %1275 = vst.msk [vmem:[#allocation4] sm:$0xff] %vm75_vm0, %v1272_v22  ;;  %2990 = vmatpush3.msra.mxu0 %v1446_v31  ;;  %v1757_v31 = vld [vmem:[%s5253_s7 + $0xc0] sm:$0xff] }
 0x26d   :  { %2991 = vmatprep.subr.mxu0 %v1461_v33  ;;  %v1754_v33 = vld [vmem:[%s5253_s7 + $0xa8] sm:$0xff] }
 0x26e   :  { %2992 = vmatpush3.msra.mxu0 %v1445_v35  ;;  %v1753_v35 = vld [vmem:[%s5253_s7 + $0xa0] sm:$0xff] }
 0x26f   :  { %2993 = vmatprep.subr.mxu0 %v1460_v37  ;;  %v1750_v37 = vld [vmem:[%s5253_s7 + $0x88] sm:$0xff] }
 0x273   :  { %v2818_v23 = vld.sshfl [vmem:[#allocation4 + $0x1] sm:$0x1 pattern:$0x76325410]  ;;  %v1279_v25 = vld [vmem:[#allocation4] sm:$0x1] }
 0x274   :  { %1293 = vrot.lane.b32.xlu0 %v2818_v23, %s3084_s2  ;;  %1281 = vst.msk [vmem:[#allocation5] sm:$0x1] %vm1280_vm4, %v1279_v25  ;;  %v1311_v26 = vld [vmem:[#allocation4 + $0x2] sm:$0x1]  ;;  %v1341_v27 = vld [vmem:[#allocation4 + $0x4] sm:$0x1] }
 0x275   :  { %1312 = vst.msk [vmem:[#allocation5 + $0x2] sm:$0x1] %vm1280_vm4, %v1311_v26  ;;  %v2820_v24 = vld.sshfl [vmem:[#allocation4 + $0x3] sm:$0x1 pattern:$0x76325410] }
 0x276   :  { %1342 = vst.msk [vmem:[#allocation5 + $0x4] sm:$0x1] %vm1280_vm4, %v1341_v27  ;;  %v1371_v28 = vld [vmem:[#allocation4 + $0x6] sm:$0x1] }
 0x277   :  { %1372 = vst.msk [vmem:[#allocation5 + $0x6] sm:$0x1] %vm1280_vm4, %v1371_v28  ;;  %v2822_v39 = vld.sshfl [vmem:[#allocation4 + $0x5] sm:$0x1 pattern:$0x76325410] }
 0x278   :  { %1324 = vrot.lane.b32.xlu0 %v2820_v24, %s3084_s2  ;;  %v2824_v43 = vld.sshfl [vmem:[#allocation4 + $0x7] sm:$0x1 pattern:$0x76325410]  ;;  %v1428_v28 = vld [vmem:[%s5252_s5 + $0xa8] sm:$0xff] }
 0x27c   :  { %1354 = vrot.lane.b32.xlu0 %v2822_v39, %s3084_s2  ;;  %v1444_v39 = vld [vmem:[%s5252_s5 + $0x128] sm:$0xff] }
 0x27d   :  { %2994 = vmatpush3.msra.mxu0 %v1444_v39  ;;  %v1749_v39 = vld [vmem:[%s5253_s7 + $0x80] sm:$0xff] }
 0x27e   :  { %2995 = vmatprep.subr.mxu0 %v1459_v42  ;;  %v1748_v42 = vld [vmem:[%s5253_s7 + $0x78] sm:$0xff] }
 0x280   :  { %1384 = vrot.lane.b32.xlu0 %v2824_v43, %s3084_s2  ;;  %v1425_v43 = vld [vmem:[%s5252_s5 + $0x90] sm:$0xff] }
 0x29a   :  { %v2891_v44 = vpop.f32.mrf.mxu1 }
 0x29c   :  { %v2892_v45 = vpop.f32.mrf.mxu1 }
 0x29d   :  { %v2893_v47 = vadd.f32 %v2892_v45, %v2891_v44  ;;  %v1443_v44 = vld [vmem:[%s5252_s5 + $0x120] sm:$0xff]  ;;  %v1409_v45 = vld [vmem:[%s5252_s5 + $0x10] sm:$0xff] }
 0x29e   :  { %v2894_v46 = vpop.f32.mrf.mxu1  ;;  %2996 = vmatpush3.msra.mxu0 %v1443_v44  ;;  %v1747_v44 = vld [vmem:[%s5253_s7 + $0x70] sm:$0xff] }
 0x29f   :  { %v1184_v51 = vadd.f32 %v2893_v47, %v3679_v16  ;;  %v1424_v47 = vld [vmem:[%s5252_s5 + $0x88] sm:$0xff] }
 0x2a0   :  { %v2895_v48 = vpop.f32.mrf.mxu1 }
 0x2a1   :  { %v2896_v52 = vadd.f32 %v2895_v48, %v2894_v46  ;;  %v1458_v46 = vld [vmem:[%s5252_s5 + $0x198] sm:$0xff] }
 0x2a2   :  { %2997 = vmatprep.subr.mxu0 %v1458_v46  ;;  %v1744_v46 = vld [vmem:[%s5253_s7 + $0x58] sm:$0xff] }
 0x2a3   :  { %v1189_v1 = vadd.f32 %v2896_v52, %v3679_v16  ;;  %v1414_v16 = vld [vmem:[%s5252_s5 + $0x38] sm:$0xff]  ;;  %v1423_v52 = vld [vmem:[%s5252_s5 + $0x80] sm:$0xff] }
 0x2a4   :  { %2955 = vmatpush3.msra.mxu1 %v1414_v16 }
 0x2a5   :  { %2956 = vmatprep.subr.mxu1 %v1429_v18  ;;  %v1476_v18 = vld [vmem:[%s5252_s5 + $0x228] sm:$0xff] }
 0x2a6   :  { %2957 = vmatpush3.msra.mxu1 %v1413_v20  ;;  %v1474_v20 = vld [vmem:[%s5252_s5 + $0x218] sm:$0xff] }
 0x2a7   :  { %2958 = vmatprep.subr.mxu1 %v1428_v28  ;;  %v1763_v28 = vld [vmem:[%s5253_s7 + $0xf0] sm:$0xff] }
 0x2a8   :  { %v2932_v49 = vpop.f32.mrf.mxu0  ;;  %2959 = vmatpush3.msra.mxu1 %v1412_v32  ;;  %v1759_v32 = vld [vmem:[%s5253_s7 + $0xd0] sm:$0xff] }
 0x2a9   :  { %2960 = vmatprep.subr.mxu1 %v1427_v34  ;;  %v1756_v34 = vld [vmem:[%s5253_s7 + $0xb8] sm:$0xff] }
 0x2aa   :  { %v2933_v50 = vpop.f32.mrf.mxu0  ;;  %2961 = vmatpush3.msra.mxu1 %v1411_v36  ;;  %v1755_v36 = vld [vmem:[%s5253_s7 + $0xb0] sm:$0xff] }
 0x2ab   :  { %v2934_v53 = vadd.f32 %v2933_v50, %v2932_v49  ;;  %2962 = vmatprep.subr.mxu1 %v1426_v38  ;;  %v1442_v49 = vld [vmem:[%s5252_s5 + $0x118] sm:$0xff]  ;;  %v1408_v50 = vld [vmem:[%s5252_s5 + $0x8] sm:$0xff] }
 0x2ac   :  { %v2935_v54 = vpop.f32.mrf.mxu0  ;;  %2963 = vmatpush3.msra.mxu1 %v1410_v41  ;;  %2998 = vmatpush3.msra.mxu0 %v1442_v49  ;;  %v1752_v38 = vld [vmem:[%s5253_s7 + $0x98] sm:$0xff]  ;;  %v1746_v41 = vld [vmem:[%s5253_s7 + $0x68] sm:$0xff] }
 0x2ad   :  { %v1264_v58 = vadd.f32 %v2934_v53, %v1184_v51  ;;  %2964 = vmatprep.subr.mxu1 %v1425_v43  ;;  %v1457_v51 = vld [vmem:[%s5252_s5 + $0x190] sm:$0xff]  ;;  %v1745_v43 = vld [vmem:[%s5253_s7 + $0x60] sm:$0xff]  ;;  %v1738_v49 = vld [vmem:[%s5253_s7 + $0x28] sm:$0xff] }
 0x2ae   :  { %v2936_v62 = vpop.f32.mrf.mxu0  ;;  %2965 = vmatpush3.msra.mxu1 %v1409_v45  ;;  %v1441_v53 = vld [vmem:[%s5252_s5 + $0x110] sm:$0xff]  ;;  %2999 = vmatprep.subr.mxu0 %v1457_v51  ;;  %v1742_v45 = vld [vmem:[%s5253_s7 + $0x48] sm:$0xff]  ;;  %v1737_v51 = vld [vmem:[%s5253_s7 + $0x20] sm:$0xff] }
 0x2af   :  { %v1273_v2 = vmax.f32 %v1264_v58, 0.0  ;;  %v2937_v3 = vadd.f32 %v2936_v62, %v2935_v54  ;;  %2966 = vmatprep.subr.mxu1 %v1424_v47  ;;  %v1407_v54 = vld [vmem:[%s5252_s5] sm:$0xff]  ;;  %3000 = vmatpush3.msra.mxu0 %v1441_v53  ;;  %v3086_v58 = vmov 0.0   ;;  %v1734_v53 = vld [vmem:[%s5253_s7 + $0x8] sm:$0xff] }
 0x2b0   :  { %2967 = vmatpush3.msra.mxu1 %v1408_v50  ;;  %3001 = vmatprep.subr.mxu0 %v1456_v55  ;;  %v1741_v47 = vld [vmem:[%s5253_s7 + $0x40] sm:$0xff]  ;;  %v1740_v50 = vld [vmem:[%s5253_s7 + $0x38] sm:$0xff] }
 0x2b1   :  { %1276 = vst.msk [vmem:[#allocation4 + $0x8] sm:$0xff] %vm75_vm0, %v1273_v2  ;;  %v1269_v7 = vadd.f32 %v2937_v3, %v1189_v1  ;;  %2968 = vmatprep.subr.mxu1 %v1423_v52  ;;  %3002 = vmatpush3.msra.mxu0 %v1440_v56  ;;  %v3087_v3 = vmov 1983009808   ;;  %v1739_v52 = vld [vmem:[%s5253_s7 + $0x30] sm:$0xff]  ;;  %v1733_v55 = vld [vmem:[%s5253_s7] sm:$0xff] }
 0x2b2   :  { %2969 = vmatpush3.msra.mxu1 %v1407_v54  ;;  %3003 = vmatprep.subr.mxu0 %v1455_v57  ;;  %v1490_v4 = vunpack.c.l.s4 %v3087_v3  ;;  %v1736_v54 = vld [vmem:[%s5253_s7 + $0x18] sm:$0xff]  ;;  %v1735_v56 = vld [vmem:[%s5253_s7 + $0x10] sm:$0xff]  ;;  %v1997_v57 = vld [vmem:[%s5254_s9 + $0x1e8] sm:$0xff] }
 0x2b3   :  { %v1274_v13 = vmax.f32 %v1269_v7, 0.0  ;;  %3057 = vmatprep.subr.mxu1 %v3086_v58  ;;  %3004 = vmatpush3.msra.mxu0 %v1439_v59 }
 0x2b4   :  { %v1491_v7 = vunpack.c.0.s8 %v1490_v4 }
 0x2b5   :  { %1278 = vst.msk [vmem:[#allocation4 + $0x10] sm:$0x3] %vm1277_vm5, %v1274_v13 }
 0x2b6   :  { %v1494_v9 = vsub.s32 %v1491_v7, %v3906_v8 }
 0x2b8   :  { %v1401_v22 = vld [vmem:[#allocation4 + $0x8] sm:$0x1]  ;;  %v2819_v23 = vld.sshfl [vmem:[#allocation4 + $0xa] sm:$0x1 pattern:$0x76325410] }
 0x2b9   :  { %1307 = vrot.lane.b32.xlu1 %v2819_v23, %s3084_s2  ;;  %1402 = vst.msk [vmem:[#allocation5 + $0x8] sm:$0x1] %vm1280_vm4, %v1401_v22  ;;  %v1282_v25 = vld [vmem:[#allocation4 + $0x9] sm:$0x1]  ;;  %v1313_v26 = vld [vmem:[#allocation4 + $0xb] sm:$0x1] }
 0x2ba   :  { %1283 = vst.msk [vmem:[#allocation5 + $0x1] sm:$0x1] %vm1280_vm4, %v1282_v25  ;;  %1314 = vst.msk [vmem:[#allocation5 + $0x3] sm:$0x1] %vm1280_vm4, %v1313_v26  ;;  %v1343_v27 = vld [vmem:[#allocation4 + $0xd] sm:$0x1] }
 0x2bb   :  { %v1373_v24 = vld [vmem:[#allocation4 + $0xf] sm:$0x1]  ;;  %v2821_v30 = vld.sshfl [vmem:[#allocation4 + $0xc] sm:$0x1 pattern:$0x76325410] }
 0x2bc   :  { %v1403_v29 = vld [vmem:[#allocation4 + $0x11] sm:$0x1]  ;;  %1344 = vst.msk [vmem:[#allocation5 + $0x5] sm:$0x1] %vm1280_vm4, %v1343_v27  ;;  %1374 = vst.msk [vmem:[#allocation5 + $0x7] sm:$0x1] %vm1280_vm4, %v1373_v24 }
 0x2bd   :  { %1337 = vrot.lane.b32.xlu1 %v2821_v30, %s3084_s2  ;;  %1404 = vst.msk [vmem:[#allocation5 + $0x9] sm:$0x1] %vm1280_vm4, %v1403_v29  ;;  %v2823_v40 = vld.sshfl [vmem:[#allocation4 + $0xe] sm:$0x1 pattern:$0x76325410] }
 0x2be   :  { %v2825_v48 = vld.sshfl [vmem:[#allocation4 + $0x10] sm:$0x1 pattern:$0x76325410]  ;;  %v1472_v22 = vld [vmem:[%s5252_s5 + $0x208] sm:$0xff]  ;;  %v1471_v23 = vld [vmem:[%s5252_s5 + $0x200] sm:$0xff] }
 0x2bf   :  { %v1762_v26 = vld [vmem:[%s5253_s7 + $0xe8] sm:$0xff]  ;;  %v1764_v27 = vld [vmem:[%s5253_s7 + $0xf8] sm:$0xff]  ;;  %v1761_v24 = vld [vmem:[%s5253_s7 + $0xe0] sm:$0xff] }
 0x2c0   :  { %1806 = vmatprep.subr.mxu0 %v1762_v26  ;;  %v1758_v29 = vld [vmem:[%s5253_s7 + $0xc8] sm:$0xff]  ;;  %v1760_v30 = vld [vmem:[%s5253_s7 + $0xd8] sm:$0xff] }
 0x2c1   :  { %1367 = vrot.lane.b32.xlu1 %v2823_v40, %s3084_s2  ;;  %v1751_v40 = vld [vmem:[%s5253_s7 + $0x90] sm:$0xff]  ;;  %v1981_v26 = vld [vmem:[%s5254_s9 + $0x168] sm:$0xff] }
 0x2c4   :  { %v2827_v25 = vld.sshfl [vmem:[#allocation5 + $0x8] sm:$0x3 pattern:$0x76325410] }
 0x2c5   :  { %1397 = vrot.lane.b32.xlu1 %v2825_v48, %s3084_s2  ;;  %v1743_v48 = vld [vmem:[%s5253_s7 + $0x50] sm:$0xff] }
 0x2e6   :  { %v1294_v60 = vpop.permute.xlu0 %1293 }
 0x2e7   :  { %1297 = vst.msk [vmem:[#allocation5] sm:$0x1] %vm1296_vm6, %v1294_v60 }
 0x2ea   :  { %v1325_v61 = vpop.permute.xlu0 %1324 }
 0x2eb   :  { %1327 = vst.msk [vmem:[#allocation5 + $0x2] sm:$0x1] %vm1296_vm6, %v1325_v61 }
 0x2ee   :  { %v1355_v62 = vpop.permute.xlu0 %1354 }
 0x2ef   :  { %1357 = vst.msk [vmem:[#allocation5 + $0x4] sm:$0x1] %vm1296_vm6, %v1355_v62 }
 0x2f2   :  { %v1385_v63 = vpop.permute.xlu0 %1384 }
 0x2f3   :  { %1387 = vst.msk [vmem:[#allocation5 + $0x6] sm:$0x1] %vm1296_vm6, %v1385_v63  ;;  %v2826_v63 = vld [vmem:[%s5255_s6] ss:$0 sm:$0xff] }
 0x32b   :  { %v1308_v0 = vpop.permute.xlu1 %1307 }
 0x32c   :  { %1310 = vst.msk [vmem:[#allocation5 + $0x1] sm:$0x1] %vm1296_vm6, %v1308_v0 }
 0x32f   :  { %v1338_v1 = vpop.permute.xlu1 %1337 }
 0x330   :  { %1340 = vst.msk [vmem:[#allocation5 + $0x3] sm:$0x1] %vm1296_vm6, %v1338_v1 }
 0x333   :  { %v1368_v2 = vpop.permute.xlu1 %1367 }
 0x334   :  { %1370 = vst.msk [vmem:[#allocation5 + $0x5] sm:$0x1] %vm1296_vm6, %v1368_v2 }
 0x337   :  { %v1398_v6 = vpop.permute.xlu1 %1397 }
 0x338   :  { %1400 = vst.msk [vmem:[#allocation5 + $0x7] sm:$0x1] %vm1296_vm6, %v1398_v6 }
 0x33f   :  { %v1405_v10 = vld [vmem:[#allocation5] sm:$0xff] }
 0x340   :  { %v1495_v11 = vrot.slane %v1405_v10, %v1494_v9  ;;  %v1488_v12 = vcombine.high %v1405_v10, %v1405_v10  ;;  %v1996_v10 = vld [vmem:[%s5254_s9 + $0x1e0] sm:$0xff] }
 0x342   :  { %v1503_v13 = vcombine.high %v1495_v11, %v1495_v11  ;;  %v1502_v14 = vrot.slane %v1488_v12, %v1494_v9 }
 0x344   :  { %1582 = vmatprep.mubr.f32.mxu1 %v1503_v13  ;;  %v1504_v16 = vcombine.high %v1502_v14, %v1502_v14  ;;  %v1993_v13 = vld [vmem:[%s5254_s9 + $0x1c8] sm:$0xff] }
 0x345   :  { %1583 = vmatmul.mubr.f32.vlgmr.msra.gmra.mxu1 %v1495_v11  ;;  %v2124_v11 = vld [vmem:[%s5254_s9 + $0x5e0] sm:$0xff] }
 0x346   :  { %3058 = vmatpush3.msra.mxu1 %v1478_v15  ;;  %1652 = vmatprep.mubr.f32.mxu0 %v1504_v16  ;;  %v1992_v15 = vld [vmem:[%s5254_s9 + $0x1c0] sm:$0xff] }
 0x347   :  { %3059 = vmatprep.subr.mxu1 %v3086_v58  ;;  %1653 = vmatmul.mubr.f32.vlgmr.msra.gmra.mxu0 %v1502_v14  ;;  %v2121_v14 = vld [vmem:[%s5254_s9 + $0x5c8] sm:$0xff]  ;;  %v2120_v16 = vld [vmem:[%s5254_s9 + $0x5c0] sm:$0xff] }
 0x348   :  { %3060 = vmatpush3.msra.mxu1 %v1477_v17  ;;  %3073 = vmatprep.mubr.msk.f32.mxu1 %vm3088_vm7, %v3086_v58  ;;  %v1989_v17 = vld [vmem:[%s5254_s9 + $0x1a8] sm:$0xff] }
 0x349   :  { %3061 = vmatprep.subr.mxu1 %v3086_v58  ;;  %1854 = vmatprep.mubr.f32.mxu0 %v3086_v58 }
 0x34a   :  { %3062 = vmatpush3.msra.mxu1 %v1476_v18  ;;  %1807 = vmatpush1.msra.mxu0 %v1761_v24  ;;  %v2117_v18 = vld [vmem:[%s5254_s9 + $0x5a8] sm:$0xff]  ;;  %v1980_v24 = vld [vmem:[%s5254_s9 + $0x160] sm:$0xff] }
 0x34b   :  { %3063 = vmatprep.subr.mxu1 %v3086_v58  ;;  %1808 = vmatprep.subr.mxu0 %v1758_v29  ;;  %v1977_v29 = vld [vmem:[%s5254_s9 + $0x148] sm:$0xff] }
 0x34c   :  { %3064 = vmatpush3.msra.mxu1 %v1475_v19  ;;  %1809 = vmatpush1.msra.mxu0 %v1757_v31  ;;  %v1988_v19 = vld [vmem:[%s5254_s9 + $0x1a0] sm:$0xff] }
 0x34d   :  { %3065 = vmatprep.subr.mxu1 %v3086_v58  ;;  %1810 = vmatprep.subr.mxu0 %v1754_v33  ;;  %v1976_v31 = vld [vmem:[%s5254_s9 + $0x140] sm:$0xff]  ;;  %v1973_v33 = vld [vmem:[%s5254_s9 + $0x128] sm:$0xff] }
 0x34e   :  { %3066 = vmatpush3.msra.mxu1 %v1474_v20  ;;  %1811 = vmatpush1.msra.mxu0 %v1753_v35  ;;  %v2116_v20 = vld [vmem:[%s5254_s9 + $0x5a0] sm:$0xff] }
 0x34f   :  { %3067 = vmatprep.subr.mxu1 %v3086_v58  ;;  %1812 = vmatprep.subr.mxu0 %v1750_v37  ;;  %v1972_v35 = vld [vmem:[%s5254_s9 + $0x120] sm:$0xff]  ;;  %v1969_v37 = vld [vmem:[%s5254_s9 + $0x108] sm:$0xff] }
 0x350   :  { %3068 = vmatpush3.msra.mxu1 %v1473_v21  ;;  %1813 = vmatpush1.msra.mxu0 %v1749_v39  ;;  %v1985_v21 = vld [vmem:[%s5254_s9 + $0x188] sm:$0xff]  ;;  %v1968_v39 = vld [vmem:[%s5254_s9 + $0x100] sm:$0xff] }
 0x351   :  { %3069 = vmatprep.subr.mxu1 %v3086_v58  ;;  %1814 = vmatprep.subr.mxu0 %v1746_v41  ;;  %v1965_v41 = vld [vmem:[%s5254_s9 + $0xe8] sm:$0xff] }
 0x352   :  { %3070 = vmatpush3.msra.mxu1 %v1472_v22  ;;  %1815 = vmatpush1.msra.mxu0 %v1745_v43  ;;  %v2113_v22 = vld [vmem:[%s5254_s9 + $0x588] sm:$0xff]  ;;  %v1964_v43 = vld [vmem:[%s5254_s9 + $0xe0] sm:$0xff] }
 0x353   :  { %3071 = vmatprep.subr.mxu1 %v3086_v58  ;;  %1816 = vmatprep.subr.mxu0 %v1742_v45  ;;  %v1961_v45 = vld [vmem:[%s5254_s9 + $0xc8] sm:$0xff] }
 0x354   :  { %3072 = vmatpush3.msra.mxu1 %v1471_v23  ;;  %1817 = vmatpush1.msra.mxu0 %v1741_v47  ;;  %v1984_v23 = vld [vmem:[%s5254_s9 + $0x180] sm:$0xff] }
 0x355   :  { %3074 = vmatmul.mubr.msk.f32.vlgmr.msra.gmra.mxu1 %vm75_vm0, %v2827_v25  ;;  %1877 = vmatprep.subr.mxu1 %v1764_v27  ;;  %v2112_v25 = vld [vmem:[%s5254_s9 + $0x580] sm:$0xff]  ;;  %v2109_v27 = vld [vmem:[%s5254_s9 + $0x568] sm:$0xff] }
 0x356   :  { %1925 = vmatprep.mubr.f32.mxu1 %v3086_v58  ;;  %1878 = vmatpush1.msra.mxu1 %v1763_v28  ;;  %v2125_v58 = vld [vmem:[%s5254_s9 + $0x5e8] sm:$0xff]  ;;  %v2108_v28 = vld [vmem:[%s5254_s9 + $0x560] sm:$0xff] }
 0x357   :  { %1879 = vmatprep.subr.mxu1 %v1760_v30  ;;  %1818 = vmatprep.subr.mxu0 %v1738_v49  ;;  %v2105_v30 = vld [vmem:[%s5254_s9 + $0x548] sm:$0xff]  ;;  %v1960_v47 = vld [vmem:[%s5254_s9 + $0xc0] sm:$0xff] }
 0x358   :  { %1880 = vmatpush1.msra.mxu1 %v1759_v32  ;;  %1819 = vmatpush1.msra.mxu0 %v1737_v51  ;;  %v2104_v32 = vld [vmem:[%s5254_s9 + $0x540] sm:$0xff]  ;;  %v1957_v49 = vld [vmem:[%s5254_s9 + $0xa8] sm:$0xff] }
 0x359   :  { %1881 = vmatprep.subr.mxu1 %v1756_v34  ;;  %1820 = vmatprep.subr.mxu0 %v1734_v53  ;;  %v2101_v34 = vld [vmem:[%s5254_s9 + $0x528] sm:$0xff]  ;;  %v1956_v51 = vld [vmem:[%s5254_s9 + $0xa0] sm:$0xff] }
 0x35a   :  { %1882 = vmatpush1.msra.mxu1 %v1755_v36  ;;  %1821 = vmatpush1.msra.mxu0 %v1733_v55  ;;  %v2100_v36 = vld [vmem:[%s5254_s9 + $0x520] sm:$0xff]  ;;  %v1953_v53 = vld [vmem:[%s5254_s9 + $0x88] sm:$0xff] }
 0x35b   :  { %1883 = vmatprep.subr.mxu1 %v1752_v38  ;;  %2214 = vmatprep.subr.mxu0 %v1997_v57  ;;  %v2097_v38 = vld [vmem:[%s5254_s9 + $0x508] sm:$0xff]  ;;  %v1952_v55 = vld [vmem:[%s5254_s9 + $0x80] sm:$0xff] }
 0x35c   :  { %1884 = vmatpush1.msra.mxu1 %v1751_v40  ;;  %v2096_v40 = vld [vmem:[%s5254_s9 + $0x500] sm:$0xff]  ;;  %v1949_v57 = vld [vmem:[%s5254_s9 + $0x68] sm:$0xff] }
 0x35d   :  { %1885 = vmatprep.subr.mxu1 %v1748_v42  ;;  %v2093_v42 = vld [vmem:[%s5254_s9 + $0x4e8] sm:$0xff] }
 0x35e   :  { %1886 = vmatpush1.msra.mxu1 %v1747_v44  ;;  %v2092_v44 = vld [vmem:[%s5254_s9 + $0x4e0] sm:$0xff] }
 0x35f   :  { %1887 = vmatprep.subr.mxu1 %v1744_v46  ;;  %v2089_v46 = vld [vmem:[%s5254_s9 + $0x4c8] sm:$0xff] }
 0x360   :  { %1888 = vmatpush1.msra.mxu1 %v1743_v48  ;;  %v2088_v48 = vld [vmem:[%s5254_s9 + $0x4c0] sm:$0xff] }
 0x361   :  { %1889 = vmatprep.subr.mxu1 %v1740_v50  ;;  %v2085_v50 = vld [vmem:[%s5254_s9 + $0x4a8] sm:$0xff] }
 0x362   :  { %1890 = vmatpush1.msra.mxu1 %v1739_v52  ;;  %v2084_v52 = vld [vmem:[%s5254_s9 + $0x4a0] sm:$0xff] }
 0x363   :  { %1891 = vmatprep.subr.mxu1 %v1736_v54  ;;  %v2081_v54 = vld [vmem:[%s5254_s9 + $0x488] sm:$0xff] }
 0x364   :  { %1892 = vmatpush1.msra.mxu1 %v1735_v56  ;;  %v2080_v56 = vld [vmem:[%s5254_s9 + $0x480] sm:$0xff] }
 0x365   :  { %2285 = vmatprep.subr.mxu1 %v2125_v58  ;;  %v2077_v58 = vld [vmem:[%s5254_s9 + $0x468] sm:$0xff] }
 0x405   :  { %v2970_v59 = vpop.f32.mrf.mxu1 }
 0x407   :  { %v2971_v60 = vpop.f32.mrf.mxu1  ;;  %v3005_v61 = vpop.f32.mrf.mxu0 }
 0x408   :  { %v2972_v62 = vadd.f32 %v2971_v60, %v2970_v59  ;;  %v1948_v59 = vld [vmem:[%s5254_s9 + $0x60] sm:$0xff] }
 0x409   :  { %v3006_v0 = vpop.f32.mrf.mxu0  ;;  %v2076_v60 = vld [vmem:[%s5254_s9 + $0x460] sm:$0xff] }
 0x40a   :  { %v1585_v1 = vadd.f32 %v2972_v62, %v2826_v63  ;;  %v3007_v2 = vadd.f32 %v3006_v0, %v3005_v61  ;;  %v1945_v61 = vld [vmem:[%s5254_s9 + $0x48] sm:$0xff]  ;;  %v1944_v63 = vld [vmem:[%s5254_s9 + $0x40] sm:$0xff] }
 0x40b   :  { %v2073_v62 = vld [vmem:[%s5254_s9 + $0x448] sm:$0xff]  ;;  %v2072_v0 = vld [vmem:[%s5254_s9 + $0x440] sm:$0xff] }
 0x40c   :  { %v1655_v3 = vadd.f32 %v3007_v2, %v1585_v1  ;;  %v1941_v1 = vld [vmem:[%s5254_s9 + $0x28] sm:$0xff] }
 0x40d   :  { %v2069_v2 = vld [vmem:[%s5254_s9 + $0x428] sm:$0xff] }
 0x415   :  { %v1724_v4 = vpop.f32.mrf.mxu1 }
 0x416   :  { %v1725_v5 = vadd.f32 %v1724_v4, %v1655_v3  ;;  %v1940_v3 = vld [vmem:[%s5254_s9 + $0x20] sm:$0xff] }
 0x417   :  { %v3075_v6 = vpop.f32.mrf.mxu1  ;;  %v2068_v4 = vld [vmem:[%s5254_s9 + $0x420] sm:$0xff] }
 0x418   :  { %v1728_v7 = vmax.f32 %v1725_v5, 0.0  ;;  %v1937_v5 = vld [vmem:[%s5254_s9 + $0x8] sm:$0xff] }
 0x419   :  { %v2065_v6 = vld [vmem:[%s5254_s9 + $0x408] sm:$0xff] }
 0x41a   :  { %1729 = vst.msk [vmem:[#allocation6] sm:$0x3] %vm1277_vm5, %v1728_v7  ;;  %v1936_v7 = vld [vmem:[%s5254_s9] sm:$0xff] }
 0x421   :  { %v1730_v9 = vld [vmem:[#allocation6] sm:$0x3] }
 0x422   :  { %1731 = vst.msk [vmem:[#allocation7] sm:$0x3] %vm1277_vm5, %v1730_v9  ;;  %v2064_v9 = vld [vmem:[%s5254_s9 + $0x400] sm:$0xff] }
 0x429   :  { %v1732_v12 = vld [vmem:[#allocation7] sm:$0x3] }
 0x42a   :  { %2829 = vmatmul.mubr.msk.f32.vlgmr.msra.gmra.mxu0 %vm75_vm0, %v1732_v12  ;;  %2830 = vmatmul.mubr.msk.f32.vlgmr.msra.gmra.mxu1 %vm75_vm0, %v1732_v12  ;;  %v2060_v12 = vld [vmem:[%s5254_s9 + $0x3e0] sm:$0xff] }
 0x42b   :  { %2215 = vmatpush1.msra.mxu0 %v1996_v10  ;;  %2286 = vmatpush1.msra.mxu1 %v2124_v11  ;;  %v2061_v10 = vld [vmem:[%s5254_s9 + $0x3e8] sm:$0xff] }
 0x42c   :  { %2216 = vmatprep.subr.mxu0 %v1993_v13  ;;  %2287 = vmatprep.subr.mxu1 %v2121_v14  ;;  %v2189_v11 = vld [vmem:[%s5254_s9 + $0x7e8] sm:$0xff]  ;;  %v2188_v13 = vld [vmem:[%s5254_s9 + $0x7e0] sm:$0xff] }
 0x42d   :  { %2217 = vmatpush1.msra.mxu0 %v1992_v15  ;;  %2288 = vmatpush1.msra.mxu1 %v2120_v16  ;;  %v2057_v14 = vld [vmem:[%s5254_s9 + $0x3c8] sm:$0xff]  ;;  %v2056_v16 = vld [vmem:[%s5254_s9 + $0x3c0] sm:$0xff] }
 0x42e   :  { %2218 = vmatprep.subr.mxu0 %v1989_v17  ;;  %2289 = vmatprep.subr.mxu1 %v2117_v18  ;;  %v2185_v15 = vld [vmem:[%s5254_s9 + $0x7c8] sm:$0xff]  ;;  %v2184_v17 = vld [vmem:[%s5254_s9 + $0x7c0] sm:$0xff] }
 0x42f   :  { %2219 = vmatpush1.msra.mxu0 %v1988_v19  ;;  %2290 = vmatpush1.msra.mxu1 %v2116_v20  ;;  %v2053_v18 = vld [vmem:[%s5254_s9 + $0x3a8] sm:$0xff]  ;;  %v2052_v20 = vld [vmem:[%s5254_s9 + $0x3a0] sm:$0xff] }
 0x430   :  { %2220 = vmatprep.subr.mxu0 %v1985_v21  ;;  %2291 = vmatprep.subr.mxu1 %v2113_v22  ;;  %v2181_v19 = vld [vmem:[%s5254_s9 + $0x7a8] sm:$0xff]  ;;  %v2180_v21 = vld [vmem:[%s5254_s9 + $0x7a0] sm:$0xff] }
 0x431   :  { %2221 = vmatpush1.msra.mxu0 %v1984_v23  ;;  %2292 = vmatpush1.msra.mxu1 %v2112_v25  ;;  %v2049_v22 = vld [vmem:[%s5254_s9 + $0x388] sm:$0xff]  ;;  %v2048_v25 = vld [vmem:[%s5254_s9 + $0x380] sm:$0xff] }
 0x432   :  { %2222 = vmatprep.subr.mxu0 %v1981_v26  ;;  %2293 = vmatprep.subr.mxu1 %v2109_v27  ;;  %v2177_v23 = vld [vmem:[%s5254_s9 + $0x788] sm:$0xff]  ;;  %v2176_v26 = vld [vmem:[%s5254_s9 + $0x780] sm:$0xff] }
 0x433   :  { %2223 = vmatpush1.msra.mxu0 %v1980_v24  ;;  %2294 = vmatpush1.msra.mxu1 %v2108_v28  ;;  %v2045_v27 = vld [vmem:[%s5254_s9 + $0x368] sm:$0xff]  ;;  %v2044_v28 = vld [vmem:[%s5254_s9 + $0x360] sm:$0xff] }
 0x434   :  { %2224 = vmatprep.subr.mxu0 %v1977_v29  ;;  %2295 = vmatprep.subr.mxu1 %v2105_v30  ;;  %v2173_v24 = vld [vmem:[%s5254_s9 + $0x768] sm:$0xff]  ;;  %v2172_v29 = vld [vmem:[%s5254_s9 + $0x760] sm:$0xff] }
 0x435   :  { %2225 = vmatpush1.msra.mxu0 %v1976_v31  ;;  %2296 = vmatpush1.msra.mxu1 %v2104_v32  ;;  %v2041_v30 = vld [vmem:[%s5254_s9 + $0x348] sm:$0xff]  ;;  %v2040_v32 = vld [vmem:[%s5254_s9 + $0x340] sm:$0xff] }
 0x436   :  { %2226 = vmatprep.subr.mxu0 %v1973_v33  ;;  %2297 = vmatprep.subr.mxu1 %v2101_v34  ;;  %v2169_v31 = vld [vmem:[%s5254_s9 + $0x748] sm:$0xff]  ;;  %v2168_v33 = vld [vmem:[%s5254_s9 + $0x740] sm:$0xff] }
 0x437   :  { %2227 = vmatpush1.msra.mxu0 %v1972_v35  ;;  %2298 = vmatpush1.msra.mxu1 %v2100_v36  ;;  %v2037_v34 = vld [vmem:[%s5254_s9 + $0x328] sm:$0xff]  ;;  %v2036_v36 = vld [vmem:[%s5254_s9 + $0x320] sm:$0xff] }
 0x438   :  { %2228 = vmatprep.subr.mxu0 %v1969_v37  ;;  %2299 = vmatprep.subr.mxu1 %v2097_v38  ;;  %v2165_v35 = vld [vmem:[%s5254_s9 + $0x728] sm:$0xff]  ;;  %v2164_v37 = vld [vmem:[%s5254_s9 + $0x720] sm:$0xff] }
 0x439   :  { %2229 = vmatpush1.msra.mxu0 %v1968_v39  ;;  %2300 = vmatpush1.msra.mxu1 %v2096_v40  ;;  %v2033_v38 = vld [vmem:[%s5254_s9 + $0x308] sm:$0xff]  ;;  %v2032_v40 = vld [vmem:[%s5254_s9 + $0x300] sm:$0xff] }
 0x43a   :  { %2230 = vmatprep.subr.mxu0 %v1965_v41  ;;  %2301 = vmatprep.subr.mxu1 %v2093_v42  ;;  %v2161_v39 = vld [vmem:[%s5254_s9 + $0x708] sm:$0xff]  ;;  %v2160_v41 = vld [vmem:[%s5254_s9 + $0x700] sm:$0xff] }
 0x43b   :  { %2231 = vmatpush1.msra.mxu0 %v1964_v43  ;;  %2302 = vmatpush1.msra.mxu1 %v2092_v44  ;;  %v2029_v42 = vld [vmem:[%s5254_s9 + $0x2e8] sm:$0xff]  ;;  %v2028_v44 = vld [vmem:[%s5254_s9 + $0x2e0] sm:$0xff] }
 0x43c   :  { %2232 = vmatprep.subr.mxu0 %v1961_v45  ;;  %2303 = vmatprep.subr.mxu1 %v2089_v46  ;;  %v2157_v43 = vld [vmem:[%s5254_s9 + $0x6e8] sm:$0xff]  ;;  %v2156_v45 = vld [vmem:[%s5254_s9 + $0x6e0] sm:$0xff] }
 0x43d   :  { %2233 = vmatpush1.msra.mxu0 %v1960_v47  ;;  %2304 = vmatpush1.msra.mxu1 %v2088_v48  ;;  %v2025_v46 = vld [vmem:[%s5254_s9 + $0x2c8] sm:$0xff]  ;;  %v2024_v48 = vld [vmem:[%s5254_s9 + $0x2c0] sm:$0xff] }
 0x43e   :  { %2234 = vmatprep.subr.mxu0 %v1957_v49  ;;  %2305 = vmatprep.subr.mxu1 %v2085_v50  ;;  %v2153_v47 = vld [vmem:[%s5254_s9 + $0x6c8] sm:$0xff]  ;;  %v2152_v49 = vld [vmem:[%s5254_s9 + $0x6c0] sm:$0xff] }
 0x43f   :  { %2235 = vmatpush1.msra.mxu0 %v1956_v51  ;;  %2306 = vmatpush1.msra.mxu1 %v2084_v52  ;;  %v2021_v50 = vld [vmem:[%s5254_s9 + $0x2a8] sm:$0xff]  ;;  %v2020_v52 = vld [vmem:[%s5254_s9 + $0x2a0] sm:$0xff] }
 0x440   :  { %2236 = vmatprep.subr.mxu0 %v1953_v53  ;;  %2307 = vmatprep.subr.mxu1 %v2081_v54  ;;  %v2149_v51 = vld [vmem:[%s5254_s9 + $0x6a8] sm:$0xff]  ;;  %v2148_v53 = vld [vmem:[%s5254_s9 + $0x6a0] sm:$0xff] }
 0x441   :  { %2237 = vmatpush1.msra.mxu0 %v1952_v55  ;;  %2308 = vmatpush1.msra.mxu1 %v2080_v56  ;;  %v2017_v54 = vld [vmem:[%s5254_s9 + $0x288] sm:$0xff]  ;;  %v2016_v56 = vld [vmem:[%s5254_s9 + $0x280] sm:$0xff] }
 0x442   :  { %2238 = vmatprep.subr.mxu0 %v1949_v57  ;;  %2309 = vmatprep.subr.mxu1 %v2077_v58  ;;  %v2145_v55 = vld [vmem:[%s5254_s9 + $0x688] sm:$0xff]  ;;  %v2144_v57 = vld [vmem:[%s5254_s9 + $0x680] sm:$0xff] }
 0x443   :  { %2239 = vmatpush1.msra.mxu0 %v1948_v59  ;;  %2310 = vmatpush1.msra.mxu1 %v2076_v60  ;;  %v2013_v58 = vld [vmem:[%s5254_s9 + $0x268] sm:$0xff]  ;;  %v2012_v60 = vld [vmem:[%s5254_s9 + $0x260] sm:$0xff] }
 0x444   :  { %2240 = vmatprep.subr.mxu0 %v1945_v61  ;;  %2311 = vmatprep.subr.mxu1 %v2073_v62  ;;  %v2141_v59 = vld [vmem:[%s5254_s9 + $0x668] sm:$0xff]  ;;  %v2140_v61 = vld [vmem:[%s5254_s9 + $0x660] sm:$0xff] }
 0x445   :  { %2241 = vmatpush1.msra.mxu0 %v1944_v63  ;;  %2312 = vmatpush1.msra.mxu1 %v2072_v0  ;;  %v2009_v62 = vld [vmem:[%s5254_s9 + $0x248] sm:$0xff]  ;;  %v2008_v0 = vld [vmem:[%s5254_s9 + $0x240] sm:$0xff] }
 0x446   :  { %2242 = vmatprep.subr.mxu0 %v1941_v1  ;;  %2313 = vmatprep.subr.mxu1 %v2069_v2  ;;  %v2137_v63 = vld [vmem:[%s5254_s9 + $0x648] sm:$0xff]  ;;  %v2136_v1 = vld [vmem:[%s5254_s9 + $0x640] sm:$0xff] }
 0x447   :  { %2243 = vmatpush1.msra.mxu0 %v1940_v3  ;;  %2314 = vmatpush1.msra.mxu1 %v2068_v4  ;;  %v2005_v2 = vld [vmem:[%s5254_s9 + $0x228] sm:$0xff]  ;;  %v2004_v4 = vld [vmem:[%s5254_s9 + $0x220] sm:$0xff] }
 0x448   :  { %2244 = vmatprep.subr.mxu0 %v1937_v5  ;;  %2315 = vmatprep.subr.mxu1 %v2065_v6  ;;  %v2133_v3 = vld [vmem:[%s5254_s9 + $0x628] sm:$0xff]  ;;  %v2132_v5 = vld [vmem:[%s5254_s9 + $0x620] sm:$0xff] }
 0x449   :  { %2245 = vmatpush1.msra.mxu0 %v1936_v7  ;;  %2316 = vmatpush1.msra.mxu1 %v2064_v9  ;;  %v2001_v6 = vld [vmem:[%s5254_s9 + $0x208] sm:$0xff]  ;;  %v2000_v9 = vld [vmem:[%s5254_s9 + $0x200] sm:$0xff] }
 0x44a   :  { %2246 = vmatprep.subr.mxu0 %v2061_v10  ;;  %2317 = vmatprep.subr.mxu1 %v2189_v11  ;;  %v2129_v7 = vld [vmem:[%s5254_s9 + $0x608] sm:$0xff]  ;;  %v2128_v10 = vld [vmem:[%s5254_s9 + $0x600] sm:$0xff]  ;;  %v1999_v11 = vld [vmem:[%s5254_s9 + $0x1f8] sm:$0xff] }
 0x44b   :  { %2247 = vmatpush2.msra.mxu0 %v2060_v12  ;;  %2318 = vmatpush2.msra.mxu1 %v2188_v13  ;;  %v2127_v12 = vld [vmem:[%s5254_s9 + $0x5f8] sm:$0xff]  ;;  %v4438_v13 = vsub.s32 0, %v3906_v8 }
 0x44c   :  { %2248 = vmatprep.subr.mxu0 %v2057_v14  ;;  %2319 = vmatprep.subr.mxu1 %v2185_v15  ;;  %v1777_v14 = vsub.s32 2, %v3906_v8  ;;  %v1765_v15 = vld [vmem:[%s5256_s8] sm:$0xf] }
 0x44d   :  { %2249 = vmatpush2.msra.mxu0 %v2056_v16  ;;  %2320 = vmatpush2.msra.mxu1 %v2184_v17  ;;  %v4445_v16 = vsub.s32 1, %v3906_v8  ;;  %v1781_v17 = vsub.s32 3, %v3906_v8 }
 0x44e   :  { %2250 = vmatprep.subr.mxu0 %v2053_v18  ;;  %2321 = vmatprep.subr.mxu1 %v2181_v19  ;;  %v1770_v18 = vrot.slane %v1765_v15, %v4438_v13  ;;  %v1778_v19 = vrot.slane %v1765_v15, %v1777_v14 }
 0x44f   :  { %2251 = vmatpush2.msra.mxu0 %v2052_v20  ;;  %2322 = vmatpush2.msra.mxu1 %v2180_v21  ;;  %v1774_v20 = vrot.slane %v1765_v15, %v4445_v16  ;;  %v1782_v21 = vrot.slane %v1765_v15, %v1781_v17  ;;  %v1955_v15 = vld [vmem:[%s5254_s9 + $0x98] sm:$0xff] }
 0x450   :  { %2252 = vmatprep.subr.mxu0 %v2049_v22  ;;  %2323 = vmatprep.subr.mxu1 %v2177_v23 }
 0x451   :  { %2253 = vmatpush2.msra.mxu0 %v2048_v25  ;;  %2324 = vmatpush2.msra.mxu1 %v2176_v26 }
 0x452   :  { %2254 = vmatprep.subr.mxu0 %v2045_v27  ;;  %2325 = vmatprep.subr.mxu1 %v2173_v24 }
 0x453   :  { %2255 = vmatpush2.msra.mxu0 %v2044_v28  ;;  %2326 = vmatpush2.msra.mxu1 %v2172_v29 }
 0x454   :  { %2256 = vmatprep.subr.mxu0 %v2041_v30  ;;  %2327 = vmatprep.subr.mxu1 %v2169_v31 }
 0x455   :  { %2257 = vmatpush2.msra.mxu0 %v2040_v32  ;;  %2328 = vmatpush2.msra.mxu1 %v2168_v33 }
 0x456   :  { %2258 = vmatprep.subr.mxu0 %v2037_v34  ;;  %2329 = vmatprep.subr.mxu1 %v2165_v35  ;;  %v1998_v34 = vld [vmem:[%s5254_s9 + $0x1f0] sm:$0xff] }
 0x457   :  { %2259 = vmatpush2.msra.mxu0 %v2036_v36  ;;  %2330 = vmatpush2.msra.mxu1 %v2164_v37  ;;  %v2126_v35 = vld [vmem:[%s5254_s9 + $0x5f0] sm:$0xff]  ;;  %v1995_v36 = vld [vmem:[%s5254_s9 + $0x1d8] sm:$0xff] }
 0x458   :  { %2260 = vmatprep.subr.mxu0 %v2033_v38  ;;  %2331 = vmatprep.subr.mxu1 %v2161_v39  ;;  %v2123_v37 = vld [vmem:[%s5254_s9 + $0x5d8] sm:$0xff]  ;;  %v1994_v38 = vld [vmem:[%s5254_s9 + $0x1d0] sm:$0xff] }
 0x459   :  { %2261 = vmatpush2.msra.mxu0 %v2032_v40  ;;  %2332 = vmatpush2.msra.mxu1 %v2160_v41  ;;  %v2122_v39 = vld [vmem:[%s5254_s9 + $0x5d0] sm:$0xff]  ;;  %v1991_v40 = vld [vmem:[%s5254_s9 + $0x1b8] sm:$0xff] }
 0x45a   :  { %2262 = vmatprep.subr.mxu0 %v2029_v42  ;;  %2333 = vmatprep.subr.mxu1 %v2157_v43  ;;  %v2119_v41 = vld [vmem:[%s5254_s9 + $0x5b8] sm:$0xff]  ;;  %v1990_v42 = vld [vmem:[%s5254_s9 + $0x1b0] sm:$0xff] }
 0x45b   :  { %2263 = vmatpush2.msra.mxu0 %v2028_v44  ;;  %2334 = vmatpush2.msra.mxu1 %v2156_v45  ;;  %v2118_v43 = vld [vmem:[%s5254_s9 + $0x5b0] sm:$0xff]  ;;  %v1987_v44 = vld [vmem:[%s5254_s9 + $0x198] sm:$0xff] }
 0x45c   :  { %2264 = vmatprep.subr.mxu0 %v2025_v46  ;;  %2335 = vmatprep.subr.mxu1 %v2153_v47  ;;  %v2115_v45 = vld [vmem:[%s5254_s9 + $0x598] sm:$0xff]  ;;  %v1986_v46 = vld [vmem:[%s5254_s9 + $0x190] sm:$0xff] }
 0x45d   :  { %2265 = vmatpush2.msra.mxu0 %v2024_v48  ;;  %2336 = vmatpush2.msra.mxu1 %v2152_v49  ;;  %v2114_v47 = vld [vmem:[%s5254_s9 + $0x590] sm:$0xff]  ;;  %v1983_v48 = vld [vmem:[%s5254_s9 + $0x178] sm:$0xff] }
 0x45e   :  { %2266 = vmatprep.subr.mxu0 %v2021_v50  ;;  %2337 = vmatprep.subr.mxu1 %v2149_v51  ;;  %v2111_v49 = vld [vmem:[%s5254_s9 + $0x578] sm:$0xff]  ;;  %v1982_v50 = vld [vmem:[%s5254_s9 + $0x170] sm:$0xff] }
 0x45f   :  { %2267 = vmatpush2.msra.mxu0 %v2020_v52  ;;  %2338 = vmatpush2.msra.mxu1 %v2148_v53  ;;  %v2110_v51 = vld [vmem:[%s5254_s9 + $0x570] sm:$0xff]  ;;  %v1979_v52 = vld [vmem:[%s5254_s9 + $0x158] sm:$0xff] }
 0x460   :  { %2268 = vmatprep.subr.mxu0 %v2017_v54  ;;  %2339 = vmatprep.subr.mxu1 %v2145_v55  ;;  %v2107_v53 = vld [vmem:[%s5254_s9 + $0x558] sm:$0xff]  ;;  %v1978_v54 = vld [vmem:[%s5254_s9 + $0x150] sm:$0xff] }
 0x461   :  { %2269 = vmatpush2.msra.mxu0 %v2016_v56  ;;  %2340 = vmatpush2.msra.mxu1 %v2144_v57  ;;  %v2106_v55 = vld [vmem:[%s5254_s9 + $0x550] sm:$0xff]  ;;  %v1975_v56 = vld [vmem:[%s5254_s9 + $0x138] sm:$0xff] }
 0x462   :  { %2270 = vmatprep.subr.mxu0 %v2013_v58  ;;  %2341 = vmatprep.subr.mxu1 %v2141_v59  ;;  %v2103_v57 = vld [vmem:[%s5254_s9 + $0x538] sm:$0xff]  ;;  %v1974_v58 = vld [vmem:[%s5254_s9 + $0x130] sm:$0xff] }
 0x463   :  { %2271 = vmatpush2.msra.mxu0 %v2012_v60  ;;  %2342 = vmatpush2.msra.mxu1 %v2140_v61  ;;  %v2102_v59 = vld [vmem:[%s5254_s9 + $0x530] sm:$0xff]  ;;  %v1971_v60 = vld [vmem:[%s5254_s9 + $0x118] sm:$0xff] }
 0x464   :  { %2272 = vmatprep.subr.mxu0 %v2009_v62  ;;  %2343 = vmatprep.subr.mxu1 %v2137_v63  ;;  %v2099_v61 = vld [vmem:[%s5254_s9 + $0x518] sm:$0xff]  ;;  %v1970_v62 = vld [vmem:[%s5254_s9 + $0x110] sm:$0xff] }
 0x465   :  { %2273 = vmatpush2.msra.mxu0 %v2008_v0  ;;  %2344 = vmatpush2.msra.mxu1 %v2136_v1  ;;  %v2098_v63 = vld [vmem:[%s5254_s9 + $0x510] sm:$0xff]  ;;  %v1967_v0 = vld [vmem:[%s5254_s9 + $0xf8] sm:$0xff] }
 0x466   :  { %2274 = vmatprep.subr.mxu0 %v2005_v2  ;;  %2345 = vmatprep.subr.mxu1 %v2133_v3  ;;  %v2095_v1 = vld [vmem:[%s5254_s9 + $0x4f8] sm:$0xff]  ;;  %v1966_v2 = vld [vmem:[%s5254_s9 + $0xf0] sm:$0xff] }
 0x467   :  { %2275 = vmatpush2.msra.mxu0 %v2004_v4  ;;  %2346 = vmatpush2.msra.mxu1 %v2132_v5  ;;  %v2094_v3 = vld [vmem:[%s5254_s9 + $0x4f0] sm:$0xff]  ;;  %v1963_v4 = vld [vmem:[%s5254_s9 + $0xd8] sm:$0xff] }
 0x468   :  { %2276 = vmatprep.subr.mxu0 %v2001_v6  ;;  %2347 = vmatprep.subr.mxu1 %v2129_v7  ;;  %v2091_v5 = vld [vmem:[%s5254_s9 + $0x4d8] sm:$0xff]  ;;  %v1962_v6 = vld [vmem:[%s5254_s9 + $0xd0] sm:$0xff] }
 0x469   :  { %2277 = vmatpush2.msra.mxu0 %v2000_v9  ;;  %2348 = vmatpush2.msra.mxu1 %v2128_v10  ;;  %v2090_v7 = vld [vmem:[%s5254_s9 + $0x4d0] sm:$0xff]  ;;  %v1959_v9 = vld [vmem:[%s5254_s9 + $0xb8] sm:$0xff] }
 0x46a   :  { %2356 = vmatprep.subr.mxu0 %v1999_v11  ;;  %2427 = vmatprep.subr.mxu1 %v2127_v12  ;;  %v2087_v10 = vld [vmem:[%s5254_s9 + $0x4b8] sm:$0xff]  ;;  %v1958_v11 = vld [vmem:[%s5254_s9 + $0xb0] sm:$0xff] }
 0x46b   :  { %v2086_v12 = vld [vmem:[%s5254_s9 + $0x4b0] sm:$0xff] }
 0x4ea   :  { %v1856_v22 = vpop.f32.mrf.mxu0  ;;  %v1927_v23 = vpop.f32.mrf.mxu1 }
 0x4eb   :  { %v4454_v25 = vadd.f32 %v1856_v22, %v1770_v18  ;;  %v4456_v26 = vadd.f32 %v1927_v23, %v1778_v19  ;;  %v2083_v18 = vld [vmem:[%s5254_s9 + $0x498] sm:$0xff]  ;;  %v1954_v19 = vld [vmem:[%s5254_s9 + $0x90] sm:$0xff] }
 0x4ec   :  { %v1858_v27 = vpop.f32.mrf.mxu0  ;;  %v1929_v24 = vpop.f32.mrf.mxu1  ;;  %v2079_v22 = vld [vmem:[%s5254_s9 + $0x478] sm:$0xff]  ;;  %v1950_v23 = vld [vmem:[%s5254_s9 + $0x70] sm:$0xff] }
 0x4ed   :  { %v1859_v28 = vadd.f32 %v1858_v27, %v1774_v20  ;;  %v1930_v29 = vadd.f32 %v1929_v24, %v1782_v21  ;;  %v1932_v32 = vmax.f32 %v4454_v25, 0.0  ;;  %v1934_v33 = vmax.f32 %v4456_v26, 0.0  ;;  %v2082_v20 = vld [vmem:[%s5254_s9 + $0x490] sm:$0xff]  ;;  %v1951_v21 = vld [vmem:[%s5254_s9 + $0x78] sm:$0xff]  ;;  %v2527_v26 = vld [vmem:[%s5257_s11 + $0xc8] sm:$0xff] }
 0x4ee   :  { %v2078_v27 = vld [vmem:[%s5254_s9 + $0x470] sm:$0xff]  ;;  %v1947_v24 = vld [vmem:[%s5254_s9 + $0x58] sm:$0xff] }
 0x4ef   :  { %v1933_v30 = vmax.f32 %v1859_v28, 0.0  ;;  %v1935_v31 = vmax.f32 %v1930_v29, 0.0  ;;  %v2075_v28 = vld [vmem:[%s5254_s9 + $0x458] sm:$0xff]  ;;  %v1946_v29 = vld [vmem:[%s5254_s9 + $0x50] sm:$0xff] }
 0x4f0   :  { %v2528_v25 = vld [vmem:[%s5257_s11 + $0xd0] sm:$0xff] }
 0x4f1   :  { %2278 = vmatprep.mubr.f32.mxu0 %v1933_v30  ;;  %2349 = vmatprep.mubr.f32.mxu1 %v1935_v31 }
 0x4f2   :  { %2279 = vmatmul.mubr.f32.vlgmr.msra.gmra.mxu0 %v1932_v32  ;;  %2350 = vmatmul.mubr.f32.vlgmr.msra.gmra.mxu1 %v1934_v33 }
 0x4f3   :  { %2357 = vmatpush1.msra.mxu0 %v1998_v34  ;;  %2428 = vmatpush1.msra.mxu1 %v2126_v35  ;;  %v2071_v34 = vld [vmem:[%s5254_s9 + $0x438] sm:$0xff]  ;;  %v1942_v35 = vld [vmem:[%s5254_s9 + $0x30] sm:$0xff] }
 0x4f4   :  { %2358 = vmatprep.subr.mxu0 %v1995_v36  ;;  %2420 = vmatprep.mubr.f32.mxu0 %v1933_v30  ;;  %v2074_v30 = vld [vmem:[%s5254_s9 + $0x450] sm:$0xff] }
 0x4f5   :  { %2429 = vmatprep.subr.mxu1 %v2123_v37  ;;  %2491 = vmatprep.mubr.f32.mxu1 %v1935_v31  ;;  %v1943_v31 = vld [vmem:[%s5254_s9 + $0x38] sm:$0xff]  ;;  %v2070_v36 = vld [vmem:[%s5254_s9 + $0x430] sm:$0xff] }
 0x4f6   :  { %2359 = vmatpush1.msra.mxu0 %v1994_v38  ;;  %2430 = vmatpush1.msra.mxu1 %v2122_v39  ;;  %v1939_v37 = vld [vmem:[%s5254_s9 + $0x18] sm:$0xff]  ;;  %v1938_v39 = vld [vmem:[%s5254_s9 + $0x10] sm:$0xff] }
 0x4f7   :  { %2360 = vmatprep.subr.mxu0 %v1991_v40  ;;  %2431 = vmatprep.subr.mxu1 %v2119_v41  ;;  %v2067_v38 = vld [vmem:[%s5254_s9 + $0x418] sm:$0xff]  ;;  %v2066_v40 = vld [vmem:[%s5254_s9 + $0x410] sm:$0xff] }
 0x4f8   :  { %2361 = vmatpush1.msra.mxu0 %v1990_v42  ;;  %2432 = vmatpush1.msra.mxu1 %v2118_v43  ;;  %v2063_v41 = vld [vmem:[%s5254_s9 + $0x3f8] sm:$0xff]  ;;  %v2062_v43 = vld [vmem:[%s5254_s9 + $0x3f0] sm:$0xff] }
 0x4f9   :  { %2362 = vmatprep.subr.mxu0 %v1987_v44  ;;  %2433 = vmatprep.subr.mxu1 %v2115_v45  ;;  %v2191_v42 = vld [vmem:[%s5254_s9 + $0x7f8] sm:$0xff]  ;;  %v2190_v44 = vld [vmem:[%s5254_s9 + $0x7f0] sm:$0xff] }
 0x4fa   :  { %2363 = vmatpush1.msra.mxu0 %v1986_v46  ;;  %2434 = vmatpush1.msra.mxu1 %v2114_v47  ;;  %v2059_v45 = vld [vmem:[%s5254_s9 + $0x3d8] sm:$0xff]  ;;  %v2058_v47 = vld [vmem:[%s5254_s9 + $0x3d0] sm:$0xff] }
 0x4fb   :  { %2364 = vmatprep.subr.mxu0 %v1983_v48  ;;  %2435 = vmatprep.subr.mxu1 %v2111_v49  ;;  %v2187_v46 = vld [vmem:[%s5254_s9 + $0x7d8] sm:$0xff]  ;;  %v2186_v48 = vld [vmem:[%s5254_s9 + $0x7d0] sm:$0xff] }
 0x4fc   :  { %2365 = vmatpush1.msra.mxu0 %v1982_v50  ;;  %2436 = vmatpush1.msra.mxu1 %v2110_v51  ;;  %v2055_v49 = vld [vmem:[%s5254_s9 + $0x3b8] sm:$0xff]  ;;  %v2054_v51 = vld [vmem:[%s5254_s9 + $0x3b0] sm:$0xff] }
 0x4fd   :  { %2366 = vmatprep.subr.mxu0 %v1979_v52  ;;  %2437 = vmatprep.subr.mxu1 %v2107_v53  ;;  %v2183_v50 = vld [vmem:[%s5254_s9 + $0x7b8] sm:$0xff]  ;;  %v2182_v52 = vld [vmem:[%s5254_s9 + $0x7b0] sm:$0xff] }
 0x4fe   :  { %2367 = vmatpush1.msra.mxu0 %v1978_v54  ;;  %2438 = vmatpush1.msra.mxu1 %v2106_v55  ;;  %v2051_v53 = vld [vmem:[%s5254_s9 + $0x398] sm:$0xff]  ;;  %v2050_v55 = vld [vmem:[%s5254_s9 + $0x390] sm:$0xff] }
 0x4ff   :  { %2368 = vmatprep.subr.mxu0 %v1975_v56  ;;  %2439 = vmatprep.subr.mxu1 %v2103_v57  ;;  %v2179_v54 = vld [vmem:[%s5254_s9 + $0x798] sm:$0xff]  ;;  %v2178_v56 = vld [vmem:[%s5254_s9 + $0x790] sm:$0xff] }
 0x500   :  { %2369 = vmatpush1.msra.mxu0 %v1974_v58  ;;  %2440 = vmatpush1.msra.mxu1 %v2102_v59  ;;  %v2047_v57 = vld [vmem:[%s5254_s9 + $0x378] sm:$0xff]  ;;  %v2046_v59 = vld [vmem:[%s5254_s9 + $0x370] sm:$0xff] }
 0x501   :  { %2370 = vmatprep.subr.mxu0 %v1971_v60  ;;  %2441 = vmatprep.subr.mxu1 %v2099_v61  ;;  %v2175_v58 = vld [vmem:[%s5254_s9 + $0x778] sm:$0xff]  ;;  %v2174_v60 = vld [vmem:[%s5254_s9 + $0x770] sm:$0xff] }
 0x502   :  { %2371 = vmatpush1.msra.mxu0 %v1970_v62  ;;  %2442 = vmatpush1.msra.mxu1 %v2098_v63  ;;  %v2043_v61 = vld [vmem:[%s5254_s9 + $0x358] sm:$0xff]  ;;  %v2042_v63 = vld [vmem:[%s5254_s9 + $0x350] sm:$0xff] }
 0x503   :  { %2372 = vmatprep.subr.mxu0 %v1967_v0  ;;  %2443 = vmatprep.subr.mxu1 %v2095_v1  ;;  %v2171_v62 = vld [vmem:[%s5254_s9 + $0x758] sm:$0xff]  ;;  %v2170_v0 = vld [vmem:[%s5254_s9 + $0x750] sm:$0xff] }
 0x504   :  { %2373 = vmatpush1.msra.mxu0 %v1966_v2  ;;  %2444 = vmatpush1.msra.mxu1 %v2094_v3  ;;  %v2039_v1 = vld [vmem:[%s5254_s9 + $0x338] sm:$0xff]  ;;  %v2038_v3 = vld [vmem:[%s5254_s9 + $0x330] sm:$0xff] }
 0x505   :  { %2374 = vmatprep.subr.mxu0 %v1963_v4  ;;  %2445 = vmatprep.subr.mxu1 %v2091_v5  ;;  %v2167_v2 = vld [vmem:[%s5254_s9 + $0x738] sm:$0xff]  ;;  %v2166_v4 = vld [vmem:[%s5254_s9 + $0x730] sm:$0xff] }
 0x506   :  { %2375 = vmatpush1.msra.mxu0 %v1962_v6  ;;  %2446 = vmatpush1.msra.mxu1 %v2090_v7  ;;  %v2035_v5 = vld [vmem:[%s5254_s9 + $0x318] sm:$0xff]  ;;  %v2034_v7 = vld [vmem:[%s5254_s9 + $0x310] sm:$0xff] }
 0x507   :  { %2376 = vmatprep.subr.mxu0 %v1959_v9  ;;  %2447 = vmatprep.subr.mxu1 %v2087_v10  ;;  %v2163_v6 = vld [vmem:[%s5254_s9 + $0x718] sm:$0xff]  ;;  %v2162_v9 = vld [vmem:[%s5254_s9 + $0x710] sm:$0xff] }
 0x508   :  { %2377 = vmatpush1.msra.mxu0 %v1958_v11  ;;  %2448 = vmatpush1.msra.mxu1 %v2086_v12  ;;  %v2031_v10 = vld [vmem:[%s5254_s9 + $0x2f8] sm:$0xff]  ;;  %v2030_v12 = vld [vmem:[%s5254_s9 + $0x2f0] sm:$0xff] }
 0x509   :  { %2378 = vmatprep.subr.mxu0 %v1955_v15  ;;  %2449 = vmatprep.subr.mxu1 %v2083_v18  ;;  %v2159_v11 = vld [vmem:[%s5254_s9 + $0x6f8] sm:$0xff]  ;;  %v2158_v15 = vld [vmem:[%s5254_s9 + $0x6f0] sm:$0xff] }
 0x50a   :  { %2379 = vmatpush1.msra.mxu0 %v1954_v19  ;;  %2450 = vmatpush1.msra.mxu1 %v2082_v20  ;;  %v2027_v18 = vld [vmem:[%s5254_s9 + $0x2d8] sm:$0xff]  ;;  %v2026_v20 = vld [vmem:[%s5254_s9 + $0x2d0] sm:$0xff] }
 0x50b   :  { %2380 = vmatprep.subr.mxu0 %v1951_v21  ;;  %2451 = vmatprep.subr.mxu1 %v2079_v22  ;;  %v2155_v19 = vld [vmem:[%s5254_s9 + $0x6d8] sm:$0xff]  ;;  %v2154_v21 = vld [vmem:[%s5254_s9 + $0x6d0] sm:$0xff] }
 0x50c   :  { %2381 = vmatpush1.msra.mxu0 %v1950_v23  ;;  %2452 = vmatpush1.msra.mxu1 %v2078_v27  ;;  %v2023_v22 = vld [vmem:[%s5254_s9 + $0x2b8] sm:$0xff]  ;;  %v2022_v27 = vld [vmem:[%s5254_s9 + $0x2b0] sm:$0xff] }
 0x50d   :  { %2382 = vmatprep.subr.mxu0 %v1947_v24  ;;  %2453 = vmatprep.subr.mxu1 %v2075_v28  ;;  %v2151_v23 = vld [vmem:[%s5254_s9 + $0x6b8] sm:$0xff]  ;;  %v2150_v24 = vld [vmem:[%s5254_s9 + $0x6b0] sm:$0xff] }
 0x50e   :  { %2383 = vmatpush1.msra.mxu0 %v1946_v29  ;;  %2454 = vmatpush1.msra.mxu1 %v2074_v30  ;;  %v2019_v28 = vld [vmem:[%s5254_s9 + $0x298] sm:$0xff]  ;;  %v2018_v30 = vld [vmem:[%s5254_s9 + $0x290] sm:$0xff] }
 0x50f   :  { %2384 = vmatprep.subr.mxu0 %v1943_v31  ;;  %2455 = vmatprep.subr.mxu1 %v2071_v34  ;;  %v2147_v29 = vld [vmem:[%s5254_s9 + $0x698] sm:$0xff]  ;;  %v2146_v31 = vld [vmem:[%s5254_s9 + $0x690] sm:$0xff] }
 0x510   :  { %2385 = vmatpush1.msra.mxu0 %v1942_v35  ;;  %2456 = vmatpush1.msra.mxu1 %v2070_v36  ;;  %v2015_v34 = vld [vmem:[%s5254_s9 + $0x278] sm:$0xff]  ;;  %v2014_v36 = vld [vmem:[%s5254_s9 + $0x270] sm:$0xff] }
 0x511   :  { %2386 = vmatprep.subr.mxu0 %v1939_v37  ;;  %2457 = vmatprep.subr.mxu1 %v2067_v38  ;;  %v2143_v35 = vld [vmem:[%s5254_s9 + $0x678] sm:$0xff]  ;;  %v2142_v37 = vld [vmem:[%s5254_s9 + $0x670] sm:$0xff] }
 0x512   :  { %2387 = vmatpush1.msra.mxu0 %v1938_v39  ;;  %2458 = vmatpush1.msra.mxu1 %v2066_v40  ;;  %v2011_v38 = vld [vmem:[%s5254_s9 + $0x258] sm:$0xff]  ;;  %v2010_v40 = vld [vmem:[%s5254_s9 + $0x250] sm:$0xff] }
 0x513   :  { %2388 = vmatprep.subr.mxu0 %v2063_v41  ;;  %2459 = vmatprep.subr.mxu1 %v2191_v42  ;;  %v2139_v39 = vld [vmem:[%s5254_s9 + $0x658] sm:$0xff]  ;;  %v2138_v41 = vld [vmem:[%s5254_s9 + $0x650] sm:$0xff] }
 0x514   :  { %2389 = vmatpush2.msra.mxu0 %v2062_v43  ;;  %2460 = vmatpush2.msra.mxu1 %v2190_v44  ;;  %v2007_v42 = vld [vmem:[%s5254_s9 + $0x238] sm:$0xff]  ;;  %v2006_v44 = vld [vmem:[%s5254_s9 + $0x230] sm:$0xff] }
 0x515   :  { %2390 = vmatprep.subr.mxu0 %v2059_v45  ;;  %2461 = vmatprep.subr.mxu1 %v2187_v46  ;;  %v2135_v43 = vld [vmem:[%s5254_s9 + $0x638] sm:$0xff]  ;;  %v2134_v45 = vld [vmem:[%s5254_s9 + $0x630] sm:$0xff] }
 0x516   :  { %2391 = vmatpush2.msra.mxu0 %v2058_v47  ;;  %2462 = vmatpush2.msra.mxu1 %v2186_v48  ;;  %v2003_v46 = vld [vmem:[%s5254_s9 + $0x218] sm:$0xff]  ;;  %v2002_v48 = vld [vmem:[%s5254_s9 + $0x210] sm:$0xff] }
 0x517   :  { %2392 = vmatprep.subr.mxu0 %v2055_v49  ;;  %2463 = vmatprep.subr.mxu1 %v2183_v50  ;;  %v2131_v47 = vld [vmem:[%s5254_s9 + $0x618] sm:$0xff]  ;;  %v2130_v49 = vld [vmem:[%s5254_s9 + $0x610] sm:$0xff] }
 0x518   :  { %2393 = vmatpush2.msra.mxu0 %v2054_v51  ;;  %2464 = vmatpush2.msra.mxu1 %v2182_v52  ;;  %v2533_v50 = vld [vmem:[%s5257_s11 + $0xf8] sm:$0xff]  ;;  %v2532_v51 = vld [vmem:[%s5257_s11 + $0xf0] sm:$0xff]  ;;  %v2531_v52 = vld [vmem:[%s5257_s11 + $0xe8] sm:$0xff] }
 0x519   :  { %2394 = vmatprep.subr.mxu0 %v2051_v53  ;;  %2465 = vmatprep.subr.mxu1 %v2179_v54  ;;  %v2530_v53 = vld [vmem:[%s5257_s11 + $0xe0] sm:$0xff]  ;;  %v2529_v54 = vld [vmem:[%s5257_s11 + $0xd8] sm:$0xff] }
 0x51a   :  { %2395 = vmatpush2.msra.mxu0 %v2050_v55  ;;  %2466 = vmatpush2.msra.mxu1 %v2178_v56  ;;  %v2524_v55 = vld [vmem:[%s5257_s11 + $0xb0] sm:$0xff]  ;;  %v2523_v56 = vld [vmem:[%s5257_s11 + $0xa8] sm:$0xff] }
 0x51b   :  { %2396 = vmatprep.subr.mxu0 %v2047_v57  ;;  %2467 = vmatprep.subr.mxu1 %v2175_v58  ;;  %v2522_v57 = vld [vmem:[%s5257_s11 + $0xa0] sm:$0xff]  ;;  %v2597_v58 = vld [vmem:[%s5257_s11 + $0x2f8] sm:$0xff] }
 0x51c   :  { %2397 = vmatpush2.msra.mxu0 %v2046_v59  ;;  %2468 = vmatpush2.msra.mxu1 %v2174_v60  ;;  %v2596_v59 = vld [vmem:[%s5257_s11 + $0x2f0] sm:$0xff]  ;;  %v2595_v60 = vld [vmem:[%s5257_s11 + $0x2e8] sm:$0xff] }
 0x51d   :  { %2398 = vmatprep.subr.mxu0 %v2043_v61  ;;  %2469 = vmatprep.subr.mxu1 %v2171_v62  ;;  %v2594_v61 = vld [vmem:[%s5257_s11 + $0x2e0] sm:$0xff]  ;;  %v2521_v62 = vld [vmem:[%s5257_s11 + $0x98] sm:$0xff] }
 0x51e   :  { %2399 = vmatpush2.msra.mxu0 %v2042_v63  ;;  %2470 = vmatpush2.msra.mxu1 %v2170_v0  ;;  %v2593_v63 = vld [vmem:[%s5257_s11 + $0x2d8] sm:$0xff]  ;;  %v2520_v0 = vld [vmem:[%s5257_s11 + $0x90] sm:$0xff] }
 0x51f   :  { %2400 = vmatprep.subr.mxu0 %v2039_v1  ;;  %2471 = vmatprep.subr.mxu1 %v2167_v2  ;;  %v2592_v1 = vld [vmem:[%s5257_s11 + $0x2d0] sm:$0xff]  ;;  %v2519_v2 = vld [vmem:[%s5257_s11 + $0x88] sm:$0xff] }
 0x520   :  { %2401 = vmatpush2.msra.mxu0 %v2038_v3  ;;  %2472 = vmatpush2.msra.mxu1 %v2166_v4  ;;  %v2591_v3 = vld [vmem:[%s5257_s11 + $0x2c8] sm:$0xff]  ;;  %v2518_v4 = vld [vmem:[%s5257_s11 + $0x80] sm:$0xff] }
 0x521   :  { %2402 = vmatprep.subr.mxu0 %v2035_v5  ;;  %2473 = vmatprep.subr.mxu1 %v2163_v6  ;;  %v2590_v5 = vld [vmem:[%s5257_s11 + $0x2c0] sm:$0xff]  ;;  %v2517_v6 = vld [vmem:[%s5257_s11 + $0x78] sm:$0xff] }
 0x522   :  { %2403 = vmatpush2.msra.mxu0 %v2034_v7  ;;  %2474 = vmatpush2.msra.mxu1 %v2162_v9  ;;  %v2589_v7 = vld [vmem:[%s5257_s11 + $0x2b8] sm:$0xff]  ;;  %v2516_v9 = vld [vmem:[%s5257_s11 + $0x70] sm:$0xff] }
 0x523   :  { %2404 = vmatprep.subr.mxu0 %v2031_v10  ;;  %2475 = vmatprep.subr.mxu1 %v2159_v11  ;;  %v2588_v10 = vld [vmem:[%s5257_s11 + $0x2b0] sm:$0xff]  ;;  %v2515_v11 = vld [vmem:[%s5257_s11 + $0x68] sm:$0xff] }
 0x524   :  { %2405 = vmatpush2.msra.mxu0 %v2030_v12  ;;  %2476 = vmatpush2.msra.mxu1 %v2158_v15  ;;  %v2587_v12 = vld [vmem:[%s5257_s11 + $0x2a8] sm:$0xff]  ;;  %v2514_v15 = vld [vmem:[%s5257_s11 + $0x60] sm:$0xff] }
 0x525   :  { %2406 = vmatprep.subr.mxu0 %v2027_v18  ;;  %2477 = vmatprep.subr.mxu1 %v2155_v19  ;;  %v2586_v18 = vld [vmem:[%s5257_s11 + $0x2a0] sm:$0xff]  ;;  %v2513_v19 = vld [vmem:[%s5257_s11 + $0x58] sm:$0xff] }
 0x526   :  { %2407 = vmatpush2.msra.mxu0 %v2026_v20  ;;  %2478 = vmatpush2.msra.mxu1 %v2154_v21  ;;  %v2585_v20 = vld [vmem:[%s5257_s11 + $0x298] sm:$0xff]  ;;  %v2512_v21 = vld [vmem:[%s5257_s11 + $0x50] sm:$0xff] }
 0x527   :  { %2408 = vmatprep.subr.mxu0 %v2023_v22  ;;  %2479 = vmatprep.subr.mxu1 %v2151_v23  ;;  %v2584_v22 = vld [vmem:[%s5257_s11 + $0x290] sm:$0xff]  ;;  %v2511_v23 = vld [vmem:[%s5257_s11 + $0x48] sm:$0xff] }
 0x528   :  { %2409 = vmatpush2.msra.mxu0 %v2022_v27  ;;  %2480 = vmatpush2.msra.mxu1 %v2150_v24  ;;  %v2583_v27 = vld [vmem:[%s5257_s11 + $0x288] sm:$0xff]  ;;  %v2510_v24 = vld [vmem:[%s5257_s11 + $0x40] sm:$0xff] }
 0x529   :  { %2410 = vmatprep.subr.mxu0 %v2019_v28  ;;  %2481 = vmatprep.subr.mxu1 %v2147_v29  ;;  %v2582_v28 = vld [vmem:[%s5257_s11 + $0x280] sm:$0xff]  ;;  %v2509_v29 = vld [vmem:[%s5257_s11 + $0x38] sm:$0xff] }
 0x52a   :  { %2411 = vmatpush2.msra.mxu0 %v2018_v30  ;;  %2482 = vmatpush2.msra.mxu1 %v2146_v31  ;;  %v2581_v30 = vld [vmem:[%s5257_s11 + $0x278] sm:$0xff]  ;;  %v2508_v31 = vld [vmem:[%s5257_s11 + $0x30] sm:$0xff] }
 0x52b   :  { %2412 = vmatprep.subr.mxu0 %v2015_v34  ;;  %2483 = vmatprep.subr.mxu1 %v2143_v35  ;;  %v2580_v34 = vld [vmem:[%s5257_s11 + $0x270] sm:$0xff]  ;;  %v2507_v35 = vld [vmem:[%s5257_s11 + $0x28] sm:$0xff] }
 0x52c   :  { %2413 = vmatpush2.msra.mxu0 %v2014_v36  ;;  %2484 = vmatpush2.msra.mxu1 %v2142_v37  ;;  %v2579_v36 = vld [vmem:[%s5257_s11 + $0x268] sm:$0xff]  ;;  %v2506_v37 = vld [vmem:[%s5257_s11 + $0x20] sm:$0xff] }
 0x52d   :  { %2414 = vmatprep.subr.mxu0 %v2011_v38  ;;  %2485 = vmatprep.subr.mxu1 %v2139_v39  ;;  %v2578_v38 = vld [vmem:[%s5257_s11 + $0x260] sm:$0xff]  ;;  %v2505_v39 = vld [vmem:[%s5257_s11 + $0x18] sm:$0xff] }
 0x52e   :  { %2415 = vmatpush2.msra.mxu0 %v2010_v40  ;;  %2486 = vmatpush2.msra.mxu1 %v2138_v41  ;;  %v2577_v40 = vld [vmem:[%s5257_s11 + $0x258] sm:$0xff]  ;;  %v2504_v41 = vld [vmem:[%s5257_s11 + $0x10] sm:$0xff] }
 0x52f   :  { %2416 = vmatprep.subr.mxu0 %v2007_v42  ;;  %2487 = vmatprep.subr.mxu1 %v2135_v43  ;;  %v2576_v42 = vld [vmem:[%s5257_s11 + $0x250] sm:$0xff]  ;;  %v2503_v43 = vld [vmem:[%s5257_s11 + $0x8] sm:$0xff] }
 0x530   :  { %2417 = vmatpush2.msra.mxu0 %v2006_v44  ;;  %2488 = vmatpush2.msra.mxu1 %v2134_v45  ;;  %v2575_v44 = vld [vmem:[%s5257_s11 + $0x248] sm:$0xff]  ;;  %v2502_v45 = vld [vmem:[%s5257_s11] sm:$0xff] }
 0x531   :  { %2418 = vmatprep.subr.mxu0 %v2003_v46  ;;  %2489 = vmatprep.subr.mxu1 %v2131_v47  ;;  %v2574_v46 = vld [vmem:[%s5257_s11 + $0x240] sm:$0xff]  ;;  %v2565_v47 = vld [vmem:[%s5257_s11 + $0x1f8] sm:$0xff] }
 0x532   :  { %2419 = vmatpush2.msra.mxu0 %v2002_v48  ;;  %2490 = vmatpush2.msra.mxu1 %v2130_v49  ;;  %v2573_v48 = vld [vmem:[%s5257_s11 + $0x238] sm:$0xff]  ;;  %v2564_v49 = vld [vmem:[%s5257_s11 + $0x1f0] sm:$0xff] }
 0x533   :  { %2421 = vmatmul.mubr.f32.vlgmr.msra.gmra.mxu0 %v1932_v32  ;;  %2492 = vmatmul.mubr.f32.vlgmr.msra.gmra.mxu1 %v1934_v33  ;;  %v2526_v32 = vld [vmem:[%s5257_s11 + $0xc0] sm:$0xff]  ;;  %v2525_v33 = vld [vmem:[%s5257_s11 + $0xb8] sm:$0xff] }
 0x534   :  { %2642 = vmatprep.subr.mxu0 %v2533_v50  ;;  %2713 = vmatprep.subr.mxu1 %v2597_v58  ;;  %v2572_v50 = vld [vmem:[%s5257_s11 + $0x230] sm:$0xff]  ;;  %v2566_v58 = vld [vmem:[%s5257_s11 + $0x200] sm:$0xff] }
 0x535   :  { %2643 = vmatpush1.msra.mxu0 %v2532_v51  ;;  %2714 = vmatpush1.msra.mxu1 %v2596_v59  ;;  %v2563_v51 = vld [vmem:[%s5257_s11 + $0x1e8] sm:$0xff]  ;;  %v2557_v59 = vld [vmem:[%s5257_s11 + $0x1b8] sm:$0xff] }
 0x536   :  { %2644 = vmatprep.subr.mxu0 %v2531_v52  ;;  %2715 = vmatprep.subr.mxu1 %v2595_v60  ;;  %v2571_v52 = vld [vmem:[%s5257_s11 + $0x228] sm:$0xff]  ;;  %v2629_v60 = vld [vmem:[%s5257_s11 + $0x3f8] sm:$0xff] }
 0x537   :  { %2645 = vmatpush1.msra.mxu0 %v2530_v53  ;;  %2716 = vmatpush1.msra.mxu1 %v2594_v61  ;;  %v2562_v53 = vld [vmem:[%s5257_s11 + $0x1e0] sm:$0xff]  ;;  %v2556_v61 = vld [vmem:[%s5257_s11 + $0x1b0] sm:$0xff] }
 0x538   :  { %2646 = vmatprep.subr.mxu0 %v2529_v54  ;;  %2717 = vmatprep.subr.mxu1 %v2593_v63  ;;  %v2570_v54 = vld [vmem:[%s5257_s11 + $0x220] sm:$0xff]  ;;  %v2555_v63 = vld [vmem:[%s5257_s11 + $0x1a8] sm:$0xff] }
 0x539   :  { %2647 = vmatpush1.msra.mxu0 %v2528_v25  ;;  %2718 = vmatpush1.msra.mxu1 %v2592_v1  ;;  %v2561_v25 = vld [vmem:[%s5257_s11 + $0x1d8] sm:$0xff]  ;;  %v2554_v1 = vld [vmem:[%s5257_s11 + $0x1a0] sm:$0xff] }
 0x53a   :  { %2648 = vmatprep.subr.mxu0 %v2527_v26  ;;  %2719 = vmatprep.subr.mxu1 %v2591_v3  ;;  %v2569_v26 = vld [vmem:[%s5257_s11 + $0x218] sm:$0xff] }
 0x53b   :  { %2649 = vmatpush1.msra.mxu0 %v2526_v32  ;;  %2720 = vmatpush1.msra.mxu1 %v2590_v5  ;;  %v2560_v32 = vld [vmem:[%s5257_s11 + $0x1d0] sm:$0xff]  ;;  %v2553_v3 = vld [vmem:[%s5257_s11 + $0x198] sm:$0xff] }
 0x53c   :  { %2650 = vmatprep.subr.mxu0 %v2525_v33  ;;  %2721 = vmatprep.subr.mxu1 %v2589_v7  ;;  %v2568_v33 = vld [vmem:[%s5257_s11 + $0x210] sm:$0xff]  ;;  %v2551_v7 = vld [vmem:[%s5257_s11 + $0x188] sm:$0xff] }
 0x53d   :  { %2651 = vmatpush1.msra.mxu0 %v2524_v55  ;;  %2722 = vmatpush1.msra.mxu1 %v2588_v10  ;;  %v2559_v55 = vld [vmem:[%s5257_s11 + $0x1c8] sm:$0xff]  ;;  %v2552_v5 = vld [vmem:[%s5257_s11 + $0x190] sm:$0xff]  ;;  %v2550_v10 = vld [vmem:[%s5257_s11 + $0x180] sm:$0xff] }
 0x53e   :  { %2652 = vmatprep.subr.mxu0 %v2523_v56  ;;  %2723 = vmatprep.subr.mxu1 %v2587_v12  ;;  %v2567_v56 = vld [vmem:[%s5257_s11 + $0x208] sm:$0xff]  ;;  %v2549_v12 = vld [vmem:[%s5257_s11 + $0x178] sm:$0xff] }
 0x53f   :  { %2653 = vmatpush1.msra.mxu0 %v2522_v57  ;;  %2724 = vmatpush1.msra.mxu1 %v2586_v18  ;;  %v2558_v57 = vld [vmem:[%s5257_s11 + $0x1c0] sm:$0xff]  ;;  %v2548_v18 = vld [vmem:[%s5257_s11 + $0x170] sm:$0xff] }
 0x540   :  { %2654 = vmatprep.subr.mxu0 %v2521_v62  ;;  %2725 = vmatprep.subr.mxu1 %v2585_v20  ;;  %v2628_v62 = vld [vmem:[%s5257_s11 + $0x3f0] sm:$0xff]  ;;  %v2547_v20 = vld [vmem:[%s5257_s11 + $0x168] sm:$0xff] }
 0x541   :  { %2655 = vmatpush1.msra.mxu0 %v2520_v0  ;;  %2726 = vmatpush1.msra.mxu1 %v2584_v22  ;;  %v2627_v0 = vld [vmem:[%s5257_s11 + $0x3e8] sm:$0xff]  ;;  %v2546_v22 = vld [vmem:[%s5257_s11 + $0x160] sm:$0xff] }
 0x542   :  { %2656 = vmatprep.subr.mxu0 %v2519_v2  ;;  %2727 = vmatprep.subr.mxu1 %v2583_v27  ;;  %v2626_v2 = vld [vmem:[%s5257_s11 + $0x3e0] sm:$0xff]  ;;  %v2545_v27 = vld [vmem:[%s5257_s11 + $0x158] sm:$0xff] }
 0x543   :  { %2657 = vmatpush1.msra.mxu0 %v2518_v4  ;;  %2728 = vmatpush1.msra.mxu1 %v2582_v28  ;;  %v2625_v4 = vld [vmem:[%s5257_s11 + $0x3d8] sm:$0xff]  ;;  %v2544_v28 = vld [vmem:[%s5257_s11 + $0x150] sm:$0xff] }
 0x544   :  { %2658 = vmatprep.subr.mxu0 %v2517_v6  ;;  %2729 = vmatprep.subr.mxu1 %v2581_v30  ;;  %v2624_v6 = vld [vmem:[%s5257_s11 + $0x3d0] sm:$0xff]  ;;  %v2543_v30 = vld [vmem:[%s5257_s11 + $0x148] sm:$0xff] }
 0x545   :  { %2659 = vmatpush1.msra.mxu0 %v2516_v9  ;;  %2730 = vmatpush1.msra.mxu1 %v2580_v34  ;;  %v2623_v9 = vld [vmem:[%s5257_s11 + $0x3c8] sm:$0xff]  ;;  %v2542_v34 = vld [vmem:[%s5257_s11 + $0x140] sm:$0xff] }
 0x546   :  { %2660 = vmatprep.subr.mxu0 %v2515_v11  ;;  %2731 = vmatprep.subr.mxu1 %v2579_v36  ;;  %v2622_v11 = vld [vmem:[%s5257_s11 + $0x3c0] sm:$0xff]  ;;  %v2541_v36 = vld [vmem:[%s5257_s11 + $0x138] sm:$0xff] }
 0x547   :  { %2661 = vmatpush1.msra.mxu0 %v2514_v15  ;;  %2732 = vmatpush1.msra.mxu1 %v2578_v38  ;;  %v2621_v15 = vld [vmem:[%s5257_s11 + $0x3b8] sm:$0xff]  ;;  %v2540_v38 = vld [vmem:[%s5257_s11 + $0x130] sm:$0xff] }
 0x548   :  { %2662 = vmatprep.subr.mxu0 %v2513_v19  ;;  %2733 = vmatprep.subr.mxu1 %v2577_v40  ;;  %v2620_v19 = vld [vmem:[%s5257_s11 + $0x3b0] sm:$0xff]  ;;  %v2539_v40 = vld [vmem:[%s5257_s11 + $0x128] sm:$0xff] }
 0x549   :  { %2663 = vmatpush1.msra.mxu0 %v2512_v21  ;;  %2734 = vmatpush1.msra.mxu1 %v2576_v42  ;;  %v2619_v21 = vld [vmem:[%s5257_s11 + $0x3a8] sm:$0xff]  ;;  %v2538_v42 = vld [vmem:[%s5257_s11 + $0x120] sm:$0xff] }
 0x54a   :  { %2664 = vmatprep.subr.mxu0 %v2511_v23  ;;  %2735 = vmatprep.subr.mxu1 %v2575_v44  ;;  %v2618_v23 = vld [vmem:[%s5257_s11 + $0x3a0] sm:$0xff]  ;;  %v2537_v44 = vld [vmem:[%s5257_s11 + $0x118] sm:$0xff] }
 0x54b   :  { %2665 = vmatpush1.msra.mxu0 %v2510_v24  ;;  %2736 = vmatpush1.msra.mxu1 %v2574_v46  ;;  %v2617_v24 = vld [vmem:[%s5257_s11 + $0x398] sm:$0xff]  ;;  %v2536_v46 = vld [vmem:[%s5257_s11 + $0x110] sm:$0xff] }
 0x54c   :  { %2666 = vmatprep.subr.mxu0 %v2509_v29  ;;  %2737 = vmatprep.subr.mxu1 %v2573_v48  ;;  %v2616_v29 = vld [vmem:[%s5257_s11 + $0x390] sm:$0xff]  ;;  %v2535_v48 = vld [vmem:[%s5257_s11 + $0x108] sm:$0xff] }
 0x54d   :  { %2667 = vmatpush1.msra.mxu0 %v2508_v31  ;;  %2738 = vmatpush1.msra.mxu1 %v2572_v50  ;;  %v2615_v31 = vld [vmem:[%s5257_s11 + $0x388] sm:$0xff] }
 0x54e   :  { %2668 = vmatprep.subr.mxu0 %v2507_v35  ;;  %2739 = vmatprep.subr.mxu1 %v2571_v52  ;;  %v2614_v35 = vld [vmem:[%s5257_s11 + $0x380] sm:$0xff]  ;;  %v2607_v50 = vld [vmem:[%s5257_s11 + $0x348] sm:$0xff]  ;;  %v2605_v52 = vld [vmem:[%s5257_s11 + $0x338] sm:$0xff] }
 0x54f   :  { %2669 = vmatpush1.msra.mxu0 %v2506_v37  ;;  %2740 = vmatpush1.msra.mxu1 %v2570_v54  ;;  %v2613_v37 = vld [vmem:[%s5257_s11 + $0x378] sm:$0xff]  ;;  %v2603_v54 = vld [vmem:[%s5257_s11 + $0x328] sm:$0xff] }
 0x550   :  { %2670 = vmatprep.subr.mxu0 %v2505_v39  ;;  %2741 = vmatprep.subr.mxu1 %v2569_v26  ;;  %v2612_v39 = vld [vmem:[%s5257_s11 + $0x370] sm:$0xff]  ;;  %v2601_v26 = vld [vmem:[%s5257_s11 + $0x318] sm:$0xff] }
 0x551   :  { %2671 = vmatpush1.msra.mxu0 %v2504_v41  ;;  %2742 = vmatpush1.msra.mxu1 %v2568_v33  ;;  %v2611_v41 = vld [vmem:[%s5257_s11 + $0x368] sm:$0xff] }
 0x552   :  { %2672 = vmatprep.subr.mxu0 %v2503_v43  ;;  %2743 = vmatprep.subr.mxu1 %v2567_v56  ;;  %v2610_v43 = vld [vmem:[%s5257_s11 + $0x360] sm:$0xff]  ;;  %v2599_v33 = vld [vmem:[%s5257_s11 + $0x308] sm:$0xff] }
 0x553   :  { %2673 = vmatpush1.msra.mxu0 %v2502_v45  ;;  %2744 = vmatpush1.msra.mxu1 %v2566_v58  ;;  %v2609_v45 = vld [vmem:[%s5257_s11 + $0x358] sm:$0xff]  ;;  %v2192_v56 = vld [vmem:[%s5258_s10] sm:$0xf] }
 0x554   :  { %2674 = vmatprep.subr.mxu0 %v2565_v47  ;;  %2745 = vmatprep.subr.mxu1 %v2629_v60  ;;  %v2608_v47 = vld [vmem:[%s5257_s11 + $0x350] sm:$0xff]  ;;  %v2201_v58 = vrot.slane %v2192_v56, %v4445_v16 }
 0x555   :  { %2675 = vmatpush2.msra.mxu0 %v2564_v49  ;;  %2746 = vmatpush2.msra.mxu1 %v2628_v62  ;;  %v2534_v49 = vld [vmem:[%s5257_s11 + $0x100] sm:$0xff] }
 0x556   :  { %2676 = vmatprep.subr.mxu0 %v2563_v51  ;;  %2747 = vmatprep.subr.mxu1 %v2627_v0  ;;  %v2606_v51 = vld [vmem:[%s5257_s11 + $0x340] sm:$0xff] }
 0x557   :  { %2677 = vmatpush2.msra.mxu0 %v2562_v53  ;;  %2748 = vmatpush2.msra.mxu1 %v2626_v2  ;;  %v2604_v53 = vld [vmem:[%s5257_s11 + $0x330] sm:$0xff] }
 0x558   :  { %2678 = vmatprep.subr.mxu0 %v2561_v25  ;;  %2749 = vmatprep.subr.mxu1 %v2625_v4  ;;  %v2602_v25 = vld [vmem:[%s5257_s11 + $0x320] sm:$0xff] }
 0x559   :  { %2679 = vmatpush2.msra.mxu0 %v2560_v32  ;;  %2750 = vmatpush2.msra.mxu1 %v2624_v6  ;;  %v2600_v32 = vld [vmem:[%s5257_s11 + $0x310] sm:$0xff]  ;;  %v2209_v6 = vrot.slane %v2192_v56, %v1781_v17 }
 0x55a   :  { %2680 = vmatprep.subr.mxu0 %v2559_v55  ;;  %2751 = vmatprep.subr.mxu1 %v2623_v9  ;;  %v2598_v55 = vld [vmem:[%s5257_s11 + $0x300] sm:$0xff] }
 0x55b   :  { %2681 = vmatpush2.msra.mxu0 %v2558_v57  ;;  %2752 = vmatpush2.msra.mxu1 %v2622_v11  ;;  %v2197_v57 = vrot.slane %v2192_v56, %v4438_v13 }
 0x55c   :  { %2682 = vmatprep.subr.mxu0 %v2557_v59  ;;  %2753 = vmatprep.subr.mxu1 %v2621_v15 }
 0x55d   :  { %2683 = vmatpush2.msra.mxu0 %v2556_v61  ;;  %2754 = vmatpush2.msra.mxu1 %v2620_v19 }
 0x55e   :  { %2684 = vmatprep.subr.mxu0 %v2555_v63  ;;  %2755 = vmatprep.subr.mxu1 %v2619_v21 }
 0x55f   :  { %2685 = vmatpush2.msra.mxu0 %v2554_v1  ;;  %2756 = vmatpush2.msra.mxu1 %v2618_v23 }
 0x560   :  { %2686 = vmatprep.subr.mxu0 %v2553_v3  ;;  %2757 = vmatprep.subr.mxu1 %v2617_v24 }
 0x561   :  { %2687 = vmatpush2.msra.mxu0 %v2552_v5  ;;  %2758 = vmatpush2.msra.mxu1 %v2616_v29  ;;  %v2205_v5 = vrot.slane %v2192_v56, %v1777_v14 }
 0x562   :  { %2688 = vmatprep.subr.mxu0 %v2551_v7  ;;  %2759 = vmatprep.subr.mxu1 %v2615_v31 }
 0x563   :  { %2689 = vmatpush2.msra.mxu0 %v2550_v10  ;;  %2760 = vmatpush2.msra.mxu1 %v2614_v35 }
 0x564   :  { %2690 = vmatprep.subr.mxu0 %v2549_v12  ;;  %2761 = vmatprep.subr.mxu1 %v2613_v37 }
 0x565   :  { %2691 = vmatpush2.msra.mxu0 %v2548_v18  ;;  %2762 = vmatpush2.msra.mxu1 %v2612_v39 }
 0x566   :  { %2692 = vmatprep.subr.mxu0 %v2547_v20  ;;  %2763 = vmatprep.subr.mxu1 %v2611_v41 }
 0x567   :  { %2693 = vmatpush2.msra.mxu0 %v2546_v22  ;;  %2764 = vmatpush2.msra.mxu1 %v2610_v43  ;;  %v2630_v22 = vld [vmem:[%s5259_s12] sm:$0x3] }
 0x568   :  { %2694 = vmatprep.subr.mxu0 %v2545_v27  ;;  %2765 = vmatprep.subr.mxu1 %v2609_v45  ;;  %v2635_v8 = vrot.slane %v2630_v22, %v4438_v13  ;;  %v2639_v17 = vrot.slane %v2630_v22, %v4445_v16 }
 0x569   :  { %2695 = vmatpush2.msra.mxu0 %v2544_v28  ;;  %2766 = vmatpush2.msra.mxu1 %v2608_v47 }
 0x56a   :  { %2696 = vmatprep.subr.mxu0 %v2543_v30  ;;  %2767 = vmatprep.subr.mxu1 %v2607_v50 }
 0x56b   :  { %2697 = vmatpush2.msra.mxu0 %v2542_v34  ;;  %2768 = vmatpush2.msra.mxu1 %v2606_v51 }
 0x56c   :  { %2698 = vmatprep.subr.mxu0 %v2541_v36  ;;  %2769 = vmatprep.subr.mxu1 %v2605_v52 }
 0x56d   :  { %2699 = vmatpush2.msra.mxu0 %v2540_v38  ;;  %2770 = vmatpush2.msra.mxu1 %v2604_v53 }
 0x56e   :  { %2700 = vmatprep.subr.mxu0 %v2539_v40  ;;  %2771 = vmatprep.subr.mxu1 %v2603_v54 }
 0x56f   :  { %2701 = vmatpush2.msra.mxu0 %v2538_v42  ;;  %2772 = vmatpush2.msra.mxu1 %v2602_v25 }
 0x570   :  { %2702 = vmatprep.subr.mxu0 %v2537_v44  ;;  %2773 = vmatprep.subr.mxu1 %v2601_v26 }
 0x571   :  { %2703 = vmatpush2.msra.mxu0 %v2536_v46  ;;  %2774 = vmatpush2.msra.mxu1 %v2600_v32 }
 0x572   :  { %2704 = vmatprep.subr.mxu0 %v2535_v48  ;;  %2775 = vmatprep.subr.mxu1 %v2599_v33 }
 0x573   :  { %2705 = vmatpush2.msra.mxu0 %v2534_v49  ;;  %2776 = vmatpush2.msra.mxu1 %v2598_v55 }
 0x5b2   :  { %v2280_v59 = vpop.f32.mrf.mxu0  ;;  %v2351_v60 = vpop.f32.mrf.mxu1 }
 0x5b3   :  { %v2281_v61 = vadd.f32 %v2280_v59, %v2197_v57 }
 0x5b4   :  { %v2282_v62 = vpop.f32.mrf.mxu0  ;;  %v2353_v1 = vpop.f32.mrf.mxu1 }
 0x5b5   :  { %v2283_v63 = vadd.f32 %v2282_v62, %v2201_v58  ;;  %v2352_v0 = vadd.f32 %v2351_v60, %v2281_v61 }
 0x5b7   :  { %v2354_v2 = vadd.f32 %v2353_v1, %v2283_v63  ;;  %v2498_v4 = vmax.f32 %v2352_v0, 0.0 }
 0x5b9   :  { %v2499_v3 = vmax.f32 %v2354_v2, 0.0 }
 0x5bb   :  { %2706 = vmatprep.mubr.f32.mxu0 %v2499_v3 }
 0x5bc   :  { %2707 = vmatmul.mubr.f32.vlgmr.msra.gmra.mxu0 %v2498_v4 }
 0x5f3   :  { %v2422_v7 = vpop.f32.mrf.mxu0  ;;  %v2493_v9 = vpop.f32.mrf.mxu1 }
 0x5f4   :  { %v2423_v10 = vadd.f32 %v2422_v7, %v2205_v5 }
 0x5f5   :  { %v2424_v11 = vpop.f32.mrf.mxu0  ;;  %v2495_v18 = vpop.f32.mrf.mxu1 }
 0x5f6   :  { %v2425_v12 = vadd.f32 %v2424_v11, %v2209_v6  ;;  %v2494_v15 = vadd.f32 %v2493_v9, %v2423_v10 }
 0x5f8   :  { %v2496_v19 = vadd.f32 %v2495_v18, %v2425_v12  ;;  %v2500_v21 = vmax.f32 %v2494_v15, 0.0 }
 0x5fa   :  { %v2501_v20 = vmax.f32 %v2496_v19, 0.0 }
 0x5fc   :  { %2777 = vmatprep.mubr.f32.mxu1 %v2501_v20 }
 0x5fd   :  { %2778 = vmatmul.mubr.f32.vlgmr.msra.gmra.mxu1 %v2500_v21 }
 0x67c   :  { %v2708_v14 = vpop.f32.mrf.mxu0 }
 0x67d   :  { %v2709_v24 = vadd.f32 %v2708_v14, %v2635_v8 }
 0x67e   :  { %v2710_v23 = vpop.f32.mrf.mxu0 }
 0x67f   :  { %v2711_v28 = vadd.f32 %v2710_v23, %v2639_v17 }
 0x6bd   :  { %v2779_v27 = vpop.f32.mrf.mxu1 }
 0x6be   :  { %v2780_v30 = vadd.f32 %v2779_v27, %v2709_v24 }
 0x6bf   :  { %v2781_v29 = vpop.f32.mrf.mxu1 }
 0x6c0   :  { %v2782_v31 = vadd.f32 %v2781_v29, %v2711_v28 }
 0x6c2   :  { %v2786_v34 = vcombine.low %v2780_v30, %v2782_v31 }
 0x6c4   :  { %2831 = vst.sshfl [vmem:[%s5260_s13] sm:$0x33 pattern:$0x76325410] %v2786_v34 }

</bundles_post_ra>
